<compile_context>
chip_gen: v5e
topology: v5e:2x2
jax: 0.10.0
libtpu: 0.0.40
codegen_flags: <defaults>
</compile_context>

<pallas_src>
import functools
import math

import jax
import jax.numpy as jnp
from jax import lax
from jax.experimental import pallas as pl
from jax.experimental.pallas import tpu as pltpu

VGG_LOSS_WEIGHTS = (1.0 / 32, 1.0 / 16, 1.0 / 8, 1.0 / 4, 1.0)

_VGG_CFG = [
    (3, 64), (64, 64),                                  # conv1_1, conv1_2
    (64, 128), (128, 128),                              # conv2_1, conv2_2
    (128, 256), (256, 256), (256, 256), (256, 256),     # conv3_1..conv3_4
    (256, 512), (512, 512), (512, 512), (512, 512),     # conv4_1..conv4_4
    (512, 512),                                         # conv5_1
]


def _round_up(x, m):
  return (x + m - 1) // m * m


@functools.lru_cache(maxsize=None)
def _physical_vmem_bytes():
  try:
    info = pltpu.get_tpu_info()
    cap = getattr(info, "vmem_capacity_bytes", None)
    if cap:
      return int(cap)
  except Exception:
    pass
  return 64 * 1024 * 1024                    # conservative (v7x-sized) fallback


def _vmem_limit():
  # 128 MiB parts (v5e/v6e): raise the scoped limit; 64 MiB (v7x): stay at 48.
  return (96 if _physical_vmem_bytes() >= (128 << 20) else 48) * 1024 * 1024


def _tile_budget():
  return (16 if _physical_vmem_bytes() >= (128 << 20) else 6) * 1024 * 1024


def _pick_row_tile(H, Wp, Cin, Cout):
  """Largest power-of-2 row tile dividing H that fits the per-tile budget."""
  budget = _tile_budget()
  per_row = Wp * (8 * Cout + 10 * Cin)       # f32 acc + operands + out buffers
  if H % 2:
    return H
  th = 2
  while th * 2 <= H and H % (th * 2) == 0 and (th * 2) * per_row <= budget:
    th *= 2
  return th


# ----------------------------------------------------------------------------
# 3x3 conv (SAME) + bias + ReLU (+ optional fused 2x2/stride-2 max-pool)
# ----------------------------------------------------------------------------
def _conv3x3_kernel(x_ref, top_ref, bot_ref, w_ref, b_ref, o_ref, *,
                    TH, W, Wp, Cout, pack, pool, Wp_out):
  i = pl.program_id(1)
  last = pl.num_programs(1) - 1
  dt = o_ref.dtype
  cin = x_ref.shape[-1]

  main = x_ref[...].reshape(TH * Wp, cin)                  # (TH*Wp, Cin)
  zrow = jnp.zeros((Wp, cin), main.dtype)
  top = jnp.where(i > 0, top_ref[...].reshape(Wp, cin), zrow)
  bot = jnp.where(i < last, bot_ref[...].reshape(Wp, cin), zrow)
  # Row-flattened window: [filler, row i*TH-1, rows i*TH..i*TH+TH-1,
  #                        row i*TH+TH, filler]  -> (TH+4)*Wp rows.
  xw = jnp.concatenate([zrow, top, main, bot, zrow], axis=0)

  # Tap (ky, kx) contribution to flat output m lives at xw[m + (ky+1)*Wp+kx-1].
  M = TH * Wp
  acc = None
  if pack == 9:                                   # im2col: one K = 9*Cin matmul
    cols = []
    for kx in range(3):
      xk = xw[Wp + kx - 1: Wp + kx - 1 + (TH + 2) * Wp]
      for ky in range(3):
        cols.append(xk[ky * Wp: ky * Wp + M])
      del xk
    a = jnp.concatenate(cols, axis=-1)                       # (M, 9*Cin)
    acc = jnp.dot(a, w_ref[...], preferred_element_type=jnp.float32)
  elif pack == 3:                                 # ky taps packed: K = 3*Cin
    for kx in range(3):
      xk = xw[Wp + kx - 1: Wp + kx - 1 + (TH + 2) * Wp]      # hoisted kx shift
      a = jnp.concatenate([xk[0:M], xk[Wp:Wp + M], xk[2 * Wp:2 * Wp + M]],
                          axis=-1)                           # (M, 3*Cin)
      d = jnp.dot(a, w_ref[kx], preferred_element_type=jnp.float32)
      acc = d if acc is None else acc + d
  else:                                           # K = Cin already deep enough
    for kx in range(3):
      xk = xw[Wp + kx - 1: Wp + kx - 1 + (TH + 2) * Wp]      # hoisted kx shift
      for ky in range(3):
        d = jnp.dot(xk[ky * Wp: ky * Wp + M], w_ref[ky, kx],
                    preferred_element_type=jnp.float32)
        acc = d if acc is None else acc + d

  y = jnp.maximum(acc + b_ref[...], 0.0).astype(dt).reshape(TH, Wp, Cout)

  if pool:
    TH2, Wo = TH // 2, W // 2
    pr = jnp.max(y.reshape(TH2, 2, Wp, Cout), axis=1)        # 2x1 row max
    pc = pr[:, 1:1 + 2 * Wo, :].reshape(TH2, Wo, 2, Cout)    # pair data cols
    pooled = jnp.max(pc, axis=2)                             # 1x2 col max
    o_ref[...] = jnp.concatenate(
        [jnp.zeros((TH2, 1, Cout), dt), pooled,
         jnp.zeros((TH2, Wp_out - Wo - 1, Cout), dt)], axis=1)
  else:
    o_ref[...] = y
    # Re-zero the padding columns so the next layer / L1 can rely on them.
    o_ref[:, 0:1, :] = jnp.zeros((TH, 1, Cout), dt)
    o_ref[:, W + 1:Wp, :] = jnp.zeros((TH, Wp - W - 1, Cout), dt)


def conv3x3_relu(xp, W, w, b, *, pool=False, row_tile=None):
  """3x3 SAME conv + bias + ReLU (+ optional fused 2x2/stride-2 max-pool).

  xp: (N, H, Wp, Cin) bf16 width-padded (col 0 and cols >= W+1 are zero).
  w:  (3, 3, Cin, Cout) HWIO;  b: (Cout,).
  Returns (N, H_out, Wp_out, Cout) bf16 in the same width-padded layout.
  """
  N, H, Wp, Cin = xp.shape
  Cout = w.shape[-1]
  assert Wp % 8 == 0 and Wp >= W + 2
  if pool:
    assert H % 2 == 0 and W % 2 == 0

  xp = xp.astype(jnp.bfloat16)
  wb = w.astype(jnp.bfloat16)
  b2 = b.reshape(1, Cout).astype(jnp.float32)

  if Cin <= 8:                        # conv1_1: full im2col, K = 9*Cin
    pack = 9
    wk = wb.transpose(1, 0, 2, 3).reshape(9 * Cin, Cout)
    w_spec = pl.BlockSpec((9 * Cin, Cout), lambda n, i: (0, 0))
  elif Cin <= 128:                    # K = 3*Cin fills the MXU depth better
    pack = 3
    wk = wb.transpose(1, 0, 2, 3).reshape(3, 3 * Cin, Cout)
    w_spec = pl.BlockSpec((3, 3 * Cin, Cout), lambda n, i: (0, 0, 0))
  else:                               # K = Cin >= 256 already deep
    pack = 1
    wk = wb
    w_spec = pl.BlockSpec((3, 3, Cin, Cout), lambda n, i: (0, 0, 0, 0))

  TH = row_tile if row_tile is not None else _pick_row_tile(H, Wp, Cin, Cout)
  assert H % TH == 0 and (not pool or TH % 2 == 0)
  n_rows = H // TH

  if pool:
    Ho, Wo = H // 2, W // 2
    Wp_out = _round_up(Wo + 2, 8)
    out_shape = jax.ShapeDtypeStruct((N, Ho, Wp_out, Cout), jnp.bfloat16)
    out_spec = pl.BlockSpec((None, TH // 2, Wp_out, Cout),
                            lambda n, i: (n, i, 0, 0))
  else:
    Wp_out = Wp
    out_shape = jax.ShapeDtypeStruct((N, H, Wp, Cout), jnp.bfloat16)
    out_spec = pl.BlockSpec((None, TH, Wp, Cout), lambda n, i: (n, i, 0, 0))

  kernel = functools.partial(_conv3x3_kernel, TH=TH, W=W, Wp=Wp, Cout=Cout,
                             pack=pack, pool=pool, Wp_out=Wp_out)

  # TODO(synk): lane-dense (W folded into lanes) stores for the Cout=64 layers.
  # TODO(synk): pl.Buffered(1) weight specs / explicit MRB accumulation on v7x.
  return pl.pallas_call(
      kernel,
      out_shape=out_shape,
      grid=(N, n_rows),
      in_specs=[
          pl.BlockSpec((None, TH, Wp, Cin), lambda n, i: (n, i, 0, 0)),
          pl.BlockSpec((None, 1, Wp, Cin),
                       lambda n, i: (n, jnp.maximum(i * TH - 1, 0), 0, 0)),
          pl.BlockSpec((None, 1, Wp, Cin),
                       lambda n, i: (n, jnp.minimum((i + 1) * TH, H - 1), 0, 0)),
          w_spec,
          pl.BlockSpec((1, Cout), lambda n, i: (0, 0)),
      ],
      out_specs=out_spec,
      compiler_params=pltpu.CompilerParams(
          dimension_semantics=("parallel", "parallel"),
          vmem_limit_bytes=_vmem_limit()),
  )(xp, xp, xp, wk, b2)


# ----------------------------------------------------------------------------
# L1 loss between the x-half and y-half of a batch-concatenated feature
# ----------------------------------------------------------------------------
def _l1_sum_kernel(x_ref, y_ref, o_ref):
  @pl.when(pl.program_id(0) == 0)
  def _init():
    o_ref[...] = jnp.zeros_like(o_ref)

  d = jnp.abs(x_ref[...].astype(jnp.float32) - y_ref[...].astype(jnp.float32))
  o_ref[...] += jnp.sum(d, keepdims=True)


def l1_pair_mean(fx, fy, true_count):
  """Mean |fx - fy| with the divisor `true_count` (zero padding contributes 0)."""
  L = 512
  fx = fx.reshape(-1)
  fy = fy.reshape(-1)
  K = fx.shape[0]
  pad = (-K) % (8 * L)
  if pad:                               # identical zero tails -> diff 0
    fx = jnp.pad(fx, (0, pad))
    fy = jnp.pad(fy, (0, pad))
    K += pad
  R = K // L
  TR = math.gcd(R, 1024)                # multiple of 8 since R % 8 == 0
  fx2 = fx.reshape(R, L)
  fy2 = fy.reshape(R, L)
  s = pl.pallas_call(
      _l1_sum_kernel,
      out_shape=jax.ShapeDtypeStruct((1, 1), jnp.float32),
      grid=(R // TR,),
      in_specs=[pl.BlockSpec((TR, L), lambda i: (i, 0)),
                pl.BlockSpec((TR, L), lambda i: (i, 0))],
      out_specs=pl.BlockSpec((1, 1), lambda i: (0, 0)),
      compiler_params=pltpu.CompilerParams(
          dimension_semantics=("arbitrary",), vmem_limit_bytes=_vmem_limit()),
  )(fx2, fy2)
  return s[0, 0] / true_count


# ----------------------------------------------------------------------------
# VGG19 feature extractor (torchvision vgg19.features up to relu5_1)
# ----------------------------------------------------------------------------
def init_vgg19_params(key):
  """Deterministic synthetic parameters with the real VGG19 shapes."""
  params = []
  for cin, cout in _VGG_CFG:
    key, kw, kb = jax.random.split(key, 3)
    scale = (2.0 / (9.0 * cin)) ** 0.5
    w = (scale * jax.random.normal(kw, (3, 3, cin, cout), jnp.float32)
         ).astype(jnp.bfloat16)
    b = 0.01 * jax.random.normal(kb, (cout,), jnp.float32)
    params.append((w, b))
  return params


def vgg19_features(params, x_nhwc):
  """x_nhwc: (NB, H, W, 3).  Returns [(feat, true_W), ...] for relu{1..5}_1,
  each feat in the width-padded (NB, H_i, Wp_i, C_i) bf16 layout."""
  _, _, W, _ = x_nhwc.shape
  Wp0 = _round_up(W + 2, 8)
  h = jnp.pad(x_nhwc.astype(jnp.bfloat16),
              ((0, 0), (0, 0), (1, Wp0 - W - 1), (0, 0)))
  s = (h, W)

  def conv(i, s, pool=False):
    hh, ww = s
    w, b = params[i]
    out = conv3x3_relu(hh, ww, w, b, pool=pool)
    return (out, ww // 2 if pool else ww)

  s = conv(0, s);                                        h1 = s   # relu1_1
  s = conv(1, s, pool=True); s = conv(2, s);             h2 = s   # relu2_1
  s = conv(3, s, pool=True); s = conv(4, s);             h3 = s   # relu3_1
  s = conv(5, s); s = conv(6, s)
  s = conv(7, s, pool=True); s = conv(8, s);             h4 = s   # relu4_1
  s = conv(9, s); s = conv(10, s)
  s = conv(11, s, pool=True); s = conv(12, s);           h5 = s   # relu5_1
  return [h1, h2, h3, h4, h5]


def vgg_loss(params, x_nchw, y_nchw):
  """VGGLoss.forward: sum_i w_i * L1(vgg(x)_i, vgg(y)_i).  Inputs are NCHW."""
  N = x_nchw.shape[0]
  xy = jnp.concatenate([x_nchw, y_nchw], axis=0)     # run x and y together
  xy = jnp.transpose(xy, (0, 2, 3, 1))
  feats = vgg19_features(params, xy)
  loss = jnp.float32(0.0)
  for w_i, (f, w_true) in zip(VGG_LOSS_WEIGHTS, feats):
    _, hf, _, cf = f.shape
    true_count = N * hf * w_true * cf
    loss = loss + jnp.float32(w_i) * l1_pair_mean(f[:N], f[N:], true_count)
  return loss


# ----------------------------------------------------------------------------
# Pure-JAX references + self-tests
# ----------------------------------------------------------------------------
def _conv_ref(x, w, b, pool):
  y = lax.conv_general_dilated(
      x.astype(jnp.float32), w.astype(jnp.float32), (1, 1), "SAME",
      dimension_numbers=("NHWC", "HWIO", "NHWC"),
      precision=lax.Precision.HIGHEST) + b.reshape(1, 1, 1, -1)
  y = jnp.maximum(y, 0.0)
  if pool:
    n, hh, ww, c = y.shape
    y = y.reshape(n, hh // 2, 2, ww // 2, 2, c).max(axis=(2, 4))
  return y


def _check_conv(key, Cin, Cout, H, W, pool, row_tile):
  kx, kw, kb = jax.random.split(key, 3)
  x = jax.random.normal(kx, (2, H, W, Cin), jnp.float32).astype(jnp.bfloat16)
  scale = (2.0 / (9.0 * Cin)) ** 0.5
  w = (scale * jax.random.normal(kw, (3, 3, Cin, Cout), jnp.float32)
       ).astype(jnp.bfloat16)
  b = 0.05 * jax.random.normal(kb, (Cout,), jnp.float32)

  Wp = _round_up(W + 2, 8)
  xp = jnp.pad(x, ((0, 0), (0, 0), (1, Wp - W - 1), (0, 0)))
  out = conv3x3_relu(xp, W, w, b, pool=pool, row_tile=row_tile)

  W_out = W // 2 if pool else W
  assert jnp.all(out[:, :, 0, :] == 0), "left pad column not zero"
  assert jnp.all(out[:, :, W_out + 1:, :] == 0), "right pad columns not zero"

  got = out[:, :, 1:W_out + 1, :].astype(jnp.float32)
  want = _conv_ref(x, w, b, pool)
  assert jnp.allclose(got, want, atol=3e-2, rtol=3e-2), (
      f"conv mismatch Cin={Cin} Cout={Cout} pool={pool} row_tile={row_tile} "
      f"max_err={jnp.max(jnp.abs(got - want))}")


def _self_tests(key):
  ks = jax.random.split(key, 8)
  # pack=9 (Cin=3): single row tile and multi-tile (halo) paths
  _check_conv(ks[0], 3, 64, 16, 16, False, None)
  _check_conv(ks[1], 3, 64, 16, 12, False, 4)
  # pack=3 (Cin=64) with fused 2x2 maxpool, multi-tile
  _check_conv(ks[2], 64, 64, 16, 16, True, 4)
  # pack=3 (Cin=128), non-pooled, width not a multiple of 8
  _check_conv(ks[3], 128, 128, 8, 12, False, 2)
  # pack=1 (Cin=256) without and with fused pool
  _check_conv(ks[4], 256, 128, 8, 8, False, 4)
  _check_conv(ks[5], 256, 128, 8, 8, True, 2)

  # L1 reduction
  a = jax.random.normal(ks[6], (2, 4, 8, 64), jnp.float32).astype(jnp.bfloat16)
  c = jax.random.normal(ks[7], (2, 4, 8, 64), jnp.float32).astype(jnp.bfloat16)
  got = l1_pair_mean(a, c, a.size)
  want = jnp.mean(jnp.abs(a.astype(jnp.float32) - c.astype(jnp.float32)))
  assert jnp.allclose(got, want, atol=1e-3, rtol=1e-3), "l1 mismatch"


def _vgg_features_ref(params, x_nhwc):
  def conv(i, h):
    w, b = params[i]
    y = lax.conv_general_dilated(
        h, w.astype(jnp.float32), (1, 1), "SAME",
        dimension_numbers=("NHWC", "HWIO", "NHWC"),
        precision=lax.Precision.HIGHEST) + b.reshape(1, 1, 1, -1)
    return jnp.maximum(y, 0.0)

  def pool(h):
    n, hh, ww, c = h.shape
    return h.reshape(n, hh // 2, 2, ww // 2, 2, c).max(axis=(2, 4))

  h = x_nhwc.astype(jnp.float32)
  h = conv(0, h); f1 = h
  h = conv(1, h); h = pool(h); h = conv(2, h); f2 = h
  h = conv(3, h); h = pool(h); h = conv(4, h); f3 = h
  h = conv(5, h); h = conv(6, h); h = conv(7, h); h = pool(h); h = conv(8, h)
  f4 = h
  h = conv(9, h); h = conv(10, h); h = conv(11, h); h = pool(h); h = conv(12, h)
  f5 = h
  return [f1, f2, f3, f4, f5]


def _vgg_loss_ref(params, x_nchw, y_nchw):
  fx = _vgg_features_ref(params, jnp.transpose(x_nchw, (0, 2, 3, 1)))
  fy = _vgg_features_ref(params, jnp.transpose(y_nchw, (0, 2, 3, 1)))
  loss = 0.0
  for w_i, a, c in zip(VGG_LOSS_WEIGHTS, fx, fy):
    loss = loss + w_i * jnp.mean(jnp.abs(a - c))
  return loss


# ----------------------------------------------------------------------------
# Demo
# ----------------------------------------------------------------------------
if __name__ == "__main__":
  key = jax.random.PRNGKey(0)
  kt, kx, ky, kp = jax.random.split(key, 4)

  _self_tests(kt)

  # Small NCHW inputs (VGG requires 3 input channels).
  N, C, H, W = 2, 3, 16, 16
  x = jax.random.normal(kx, (N, C, H, W), jnp.float32)
  y = jax.random.normal(ky, (N, C, H, W), jnp.float32)
  # Quantize once so the Pallas path and the f32 reference see identical inputs.
  x = x.astype(jnp.bfloat16).astype(jnp.float32)
  y = y.astype(jnp.bfloat16).astype(jnp.float32)
  params = init_vgg19_params(kp)

  loss = jax.jit(vgg_loss)(params, x, y)
  loss = jax.block_until_ready(loss)
  assert loss.shape == () and bool(jnp.isfinite(loss))

  ref = _vgg_loss_ref(params, x, y)
  assert jnp.allclose(loss, ref, rtol=0.15, atol=1e-3), (loss, ref)

  print("KERNEL_OK")
</pallas_src>

<mosaic_0001>
module attributes {stable_mosaic.version = 11 : i64} {
  func.func @_conv3x3_kernel(%arg0: i32, %arg1: i32, %arg2: memref<1x16x24x3xbf16, #tpu.memory_space<vmem>>, %arg3: memref<1x1x24x3xbf16, #tpu.memory_space<vmem>>, %arg4: memref<1x1x24x3xbf16, #tpu.memory_space<vmem>>, %arg5: memref<27x64xbf16, #tpu.memory_space<vmem>>, %arg6: memref<1x64xf32, #tpu.memory_space<vmem>>, %arg7: memref<1x16x24x64xbf16, #tpu.memory_space<vmem>>) attributes {dimension_semantics = [#tpu.dimension_semantics<parallel>, #tpu.dimension_semantics<parallel>], iteration_bounds = array<i64: 2, 1>, scalar_prefetch = 0 : i64, scratch_operands = 0 : i64, tpu.core_type = #tpu.core_type<tc>, window_params = [{transform_indices = @transform_0, window_bounds = array<i64: 1, 16, 24, 3>}, {transform_indices = @transform_1, window_bounds = array<i64: 1, 1, 24, 3>}, {transform_indices = @transform_2, window_bounds = array<i64: 1, 1, 24, 3>}, {pipeline_mode = #tpu.pipeline_mode<synchronous>, transform_indices = @transform_3, window_bounds = array<i64: 27, 64>}, {pipeline_mode = #tpu.pipeline_mode<synchronous>, transform_indices = @transform_4, window_bounds = array<i64: 1, 64>}, {transform_indices = @transform_5, window_bounds = array<i64: 1, 16, 24, 64>}]} {
    %c0 = arith.constant 0 : index
    %c0_0 = arith.constant 0 : index
    %c0_1 = arith.constant 0 : index
    %c0_2 = arith.constant 0 : index
    %0 = vector.load %arg2[%c0, %c0_0, %c0_1, %c0_2] : memref<1x16x24x3xbf16, #tpu.memory_space<vmem>>, vector<1x16x24x3xbf16>
    %1 = vector.shape_cast %0 : vector<1x16x24x3xbf16> to vector<16x24x3xbf16>
    %2 = vector.shape_cast %1 : vector<16x24x3xbf16> to vector<384x3xbf16>
    %cst = arith.constant 0.000000e+00 : bf16
    %3 = vector.broadcast %cst : bf16 to vector<24x3xbf16>
    %c0_i32 = arith.constant 0 : i32
    %4 = arith.cmpi sgt, %arg1, %c0_i32 : i32
    %c0_3 = arith.constant 0 : index
    %c0_4 = arith.constant 0 : index
    %c0_5 = arith.constant 0 : index
    %c0_6 = arith.constant 0 : index
    %5 = vector.load %arg3[%c0_3, %c0_4, %c0_5, %c0_6] : memref<1x1x24x3xbf16, #tpu.memory_space<vmem>>, vector<1x1x24x3xbf16>
    %6 = vector.shape_cast %5 : vector<1x1x24x3xbf16> to vector<1x24x3xbf16>
    %7 = vector.shape_cast %6 : vector<1x24x3xbf16> to vector<24x3xbf16>
    %8 = arith.select %4, %7, %3 : vector<24x3xbf16>
    %c0_i32_7 = arith.constant 0 : i32
    %9 = arith.cmpi slt, %arg1, %c0_i32_7 : i32
    %c0_8 = arith.constant 0 : index
    %c0_9 = arith.constant 0 : index
    %c0_10 = arith.constant 0 : index
    %c0_11 = arith.constant 0 : index
    %10 = vector.load %arg4[%c0_8, %c0_9, %c0_10, %c0_11] : memref<1x1x24x3xbf16, #tpu.memory_space<vmem>>, vector<1x1x24x3xbf16>
    %11 = vector.shape_cast %10 : vector<1x1x24x3xbf16> to vector<1x24x3xbf16>
    %12 = vector.shape_cast %11 : vector<1x24x3xbf16> to vector<24x3xbf16>
    %13 = arith.select %9, %12, %3 : vector<24x3xbf16>
    %14 = tpu.concatenate %3, %8, %2, %13, %3 in 0 : vector<24x3xbf16>, vector<24x3xbf16>, vector<384x3xbf16>, vector<24x3xbf16>, vector<24x3xbf16> -> vector<480x3xbf16>
    %15 = vector.extract_strided_slice %14 {offsets = [23, 0], sizes = [432, 3], strides = [1, 1]} : vector<480x3xbf16> to vector<432x3xbf16>
    %16 = vector.extract_strided_slice %15 {offsets = [0, 0], sizes = [384, 3], strides = [1, 1]} : vector<432x3xbf16> to vector<384x3xbf16>
    %17 = vector.extract_strided_slice %15 {offsets = [24, 0], sizes = [384, 3], strides = [1, 1]} : vector<432x3xbf16> to vector<384x3xbf16>
    %18 = vector.extract_strided_slice %15 {offsets = [48, 0], sizes = [384, 3], strides = [1, 1]} : vector<432x3xbf16> to vector<384x3xbf16>
    %19 = vector.extract_strided_slice %14 {offsets = [24, 0], sizes = [432, 3], strides = [1, 1]} : vector<480x3xbf16> to vector<432x3xbf16>
    %20 = vector.extract_strided_slice %19 {offsets = [0, 0], sizes = [384, 3], strides = [1, 1]} : vector<432x3xbf16> to vector<384x3xbf16>
    %21 = vector.extract_strided_slice %19 {offsets = [24, 0], sizes = [384, 3], strides = [1, 1]} : vector<432x3xbf16> to vector<384x3xbf16>
    %22 = vector.extract_strided_slice %19 {offsets = [48, 0], sizes = [384, 3], strides = [1, 1]} : vector<432x3xbf16> to vector<384x3xbf16>
    %23 = vector.extract_strided_slice %14 {offsets = [25, 0], sizes = [432, 3], strides = [1, 1]} : vector<480x3xbf16> to vector<432x3xbf16>
    %24 = vector.extract_strided_slice %23 {offsets = [0, 0], sizes = [384, 3], strides = [1, 1]} : vector<432x3xbf16> to vector<384x3xbf16>
    %25 = vector.extract_strided_slice %23 {offsets = [24, 0], sizes = [384, 3], strides = [1, 1]} : vector<432x3xbf16> to vector<384x3xbf16>
    %26 = vector.extract_strided_slice %23 {offsets = [48, 0], sizes = [384, 3], strides = [1, 1]} : vector<432x3xbf16> to vector<384x3xbf16>
    %27 = tpu.concatenate %16, %17, %18, %20, %21, %22, %24, %25, %26 in 1 : vector<384x3xbf16>, vector<384x3xbf16>, vector<384x3xbf16>, vector<384x3xbf16>, vector<384x3xbf16>, vector<384x3xbf16>, vector<384x3xbf16>, vector<384x3xbf16>, vector<384x3xbf16> -> vector<384x27xbf16>
    %c0_12 = arith.constant 0 : index
    %c0_13 = arith.constant 0 : index
    %28 = vector.load %arg5[%c0_12, %c0_13] : memref<27x64xbf16, #tpu.memory_space<vmem>>, vector<27x64xbf16>
    %cst_14 = arith.constant dense<0.000000e+00> : vector<384x64xf32>
    %29 = tpu.matmul %27, %28, %cst_14 {dimension_numbers = #tpu.dot_dimension_numbers<[1], [0], [0], [1], [0, 0, 1, 1], [], []>} : vector<384x27xbf16>, vector<27x64xbf16>, vector<384x64xf32> -> vector<384x64xf32>
    %c0_15 = arith.constant 0 : index
    %c0_16 = arith.constant 0 : index
    %30 = vector.load %arg6[%c0_15, %c0_16] : memref<1x64xf32, #tpu.memory_space<vmem>>, vector<1x64xf32>
    %31 = vector.broadcast %30 : vector<1x64xf32> to vector<384x64xf32>
    %32 = arith.addf %29, %31 : vector<384x64xf32>
    %cst_17 = arith.constant 0.000000e+00 : f32
    %33 = vector.broadcast %cst_17 : f32 to vector<384x64xf32>
    %34 = arith.maximumf %32, %33 : vector<384x64xf32>
    %35 = arith.truncf %34 : vector<384x64xf32> to vector<384x64xbf16>
    %36 = vector.shape_cast %35 : vector<384x64xbf16> to vector<16x24x64xbf16>
    %c0_18 = arith.constant 0 : index
    %c0_19 = arith.constant 0 : index
    %c0_20 = arith.constant 0 : index
    %c0_21 = arith.constant 0 : index
    %37 = vector.load %arg7[%c0_18, %c0_19, %c0_20, %c0_21] : memref<1x16x24x64xbf16, #tpu.memory_space<vmem>>, vector<1x16x24x64xbf16>
    %38 = vector.shape_cast %37 : vector<1x16x24x64xbf16> to vector<16x24x64xbf16>
    %39 = vector.shape_cast %36 : vector<16x24x64xbf16> to vector<1x16x24x64xbf16>
    tpu.vector_store %arg7[%c0_18, %c0_19, %c0_20, %c0_21], %39 {strides = array<i32>} : memref<1x16x24x64xbf16, #tpu.memory_space<vmem>>, vector<1x16x24x64xbf16>,
    %cst_22 = arith.constant 0.000000e+00 : bf16
    %40 = vector.broadcast %cst_22 : bf16 to vector<16x1x64xbf16>
    %c0_23 = arith.constant 0 : index
    %c0_24 = arith.constant 0 : index
    %c0_25 = arith.constant 0 : index
    %c0_26 = arith.constant 0 : index
    %41 = vector.load %arg7[%c0_23, %c0_24, %c0_25, %c0_26] : memref<1x16x24x64xbf16, #tpu.memory_space<vmem>>, vector<1x16x1x64xbf16>
    %42 = vector.shape_cast %41 : vector<1x16x1x64xbf16> to vector<16x1x64xbf16>
    %43 = vector.shape_cast %40 : vector<16x1x64xbf16> to vector<1x16x1x64xbf16>
    tpu.vector_store %arg7[%c0_23, %c0_24, %c0_25, %c0_26], %43 {strides = array<i32>} : memref<1x16x24x64xbf16, #tpu.memory_space<vmem>>, vector<1x16x1x64xbf16>,
    %cst_27 = arith.constant 0.000000e+00 : bf16
    %44 = vector.broadcast %cst_27 : bf16 to vector<16x7x64xbf16>
    %c0_28 = arith.constant 0 : index
    %c0_29 = arith.constant 0 : index
    %c17 = arith.constant 17 : index
    %c0_30 = arith.constant 0 : index
    %45 = vector.load %arg7[%c0_28, %c0_29, %c17, %c0_30] : memref<1x16x24x64xbf16, #tpu.memory_space<vmem>>, vector<1x16x7x64xbf16>
    %46 = vector.shape_cast %45 : vector<1x16x7x64xbf16> to vector<16x7x64xbf16>
    %47 = vector.shape_cast %44 : vector<16x7x64xbf16> to vector<1x16x7x64xbf16>
    tpu.vector_store %arg7[%c0_28, %c0_29, %c17, %c0_30], %47 {strides = array<i32>} : memref<1x16x24x64xbf16, #tpu.memory_space<vmem>>, vector<1x16x7x64xbf16>,
    return
  }
  func.func @transform_0(%arg0: i32, %arg1: i32) -> (i32, i32, i32, i32) {
    %c0_i32 = arith.constant 0 : i32
    %c0_i32_0 = arith.constant 0 : i32
    %c0_i32_1 = arith.constant 0 : i32
    return %arg0, %arg1, %c0_i32, %c0_i32_0 : i32, i32, i32, i32
  }
  func.func @transform_1(%arg0: i32, %arg1: i32) -> (i32, i32, i32, i32) {
    %c16_i32 = arith.constant 16 : i32
    %0 = arith.muli %arg1, %c16_i32 : i32
    %c1_i32 = arith.constant 1 : i32
    %1 = arith.subi %0, %c1_i32 : i32
    %c0_i32 = arith.constant 0 : i32
    %2 = arith.maxsi %1, %c0_i32 : i32
    %c0_i32_0 = arith.constant 0 : i32
    %c0_i32_1 = arith.constant 0 : i32
    %c0_i32_2 = arith.constant 0 : i32
    return %arg0, %2, %c0_i32_0, %c0_i32_1 : i32, i32, i32, i32
  }
  func.func @transform_2(%arg0: i32, %arg1: i32) -> (i32, i32, i32, i32) {
    %c1_i32 = arith.constant 1 : i32
    %0 = arith.addi %arg1, %c1_i32 : i32
    %c16_i32 = arith.constant 16 : i32
    %1 = arith.muli %0, %c16_i32 : i32
    %c15_i32 = arith.constant 15 : i32
    %2 = arith.minsi %1, %c15_i32 : i32
    %c0_i32 = arith.constant 0 : i32
    %c0_i32_0 = arith.constant 0 : i32
    %c0_i32_1 = arith.constant 0 : i32
    return %arg0, %2, %c0_i32, %c0_i32_0 : i32, i32, i32, i32
  }
  func.func @transform_3(%arg0: i32, %arg1: i32) -> (i32, i32) {
    %c0_i32 = arith.constant 0 : i32
    %c0_i32_0 = arith.constant 0 : i32
    %c0_i32_1 = arith.constant 0 : i32
    return %c0_i32, %c0_i32_0 : i32, i32
  }
  func.func @transform_4(%arg0: i32, %arg1: i32) -> (i32, i32) {
    %c0_i32 = arith.constant 0 : i32
    %c0_i32_0 = arith.constant 0 : i32
    %c0_i32_1 = arith.constant 0 : i32
    return %c0_i32, %c0_i32_0 : i32, i32
  }
  func.func @transform_5(%arg0: i32, %arg1: i32) -> (i32, i32, i32, i32) {
    %c0_i32 = arith.constant 0 : i32
    %c0_i32_0 = arith.constant 0 : i32
    %c0_i32_1 = arith.constant 0 : i32
    return %arg0, %arg1, %c0_i32, %c0_i32_0 : i32, i32, i32, i32
  }
}

</mosaic_0001>

<bundles_post_ra>
// kernel: tpu_custom_call.1
= control target key start
LH: loop header
LB: loop body
LE: loop exit
PB: predicated region body
PF: predicated region fallthrough
CT: control target
= control target key end

     0   :  { %10 = vsyncpa [#allocation3], 0  ;;  %s5401_s0 = inlined_call_operand.vmem [shape: bf16[2,16,24,3], index: 0, kind: input, shape index: {}]   ;;  %s5402_s1 = inlined_call_operand.vmem [shape: bf16[2,16,24,3], index: 1, kind: input, shape index: {}]   ;;  %s5403_s2 = inlined_call_operand.vmem [shape: bf16[2,16,24,3], index: 2, kind: input, shape index: {}]   ;;  %s5404_s3 = inlined_call_operand.vmem [shape: bf16[27,64], index: 3, kind: input, shape index: {}]   ;;  %s5405_s4 = inlined_call_operand.vmem [shape: f32[1,64], index: 4, kind: input, shape index: {}]   ;;  %s5406_s5 = inlined_call_operand.hbm [shape: bf16[2,16,24,64], index: 5, kind: output, shape index: {}]  }
   0x1   :  { %12 = vsyncpa [#allocation3 + $0x1], 0  ;;  %s3083_s18 = smov 0   ;;  %s3085_s19 = smov 0  }
   0x2   :  { %s3087_s20 = smov 0   ;;  %s3089_s1 = smov 0  }
   0x3   :  { %s3091_s2 = smov 0   ;;  %s3093_s21 = smov 0  }
   0x4 LB: > { %s2694_s22 = sadd.s32 4294967295, %s3039_s21   ;;  %s2695_s23 = sadd.s32 4294967294, %s3039_s21   ;;  %s3039_s21 = sphi %s3093_s21, %s18_s21   ;;  %s3035_s2 = sphi %s3091_s2, %s5743_s2   ;;  %s3031_s1 = sphi %s3089_s1, %s5742_s1   ;;  %s3027_s20 = sphi %s3087_s20, %s5741_s20   ;;  %s3023_s19 = sphi %s3085_s19, %s5740_s19   ;;  %s3019_s18 = sphi %s3083_s18, %s5739_s18  }
   0x5   : > { %s30_s24 = sadd.s32 1, %s3035_s2  ;;  %s181_s25 = sadd.s32 1, %s3027_s20 }
   0x6   : > { %p32_p0 = scmp.ge.s32.totalorder %s30_s24, 2  ;;  %p191_p1 = scmp.ne.s32.totalorder %s3027_s20, %s3023_s19 }
   0x7   : > { %p192_p2 = scmp.eq.s32.totalorder %s2694_s22, 1  ;;  %p197_p3 = scmp.ne.s32.totalorder %s3023_s19, %s3019_s18 }
   0x8   : > { %s5745_s24 = smov (%p32_p0, %s30_s24), 0  ;;  %p198_p5 = scmp.eq.s32.totalorder %s2695_s23, 1 }
   0x9   : > { %p3123_p4 = por %p192_p2, %p191_p1  ;;  %s176_s27 = ssub.s32 %s3035_s2, %s5745_s24 }
   0xa   : > { %p2698_p6 = scmp.ge.s32.totalorder %s3039_s21, 1  ;;  %p179_p7 = scmp.eq.s32.totalorder %s176_s27, 0 }
   0xb   : > { %p3130_p8 = por %p198_p5, %p197_p3  ;;  %p276_p9 = scmp.lt.s32.totalorder %s3039_s21, 3 }
   0xc   : > { %s3136_s29 = scalar_select %p179_p7, %s3027_s20, %s181_s25  }
   0xd   : > { %p277_p10 = pnand %p2698_p6, %p276_p9 }
   0xf   : > { %280 = sbr.rel (%p277_p10) target bundleno = 845 (0x34d), region = 40 }
  0x14   : > { %p336_p11 = scmp.lt.s32.totalorder %s3031_s1, 1  ;;  %v3041_v0 = vmov 0   ;;  %vm586_vm0 = vcmask 1043456   ;;  %s3042_s10 = smov 3   ;;  %vm743_vm1 = vsmask.f32 7424 }
  0x15   : > { %v453_v1 = vunpack.c.l.b16 %v3041_v0  ;;  %s3043_s11 = smov 6   ;;  %s3044_s12 = smov 9   ;;  %vm992_vm2 = vsmask.f32 3328  ;;  %vm1212_vm3 = vcmask 1046528   ;;  %vm1312_vm4 = vcmask 1042432  }
  0x16   : > { %s337_s30 = scalar_select %p336_p11, %s3031_s1, 1  ;;  %vm1468_vm5 = vcmask 23552   ;;  %vm1519_vm6 = vcmask 48128   ;;  %vm1570_vm7 = vcmask 72704   ;;  %vm1621_vm8 = vcmask 97280  }
  0x17   : > { %v3140_v2 = vpack.c.b16 %v453_v1, %v453_v1  ;;  %s3045_s13 = smov 12   ;;  %s3046_s14 = smov 15   ;;  %vm1672_vm9 = vcmask 121856   ;;  %vm2168_vm10 = vcmask 1044480   ;;  %vm2169_vm11 = vcmask 1045504  }
  0x18   : > { %s2868_s6 = smul.u32 192, %s337_s30  ;;  %s3047_s15 = smov 18   ;;  %vm1723_vm12 = vcmask 146432   ;;  %vm1774_vm13 = vcmask 171008   ;;  %vm1825_vm14 = vcmask 195584  }
  0x19   : > { %5493 = vst [vmem:[#allocation5_spill] sm:$0xff] %v3140_v2  ;;  %v593_v8 = vrot.slane %v3140_v2, 4  ;;  %s3048_s16 = smov 21   ;;  %s3049_s17 = smov 24   ;;  %vm1884_vm15 = vsmask.f32 4352 }
  0x1a   : > { %s3145_s9 = scalar_lea.vmem %s5401_s0, %s2868_s6  ;;  %s332_s7 = sand.u32 1, %s3023_s19  }
  0x1b   : > { %v3148_v3 = vld [vmem:[%s3145_s9 + $0x18] sm:$0xff]  ;;  %v3151_v4 = vld [vmem:[%s3145_s9 + $0x20] sm:$0xff]  ;;  %v3154_v5 = vld [vmem:[%s3145_s9 + $0x8] sm:$0xff]  ;;  %s2981_s30 = scalar_lea.hbm %s5406_s5, 384 }
  0x1c   : > { %v3157_v6 = vld [vmem:[%s3145_s9 + $0x10] sm:$0xff]  ;;  %v3160_v7 = vld [vmem:[%s3145_s9] sm:$0xff]  ;;  %v600_v9 = vrot.slane %v3148_v3, 4  ;;  %v602_v10 = vrot.slane %v3151_v4, 4  ;;  %v596_v11 = vrot.slane %v3154_v5, 4  ;;  %v3167_v12 = vld [vmem:[%s3145_s9 + $0x28] sm:$0xff] }
  0x1d   : > { %v598_v13 = vrot.slane %v3157_v6, 4  ;;  %v594_v14 = vrot.slane %v3160_v7, 4  ;;  %v604_v18 = vrot.slane %v3167_v12, 4  ;;  %v3180_v20 = vld [vmem:[%s3145_s9 + $0x38] sm:$0xff]  ;;  %v3183_v21 = vld [vmem:[%s3145_s9 + $0x40] sm:$0xff]  ;;  %v3188_v24 = vld [vmem:[%s3145_s9 + $0x30] sm:$0xff] }
  0x1e   : > { %v603_v15 = vsel %vm586_vm0, %v600_v9, %v602_v10  ;;  %v608_v25 = vrot.slane %v3180_v20, 4  ;;  %v610_v26 = vrot.slane %v3183_v21, 4  ;;  %v606_v27 = vrot.slane %v3188_v24, 4  ;;  %v3198_v29 = vld [vmem:[%s3145_s9 + $0x50] sm:$0xff]  ;;  %v3201_v30 = vld [vmem:[%s3145_s9 + $0x58] sm:$0xff]  ;;  %v3206_v33 = vld [vmem:[%s3145_s9 + $0x48] sm:$0xff] }
  0x1f   : > { %650 = vrot.lane.b32.xlu2 %v603_v15, %s3042_s10  ;;  %v599_v16 = vsel %vm586_vm0, %v596_v11, %v598_v13  ;;  %v595_v17 = vsel %vm586_vm0, %v593_v8, %v594_v14  ;;  %v605_v19 = vsel %vm586_vm0, %v602_v10, %v604_v18  ;;  %v601_v22 = vsel %vm586_vm0, %v598_v13, %v600_v9  ;;  %v3216_v38 = vld [vmem:[%s3145_s9 + $0x68] sm:$0xff]  ;;  %v3219_v39 = vld [vmem:[%s3145_s9 + $0x70] sm:$0xff]  ;;  %v3224_v42 = vld [vmem:[%s3145_s9 + $0x60] sm:$0xff] }
  0x20   : > { %646 = vrot.lane.b32.xlu1 %v599_v16, %s3042_s10  ;;  %642 = vrot.lane.b32.xlu0 %v595_v17, %s3042_s10  ;;  %v597_v23 = vsel %vm586_vm0, %v594_v14, %v596_v11  ;;  %v611_v28 = vsel %vm586_vm0, %v608_v25, %v610_v26  ;;  %5494 = vst [vmem:[#allocation6_spill] sm:$0xff] %v3201_v30  ;;  %v614_v34 = vrot.slane %v3198_v29, 4  ;;  %v616_v35 = vrot.slane %v3201_v30, 4  ;;  %v3234_v47 = vld [vmem:[%s3145_s9 + $0x80] sm:$0xff]  ;;  %v3237_v48 = vld [vmem:[%s3145_s9 + $0x88] sm:$0xff] }
  0x21   : > { %v609_v31 = vsel %vm586_vm0, %v606_v27, %v608_v25  ;;  %v607_v32 = vsel %vm586_vm0, %v604_v18, %v606_v27  ;;  %v612_v36 = vrot.slane %v3206_v33, 4  ;;  %v620_v43 = vrot.slane %v3216_v38, 4  ;;  %5495 = vst [vmem:[#allocation7_spill] sm:$0xff] %v3237_v48  ;;  %v3242_v51 = vld [vmem:[%s3145_s9 + $0x78] sm:$0xff]  ;;  %v3255_v57 = vld [vmem:[%s3145_s9 + $0xa0] sm:$0xff]  ;;  %v3260_v60 = vld [vmem:[%s3145_s9 + $0x90] sm:$0xff] }
  0x22   : > { %v617_v37 = vsel %vm586_vm0, %v614_v34, %v616_v35  ;;  %v622_v44 = vrot.slane %v3219_v39, 4  ;;  %v618_v45 = vrot.slane %v3224_v42, 4  ;;  %v626_v52 = vrot.slane %v3234_v47, 4  ;;  %v3252_v56 = vld [vmem:[%s3145_s9 + $0x98] sm:$0xff]  ;;  %v3270_v1 = vld [vmem:[%s3145_s9 + $0xb0] sm:$0xff]  ;;  %v3278_v11 = vld [vmem:[%s3145_s9 + $0xa8] sm:$0xff] }
  0x23   : > { %v615_v40 = vsel %vm586_vm0, %v612_v36, %v614_v34  ;;  %v613_v41 = vsel %vm586_vm0, %v610_v26, %v612_v36  ;;  %v628_v53 = vrot.slane %v3237_v48, 4  ;;  %v624_v54 = vrot.slane %v3242_v51, 4  ;;  %v3273_v8 = vld [vmem:[%s3145_s9 + $0xb8] sm:$0xff] }
  0x24   : > { %v623_v46 = vsel %vm586_vm0, %v620_v43, %v622_v44  ;;  %v621_v49 = vsel %vm586_vm0, %v618_v45, %v620_v43  ;;  %v619_v50 = vsel %vm586_vm0, %v616_v35, %v618_v45  ;;  %v632_v61 = vrot.slane %v3252_v56, 4 }
  0x25   : > { %v629_v55 = vsel %vm586_vm0, %v626_v52, %v628_v53  ;;  %v627_v58 = vsel %vm586_vm0, %v624_v54, %v626_v52  ;;  %v625_v59 = vsel %vm586_vm0, %v622_v44, %v624_v54  ;;  %v634_v62 = vrot.slane %v3255_v57, 4 }
  0x26   : > { %v630_v63 = vrot.slane %v3260_v60, 4  ;;  %v638_v13 = vrot.slane %v3270_v1, 4  ;;  %v640_v14 = vrot.slane %v3273_v8, 4  ;;  %v636_v15 = vrot.slane %v3278_v11, 4 }
  0x27   : > { %652 = vrot.lane.b32.xlu2 %v605_v19, %s3042_s10  ;;  %v635_v0 = vsel %vm586_vm0, %v632_v61, %v634_v62  ;;  %v3337_v25 = vsel %vm586_vm0, 0, %v3140_v2  ;;  %v751_v35 = vshll.u32 %v3140_v2, 16  ;;  %v5420_v36 = vshll.u32 %v3154_v5, 16 }
  0x28   : > { %648 = vrot.lane.b32.xlu1 %v601_v22, %s3042_s10  ;;  %644 = vrot.lane.b32.xlu0 %v597_v23, %s3042_s10  ;;  %v633_v9 = vsel %vm586_vm0, %v630_v63, %v632_v61  ;;  %v631_v10 = vsel %vm586_vm0, %v628_v53, %v630_v63  ;;  %v641_v16 = vsel %vm586_vm0, %v638_v13, %v640_v14  ;;  %v746_v26 = vshll.u32 %v3337_v25, 16 }
  0x29   : > { %v639_v17 = vsel %vm586_vm0, %v636_v15, %v638_v13  ;;  %v637_v18 = vsel %vm586_vm0, %v634_v62, %v636_v15  ;;  %5496 = vst [vmem:[#allocation8_spill] sm:$0xff] %v3337_v25  ;;  %v5416_v54 = vshrl.u32 %v3160_v7, 16  ;;  %v5409_v63 = vshll.u32 %v3151_v4, 16 }
  0x2a   : > { %v748_v34 = vrot.slane %v746_v26, 1  ;;  %v5410_v26 = vshll.u32 %v3167_v12, 16 }
  0x2f   : > { %658 = vrot.lane.b32.xlu2 %v611_v28, %s3042_s10 }
  0x30   : > { %656 = vrot.lane.b32.xlu1 %v609_v31, %s3042_s10  ;;  %654 = vrot.lane.b32.xlu0 %v607_v32, %s3042_s10  ;;  %v744_v32 = vshrl.u32 %v3337_v25, 16  ;;  %v5567_v25 = vshll.u32 %v3157_v6, 16 }
  0x37   : > { %664 = vrot.lane.b32.xlu2 %v617_v37, %s3042_s10  ;;  %v749_v37 = vor.u32 %v748_v34, %v744_v32 }
  0x38   : > { %662 = vrot.lane.b32.xlu1 %v615_v40, %s3042_s10  ;;  %660 = vrot.lane.b32.xlu0 %v613_v41, %s3042_s10  ;;  %v3359_v40 = vrot.slane %v751_v35, 1  ;;  %v5413_v41 = vshll.u32 %v3160_v7, 16  ;;  %v5412_v35 = vshrl.u32 %v3148_v3, 16 }
  0x3a   : > { %5499 = vst [vmem:[#allocation11_spill] sm:$0xff] %v3359_v40  ;;  %v754_v52 = vsel %vm743_vm1, %v749_v37, %v3359_v40  ;;  %v761_v53 = vrot.slane %v5413_v41, 1  ;;  %v5414_v37 = vshrl.u32 %v3157_v6, 16  ;;  %v5422_v41 = vshrl.u32 %v3188_v24, 16 }
  0x3c   : > { %v765_v62 = vor.u32 %v5416_v54, %v761_v53 }
  0x3f   : > { %670 = vrot.lane.b32.xlu2 %v623_v46, %s3042_s10  ;;  %v769_v46 = vrot.slane %v5420_v36, 1 }
  0x40   : > { %668 = vrot.lane.b32.xlu1 %v621_v49, %s3042_s10  ;;  %666 = vrot.lane.b32.xlu0 %v619_v50, %s3042_s10  ;;  %v5421_v49 = vshrl.u32 %v3154_v5, 16  ;;  %v5407_v50 = vshll.u32 %v3157_v6, 16 }
  0x42   : > { %v777_v61 = vrot.slane %v5407_v50, 1 }
  0x44   : > { %v781_v50 = vor.u32 %v5414_v37, %v777_v61 }
  0x47   : > { %676 = vrot.lane.b32.xlu2 %v629_v55, %s3042_s10  ;;  %v3379_v55 = vsel %vm586_vm0, %v3140_v2, 0  ;;  %vm2095_vm0 = vcmask 220160  }
  0x48   : > { %674 = vrot.lane.b32.xlu1 %v627_v58, %s3042_s10  ;;  %672 = vrot.lane.b32.xlu0 %v625_v59, %s3042_s10  ;;  %5501 = vst [vmem:[#allocation13_spill] sm:$0xff] %v3379_v55  ;;  %v755_v58 = vshrl.u32 %v3140_v2, 16  ;;  %v773_v59 = vor.u32 %v5421_v49, %v769_v46 }
  0x4a   : > { %v3405_v15 = vsel %vm743_vm1, %v773_v59, %v777_v61 }
  0x4f   : > { %682 = vrot.lane.b32.xlu2 %v635_v0, %s3042_s10 }
  0x50   : > { %680 = vrot.lane.b32.xlu1 %v633_v9, %s3042_s10  ;;  %678 = vrot.lane.b32.xlu0 %v631_v10, %s3042_s10  ;;  %v3397_v9 = vor.u32 %v755_v58, %v3359_v40  ;;  %v5408_v10 = vshll.u32 %v3148_v3, 16  ;;  %v5417_v58 = vshll.u32 %v3188_v24, 16  ;;  %v5433_v40 = vshrl.u32 %v3206_v33, 16 }
  0x52   : > { %5503 = vst [vmem:[#allocation15_spill] sm:$0xff] %v3397_v9  ;;  %v762_v32 = vsel %vm743_vm1, %v3397_v9, %v761_v53  ;;  %v785_v34 = vrot.slane %v5408_v10, 1  ;;  %v801_v53 = vrot.slane %v5410_v26, 1  ;;  %v5419_v26 = vshll.u32 %v3183_v21, 16 }
  0x53   : > { %v5431_v9 = vshrl.u32 %v3198_v29, 16 }
  0x54   : > { %v3452_v37 = vsel %vm743_vm1, %v781_v50, %v785_v34  ;;  %v825_v54 = vrot.slane %v5419_v26, 1 }
  0x57   : > { %688 = vrot.lane.b32.xlu2 %v641_v16, %s3042_s10  ;;  %v770_v16 = vsel %vm743_vm1, %v765_v62, %v769_v46  ;;  %v5415_v46 = vshll.u32 %v3180_v20, 16  ;;  %v789_v62 = vor.u32 %v5412_v35, %v785_v34  ;;  %v809_v35 = vrot.slane %v5417_v58, 1 }
  0x58   : > { %686 = vrot.lane.b32.xlu1 %v639_v17, %s3042_s10  ;;  %684 = vrot.lane.b32.xlu0 %v637_v18, %s3042_s10  ;;  %v793_v17 = vrot.slane %v5409_v63, 1  ;;  %v5411_v18 = vshrl.u32 %v3151_v4, 16  ;;  %v5418_v63 = vshrl.u32 %v3180_v20, 16  ;;  %v5428_v58 = vshll.u32 %v3206_v33, 16 }
  0x59   : > { %v813_v50 = vor.u32 %v5422_v41, %v809_v35 }
  0x5a   : > { %v3449_v61 = vsel %vm743_vm1, %v789_v62, %v793_v17 }
  0x5f   : > { %695 = vrot.lane.b32.xlu2 %v3157_v6, %s3043_s11 }
  0x60   : > { %693 = vrot.lane.b32.xlu1 %v3154_v5, %s3043_s11  ;;  %690 = vrot.lane.b32.xlu0 %v640_v14, %s3042_s10  ;;  %s2867_s10 = smul.u32 192, %s332_s7 }
  0x67   : > { %701 = vrot.lane.b32.xlu2 %v3167_v12, %s3043_s11 }
  0x68   : > { %699 = vrot.lane.b32.xlu1 %v3151_v4, %s3043_s11  ;;  %697 = vrot.lane.b32.xlu0 %v3148_v3, %s3043_s11 }
  0x6f   : > { %707 = vrot.lane.b32.xlu2 %v3183_v21, %s3043_s11 }
  0x70   : > { %705 = vrot.lane.b32.xlu1 %v3180_v20, %s3043_s11  ;;  %703 = vrot.lane.b32.xlu0 %v3188_v24, %s3043_s11 }
  0x77   : > { %713 = vrot.lane.b32.xlu2 %v3201_v30, %s3043_s11 }
  0x78   : > { %711 = vrot.lane.b32.xlu1 %v3198_v29, %s3043_s11  ;;  %709 = vrot.lane.b32.xlu0 %v3206_v33, %s3043_s11 }
  0x79   : > { %v3315_v19 = vpop.permute.xlu2 %650 }
  0x7f   : > { %719 = vrot.lane.b32.xlu2 %v3219_v39, %s3043_s11 }
  0x80   : > { %717 = vrot.lane.b32.xlu1 %v3216_v38, %s3043_s11  ;;  %715 = vrot.lane.b32.xlu0 %v3224_v42, %s3043_s11 }
  0x81   : > { %v3323_v22 = vpop.permute.xlu2 %652 }
  0x87   : > { %725 = vrot.lane.b32.xlu2 %v3237_v48, %s3043_s11 }
  0x88   : > { %723 = vrot.lane.b32.xlu1 %v3234_v47, %s3043_s11  ;;  %721 = vrot.lane.b32.xlu0 %v3242_v51, %s3043_s11 }
  0x89   : > { %v3331_v23 = vpop.permute.xlu2 %658 }
  0x8f   : > { %731 = vrot.lane.b32.xlu2 %v3255_v57, %s3043_s11 }
  0x90   : > { %729 = vrot.lane.b32.xlu1 %v3252_v56, %s3043_s11  ;;  %727 = vrot.lane.b32.xlu0 %v3260_v60, %s3043_s11 }
  0x91   : > { %v3344_v27 = vpop.permute.xlu2 %664 }
  0x92   : > { %v3346_v28 = vpop.permute.xlu1 %646  ;;  %v3348_v31 = vpop.permute.xlu0 %642 }
  0x93   : > { %5497 = vst [vmem:[#allocation9_spill] sm:$0xff] %v3346_v28  ;;  %v5517_v28 = vshll.u32 %v3216_v38, 16 }
  0x94   : > { %5498 = vst [vmem:[#allocation10_spill] sm:$0xff] %v3348_v31 }
  0x95   : > { %v865_v31 = vrot.slane %v5517_v28, 1  ;;  %v5440_v28 = vshll.u32 %v3234_v47, 16 }
  0x97   : > { %737 = vrot.lane.b32.xlu2 %v3273_v8, %s3043_s11 }
  0x98   : > { %735 = vrot.lane.b32.xlu1 %v3270_v1, %s3043_s11  ;;  %733 = vrot.lane.b32.xlu0 %v3278_v11, %s3043_s11 }
  0x99   : > { %v3362_v43 = vpop.permute.xlu2 %670 }
  0x9a   : > { %v3364_v44 = vpop.permute.xlu1 %648  ;;  %v3366_v45 = vpop.permute.xlu0 %644 }
  0x9b   : > { %5500 = vst [vmem:[#allocation12_spill] sm:$0xff] %v3366_v45  ;;  %v5436_v45 = vshll.u32 %v3219_v39, 16 }
  0x9f   : > { %942 = vrot.lane.b32.xlu2 %v754_v52, %s3044_s12  ;;  %v797_v52 = vor.u32 %v5411_v18, %v793_v17  ;;  %v5429_v17 = vshll.u32 %v3198_v29, 16 }
  0xa0   : > { %741 = vrot.lane.b32.xlu1 %v3379_v55, %s3043_s11  ;;  %739 = vrot.lane.b32.xlu0 %v3140_v2, %s3043_s11  ;;  %v5432_v55 = vshll.u32 %v3201_v30, 16  ;;  %s4991_s11 = scalar_lea.vmem [#allocation2], %s2867_s10 }
  0xa1   : > { %v3394_v0 = vpop.permute.xlu2 %676  ;;  %v3443_v18 = vsel %vm743_vm1, %v797_v52, %v801_v53  ;;  %v841_v41 = vrot.slane %v5429_v17, 1 }
  0xa2   : > { %5502 = vst [vmem:[#allocation14_spill] sm:$0xff] %v3394_v0  ;;  %v3400_v13 = vpop.permute.xlu1 %656  ;;  %v3402_v14 = vpop.permute.xlu0 %654  ;;  %v5566_v0 = vshrl.u32 %v3157_v6, 16 }
  0xa3   : > { %5504 = vst [vmem:[#allocation16_spill] sm:$0xff] %v3400_v13 }
  0xa4   : > { %5505 = vst [vmem:[#allocation17_spill] sm:$0xff] %v3402_v14 }
  0xa7   : > { %948 = vrot.lane.b32.xlu2 %v3405_v15, %s3044_s12 }
  0xa8   : > { %946 = vrot.lane.b32.xlu1 %v770_v16, %s3044_s12  ;;  %944 = vrot.lane.b32.xlu0 %v762_v32, %s3044_s12  ;;  %v817_v32 = vrot.slane %v5415_v46, 1  ;;  %v5426_v46 = vshrl.u32 %v3167_v12, 16 }
  0xa9   : > { %v3428_v59 = vpop.permute.xlu2 %682 }
  0xaa   : > { %5506 = vst [vmem:[#allocation18_spill] sm:$0xff] %v3428_v59  ;;  %v3434_v10 = vpop.permute.xlu1 %662  ;;  %v3436_v16 = vpop.permute.xlu0 %660  ;;  %v821_v52 = vor.u32 %v5418_v63, %v817_v32  ;;  %v805_v62 = vor.u32 %v5426_v46, %v801_v53  ;;  %v3481_v49 = vsel %vm743_vm1, %v813_v50, %v817_v32  ;;  %v833_v46 = vrot.slane %v5428_v58, 1 }
  0xab   : > { %5507 = vst [vmem:[#allocation19_spill] sm:$0xff] %v3434_v10 }
  0xac   : > { %5508 = vst [vmem:[#allocation20_spill] sm:$0xff] %v3436_v16  ;;  %v3478_v36 = vsel %vm743_vm1, %v821_v52, %v825_v54  ;;  %v3488_v53 = vsel %vm743_vm1, %v805_v62, %v809_v35  ;;  %v5434_v52 = vshrl.u32 %v3183_v21, 16  ;;  %v845_v35 = vor.u32 %v5431_v9, %v841_v41 }
  0xad   : > { %5512 = vst [vmem:[#allocation24_spill] sm:$0xff] %v3478_v36  ;;  %v849_v62 = vrot.slane %v5432_v55, 1  ;;  %v837_v17 = vor.u32 %v5433_v40, %v833_v46  ;;  %v5435_v9 = vshrl.u32 %v3216_v38, 16  ;;  %v5518_v55 = vshll.u32 %v3224_v42, 16 }
  0xae   : > { %5513 = vst [vmem:[#allocation25_spill] sm:$0xff] %v3481_v49  ;;  %v829_v50 = vor.u32 %v5434_v52, %v825_v54 }
  0xaf   : > { %954 = vrot.lane.b32.xlu2 %v3443_v18, %s3044_s12  ;;  %v3524_v40 = vsel %vm743_vm1, %v845_v35, %v849_v62  ;;  %v3528_v52 = vsel %vm743_vm1, %v837_v17, %v841_v41  ;;  %v873_v35 = vrot.slane %v5436_v45, 1  ;;  %v5522_v41 = vshrl.u32 %v3201_v30, 16 }
  0xb0   : > { %952 = vrot.lane.b32.xlu1 %v3449_v61, %s3044_s12  ;;  %950 = vrot.lane.b32.xlu0 %v3452_v37, %s3044_s12  ;;  %5519 = vst [vmem:[#allocation29_spill] sm:$0xff] %v3524_v40 }
  0xb1   : > { %v3468_v34 = vpop.permute.xlu2 %688  ;;  %5520 = vst [vmem:[#allocation30_spill] sm:$0xff] %v3528_v52 }
  0xb2   : > { %5509 = vst [vmem:[#allocation21_spill] sm:$0xff] %v3468_v34  ;;  %v3473_v63 = vpop.permute.xlu1 %668  ;;  %v3475_v26 = vpop.permute.xlu0 %666 }
  0xb3   : > { %5510 = vst [vmem:[#allocation22_spill] sm:$0xff] %v3473_v63 }
  0xb4   : > { %5511 = vst [vmem:[#allocation23_spill] sm:$0xff] %v3475_v26  ;;  %v5438_v26 = vshrl.u32 %v3224_v42, 16 }
  0xb7   : > { %960 = vrot.lane.b32.xlu2 %v3478_v36, %s3044_s12 }
  0xb8   : > { %958 = vrot.lane.b32.xlu1 %v3481_v49, %s3044_s12  ;;  %956 = vrot.lane.b32.xlu0 %v3488_v53, %s3044_s12 }
  0xb9   : > { %v3506_v58 = vpop.permute.xlu2 %695 }
  0xba   : > { %5514 = vst [vmem:[#allocation26_spill] sm:$0xff] %v3506_v58  ;;  %v3512_v32 = vpop.permute.xlu1 %674  ;;  %v3514_v49 = vpop.permute.xlu0 %672  ;;  %v857_v58 = vrot.slane %v5518_v55, 1  ;;  %v869_v55 = vor.u32 %v5435_v9, %v865_v31  ;;  %v889_v9 = vrot.slane %v5440_v28, 1  ;;  %v5529_v28 = vshll.u32 %v3242_v51, 16 }
  0xbb   : > { %5515 = vst [vmem:[#allocation27_spill] sm:$0xff] %v3512_v32 }
  0xbc   : > { %5516 = vst [vmem:[#allocation28_spill] sm:$0xff] %v3514_v49  ;;  %v3531_v49 = vsel %vm743_vm1, %v829_v50, %v833_v46  ;;  %v861_v54 = vor.u32 %v5438_v26, %v857_v58  ;;  %v853_v46 = vor.u32 %v5522_v41, %v849_v62  ;;  %v3560_v32 = vsel %vm743_vm1, %v869_v55, %v873_v35 }
  0xbd   : > { %5521 = vst [vmem:[#allocation31_spill] sm:$0xff] %v3531_v49  ;;  %v5527_v41 = vshrl.u32 %v3154_v5, 16  ;;  %v881_v45 = vrot.slane %v5529_v28, 1  ;;  %v5532_v55 = vshrl.u32 %v3234_v47, 16  ;;  %v5445_v28 = vshll.u32 %v3252_v56, 16 }
  0xbe   : > { %v3563_v62 = vsel %vm743_vm1, %v861_v54, %v865_v31  ;;  %v3568_v63 = vsel %vm743_vm1, %v853_v46, %v857_v58  ;;  %v5441_v31 = vshrl.u32 %v3242_v51, 16  ;;  %v5442_v54 = vshrl.u32 %v3219_v39, 16 }
  0xbf   : > { %966 = vrot.lane.b32.xlu2 %v3524_v40, %s3044_s12  ;;  %5526 = vst [vmem:[#allocation35_spill] sm:$0xff] %v3563_v62  ;;  %v996_v17 = vrot.slane %v5527_v41, 4  ;;  %v893_v16 = vor.u32 %v5532_v55, %v889_v9  ;;  %v5533_v41 = vshll.u32 %v3160_v7, 16  ;;  %v5534_v46 = vshll.u32 %v3237_v48, 16 }
  0xc0   : > { %964 = vrot.lane.b32.xlu1 %v3528_v52, %s3044_s12  ;;  %962 = vrot.lane.b32.xlu0 %v3531_v49, %s3044_s12  ;;  %5528 = vst [vmem:[#allocation36_spill] sm:$0xff] %v3568_v63  ;;  %v5531_v52 = vshrl.u32 %v3160_v7, 16  ;;  %v885_v55 = vor.u32 %v5441_v31, %v881_v45  ;;  %v5543_v31 = vshll.u32 %v3148_v3, 16 }
  0xc1   : > { %v3549_v50 = vpop.permute.xlu2 %701  ;;  %v994_v58 = vrot.slane %v5533_v41, 5  ;;  %v897_v59 = vrot.slane %v5534_v46, 1  ;;  %v913_v46 = vrot.slane %v5445_v28, 1 }
  0xc2   : > { %5523 = vst [vmem:[#allocation32_spill] sm:$0xff] %v3549_v50  ;;  %v3554_v40 = vpop.permute.xlu1 %680  ;;  %v3556_v26 = vpop.permute.xlu0 %678  ;;  %v993_v34 = vrot.slane %v5531_v52, 4  ;;  %v1005_v14 = vrot.slane %v5543_v31, 5 }
  0xc3   : > { %5524 = vst [vmem:[#allocation33_spill] sm:$0xff] %v3554_v40  ;;  %v5530_v40 = vshll.u32 %v3154_v5, 16 }
  0xc4   : > { %5525 = vst [vmem:[#allocation34_spill] sm:$0xff] %v3556_v26  ;;  %v3590_v52 = vor.u32 %v994_v58, %v993_v34  ;;  %v3612_v58 = vsel %vm743_vm1, %v893_v16, %v897_v59 }
  0xc5   : > { %v997_v26 = vrot.slane %v5530_v40, 5  ;;  %5538 = vst [vmem:[#allocation40_spill] sm:$0xff] %v3612_v58  ;;  %v3631_v40 = vsel %vm743_vm1, %v885_v55, %v889_v9  ;;  %v5548_v9 = vshrl.u32 %v3237_v48, 16 }
  0xc6   : > { %5544 = vst [vmem:[#allocation41_spill] sm:$0xff] %v3631_v40 }
  0xc7   : > { %v3585_v5 = vor.u32 %v997_v26, %v996_v17  ;;  %972 = vrot.lane.b32.xlu2 %v3560_v32, %s3044_s12  ;;  %v877_v26 = vor.u32 %v5442_v54, %v873_v35  ;;  %v5539_v35 = vshll.u32 %v3260_v60, 16 }
  0xc8   : > { %970 = vrot.lane.b32.xlu1 %v3563_v62, %s3044_s12  ;;  %968 = vrot.lane.b32.xlu0 %v3568_v63, %s3044_s12  ;;  %v5540_v62 = vshrl.u32 %v3151_v4, 16 }
  0xc9   : > { %v3596_v7 = vpop.permute.xlu2 %707  ;;  %v3605_v17 = vsel %vm992_vm2, %v3590_v52, %v3585_v5  ;;  %v905_v54 = vrot.slane %v5539_v35, 1  ;;  %v3634_v35 = vsel %vm743_vm1, %v877_v26, %v881_v45  ;;  %v5547_v45 = vshrl.u32 %v3260_v60, 16 }
  0xca   : > { %5535 = vst [vmem:[#allocation37_spill] sm:$0xff] %v3596_v7  ;;  %v3607_v34 = vpop.permute.xlu1 %686  ;;  %v3609_v41 = vpop.permute.xlu0 %684  ;;  %v1008_v63 = vrot.slane %v5540_v62, 4  ;;  %v5542_v7 = vshrl.u32 %v3148_v3, 16 }
  0xcb   : > { %5536 = vst [vmem:[#allocation38_spill] sm:$0xff] %v3607_v34  ;;  %v5541_v34 = vshll.u32 %v3151_v4, 16 }
  0xcc   : > { %5537 = vst [vmem:[#allocation39_spill] sm:$0xff] %v3609_v41  ;;  %v1004_v28 = vrot.slane %v5542_v7, 4  ;;  %v5546_v7 = vshll.u32 %v3255_v57, 16 }
  0xcd   : > { %v1009_v10 = vrot.slane %v5541_v34, 5  ;;  %v5545_v34 = vshrl.u32 %v3252_v56, 16 }
  0xce   : > { %v3638_v4 = vor.u32 %v1005_v14, %v1004_v28  ;;  %v921_v41 = vrot.slane %v5546_v7, 1  ;;  %v5558_v7 = vshll.u32 %v3278_v11, 16 }
  0xcf   : > { %v3636_v62 = vor.u32 %v1009_v10, %v1008_v63  ;;  %978 = vrot.lane.b32.xlu2 %v3612_v58, %s3044_s12  ;;  %v917_v16 = vor.u32 %v5545_v34, %v913_v46  ;;  %v909_v63 = vor.u32 %v5547_v45, %v905_v54  ;;  %v901_v10 = vor.u32 %v5548_v9, %v897_v59 }
  0xd0   : > { %976 = vrot.lane.b32.xlu1 %v3631_v40, %s3044_s12  ;;  %974 = vrot.lane.b32.xlu0 %v3634_v35, %s3044_s12  ;;  %v5552_v59 = vshrl.u32 %v3180_v20, 16  ;;  %v5553_v9 = vshll.u32 %v3180_v20, 16  ;;  %v929_v13 = vrot.slane %v5558_v7, 1  ;;  %v5453_v20 = vshrl.u32 %v3255_v57, 16 }
  0xd1   : > { %v3657_v14 = vsel %vm992_vm2, %v3638_v4, %v3636_v62  ;;  %v3659_v31 = vpop.permute.xlu2 %713  ;;  %v3667_v34 = vsel %vm743_vm1, %v917_v16, %v921_v41  ;;  %v3675_v40 = vsel %vm743_vm1, %v909_v63, %v913_v46  ;;  %v3678_v28 = vsel %vm743_vm1, %v901_v10, %v905_v54 }
  0xd2   : > { %5549 = vst [vmem:[#allocation42_spill] sm:$0xff] %v3659_v31  ;;  %v3662_v55 = vpop.permute.xlu1 %693  ;;  %v3664_v26 = vpop.permute.xlu0 %690  ;;  %v1020_v45 = vrot.slane %v5552_v59, 4  ;;  %v1021_v58 = vrot.slane %v5553_v9, 5  ;;  %v5557_v16 = vshll.u32 %v3188_v24, 16  ;;  %v5450_v59 = vshrl.u32 %v3278_v11, 16 }
  0xd3   : > { %5550 = vst [vmem:[#allocation43_spill] sm:$0xff] %v3662_v55  ;;  %v5556_v55 = vshrl.u32 %v3188_v24, 16  ;;  %v5559_v54 = vshll.u32 %v3270_v1, 16  ;;  %v5457_v10 = vshrl.u32 %v3270_v1, 16 }
  0xd4   : > { %5551 = vst [vmem:[#allocation44_spill] sm:$0xff] %v3664_v26  ;;  %v1017_v31 = vrot.slane %v5557_v16, 5  ;;  %v3688_v9 = vor.u32 %v1021_v58, %v1020_v45 }
  0xd5   : > { %5554 = vst [vmem:[#allocation45_spill] sm:$0xff] %v3675_v40  ;;  %v1016_v26 = vrot.slane %v5556_v55, 4  ;;  %v937_v63 = vrot.slane %v5559_v54, 1  ;;  %v933_v55 = vor.u32 %v5450_v59, %v929_v13  ;;  %v5564_v54 = vshrl.u32 %v3198_v29, 16 }
  0xd6   : > { %5555 = vst [vmem:[#allocation46_spill] sm:$0xff] %v3678_v28  ;;  %v1000_v59 = vrot.slane %v5566_v0, 4 }
  0xd7   : > { %v3690_v46 = vor.u32 %v1017_v31, %v1016_v26  ;;  %984 = vrot.lane.b32.xlu2 %v3667_v34, %s3044_s12  ;;  %v925_v26 = vor.u32 %v5453_v20, %v921_v41  ;;  %v3718_v16 = vor.u32 %v5457_v10, %v937_v63  ;;  %v1001_v41 = vrot.slane %v5567_v25, 5 }
  0xd8   : > { %982 = vrot.lane.b32.xlu1 %v3675_v40, %s3044_s12  ;;  %980 = vrot.lane.b32.xlu0 %v3678_v28, %s3044_s12  ;;  %v1032_v40 = vrot.slane %v5564_v54, 4  ;;  %v5565_v28 = vshll.u32 %v3198_v29, 16  ;;  %v5568_v20 = vshrl.u32 %v3206_v33, 16  ;;  %v3733_v10 = vsel %vm743_vm1, %v933_v55, %v937_v63 }
  0xd9   : > { %v3704_v58 = vsel %vm992_vm2, %v3690_v46, %v3688_v9  ;;  %v3706_v31 = vpop.permute.xlu2 %719  ;;  %5563 = vst [vmem:[#allocation50_spill] sm:$0xff] %v3718_v16  ;;  %v3736_v54 = vsel %vm743_vm1, %v925_v26, %v929_v13  ;;  %v1002_v6 = vor.u32 %v1001_v41, %v1000_v59  ;;  %v5576_v55 = vshll.u32 %v3216_v38, 16 }
  0xda   : > { %5560 = vst [vmem:[#allocation47_spill] sm:$0xff] %v3706_v31  ;;  %v3712_v7 = vpop.permute.xlu1 %699  ;;  %v3714_v45 = vpop.permute.xlu0 %697  ;;  %v1033_v31 = vrot.slane %v5565_v28, 5  ;;  %v1028_v2 = vrot.slane %v5568_v20, 4  ;;  %v5574_v20 = vshll.u32 %v3167_v12, 16  ;;  %v5577_v41 = vshrl.u32 %v3224_v42, 16 }
  0xdb   : > { %5561 = vst [vmem:[#allocation48_spill] sm:$0xff] %v3712_v7  ;;  %v1045_v26 = vrot.slane %v5576_v55, 5  ;;  %v5584_v55 = vshll.u32 %v3183_v21, 16 }
  0xdc   : > { %5562 = vst [vmem:[#allocation49_spill] sm:$0xff] %v3714_v45  ;;  %v5569_v45 = vshll.u32 %v3206_v33, 16  ;;  %v3738_v7 = vor.u32 %v1033_v31, %v1032_v40  ;;  %v1013_v63 = vrot.slane %v5574_v20, 5  ;;  %v5575_v31 = vshrl.u32 %v3216_v38, 16 }
  0xdd   : > { %5570 = vst [vmem:[#allocation51_spill] sm:$0xff] %v3733_v10 }
  0xde   : > { %v1029_v36 = vrot.slane %v5569_v45, 5  ;;  %v1044_v59 = vrot.slane %v5575_v31, 4  ;;  %v1003_v45 = vsel %vm992_vm2, %v3585_v5, %v1002_v6  ;;  %v5583_v31 = vshrl.u32 %v3183_v21, 16 }
  0xdf   : > { %990 = vrot.lane.b32.xlu2 %v3718_v16, %s3044_s12  ;;  %v1040_v16 = vrot.slane %v5577_v41, 4 }
  0xe0   : > { %v3740_v28 = vor.u32 %v1029_v36, %v1028_v2  ;;  %988 = vrot.lane.b32.xlu1 %v3733_v10, %s3044_s12  ;;  %986 = vrot.lane.b32.xlu0 %v3736_v54, %s3044_s12  ;;  %v5573_v36 = vshrl.u32 %v3167_v12, 16  ;;  %v5578_v10 = vshll.u32 %v3224_v42, 16  ;;  %s2869_s12 = smul.u32 192, %s3031_s1  ;;  %s2567_s1 = sshll.u32 %s4991_s11, 4  ;;  %s2568_s1 = int_to_ptr.vmem [resolvable:$true] %s2567_s1 }
  0xe1   : > { %v3753_v0 = vpop.permute.xlu2 %725 }
  0xe2   : > { %v3751_v25 = vsel %vm992_vm2, %v3740_v28, %v3738_v7  ;;  %5571 = vst [vmem:[#allocation52_spill] sm:$0xff] %v3753_v0  ;;  %v3755_v13 = vpop.permute.xlu1 %705  ;;  %v3757_v2 = vpop.permute.xlu0 %703  ;;  %v1012_v40 = vrot.slane %v5573_v36, 4  ;;  %v1041_v0 = vrot.slane %v5578_v10, 5 }
  0xe3   : > { %5572 = vst [vmem:[#allocation53_spill] sm:$0xff] %v3755_v13  ;;  %v3773_v13 = vor.u32 %v1045_v26, %v1044_v59  ;;  %v1024_v59 = vrot.slane %v5583_v31, 4  ;;  %v1025_v26 = vrot.slane %v5584_v55, 5 }
  0xe4   : > { %v3775_v36 = vor.u32 %v1041_v0, %v1040_v16  ;;  %v1014_v12 = vor.u32 %v1013_v63, %v1012_v40  ;;  %v5581_v40 = vshrl.u32 %v3234_v47, 16  ;;  %v5582_v63 = vshll.u32 %v3234_v47, 16 }
  0xe5   : > { %v1026_v21 = vor.u32 %v1025_v26, %v1024_v59 }
  0xe6   : > { %v3785_v5 = vsel %vm992_vm2, %v3775_v36, %v3773_v13  ;;  %v1015_v0 = vsel %vm992_vm2, %v3636_v62, %v1014_v12  ;;  %v1007_v62 = vsel %vm992_vm2, %v1002_v6, %v3638_v4  ;;  %v5589_v4 = vshrl.u32 %v3201_v30, 16 }
  0xe7   : > { %1097 = vrot.lane.b32.xlu2 %v1003_v45, %s3045_s13  ;;  %v5585_v45 = vshrl.u32 %v3242_v51, 16  ;;  %v1027_v26 = vsel %vm992_vm2, %v3688_v9, %v1026_v21 }
  0xe8   : > { %1095 = vrot.lane.b32.xlu1 %v3605_v17, %s3045_s13  ;;  %1093 = vrot.lane.b32.xlu0 %v3590_v52, %s3045_s13  ;;  %v1056_v17 = vrot.slane %v5581_v40, 4  ;;  %v1057_v52 = vrot.slane %v5582_v63, 5  ;;  %v1036_v6 = vrot.slane %v5589_v4, 4  ;;  %v1019_v4 = vsel %vm992_vm2, %v1014_v12, %v3690_v46 }
  0xe9   : > { %v3787_v10 = vpop.permute.xlu2 %731  ;;  %v1052_v41 = vrot.slane %v5585_v45, 4  ;;  %v5593_v45 = vshrl.u32 %v3260_v60, 16 }
  0xea   : > { %5579 = vst [vmem:[#allocation54_spill] sm:$0xff] %v3787_v10  ;;  %v3789_v20 = vpop.permute.xlu1 %711  ;;  %v3791_v16 = vpop.permute.xlu0 %709  ;;  %v5586_v10 = vshll.u32 %v3242_v51, 16  ;;  %v1058_v49 = vor.u32 %v1057_v52, %v1056_v17  ;;  %v5591_v17 = vshrl.u32 %v3252_v56, 16  ;;  %v5592_v52 = vshll.u32 %v3252_v56, 16 }
  0xeb   : > { %5580 = vst [vmem:[#allocation55_spill] sm:$0xff] %v3789_v20 }
  0xec   : > { %v1053_v20 = vrot.slane %v5586_v10, 5  ;;  %v1069_v59 = vrot.slane %v5592_v52, 5  ;;  %v5595_v52 = vshrl.u32 %v3270_v1, 16 }
  0xee   : > { %v1054_v40 = vor.u32 %v1053_v20, %v1052_v41  ;;  %v5590_v20 = vshll.u32 %v3201_v30, 16  ;;  %v1064_v41 = vrot.slane %v5593_v45, 4  ;;  %v1080_v45 = vrot.slane %v5595_v52, 4 }
  0xef   : > { %1103 = vrot.lane.b32.xlu2 %v1015_v0, %s3045_s13 }
  0xf0   : > { %1101 = vrot.lane.b32.xlu1 %v3657_v14, %s3045_s13  ;;  %1099 = vrot.lane.b32.xlu0 %v1007_v62, %s3045_s13  ;;  %v1059_v63 = vsel %vm992_vm2, %v1054_v40, %v1058_v49  ;;  %v1037_v0 = vrot.slane %v5590_v20, 5  ;;  %v1068_v14 = vrot.slane %v5591_v17, 4  ;;  %v5594_v62 = vshll.u32 %v3260_v60, 16 }
  0xf1   : > { %v3814_v31 = vpop.permute.xlu2 %737 }
  0xf2   : > { %5587 = vst [vmem:[#allocation56_spill] sm:$0xff] %v3814_v31  ;;  %v3816_v55 = vpop.permute.xlu1 %717  ;;  %v3818_v10 = vpop.permute.xlu0 %715  ;;  %v1065_v31 = vrot.slane %v5594_v62, 5  ;;  %v1038_v17 = vor.u32 %v1037_v0, %v1036_v6 }
  0xf3   : > { %5588 = vst [vmem:[#allocation57_spill] sm:$0xff] %v3816_v55  ;;  %v1070_v55 = vor.u32 %v1069_v59, %v1068_v14  ;;  %v5600_v14 = vshll.u32 %v3219_v39, 16 }
  0xf4   : > { %v1066_v20 = vor.u32 %v1065_v31, %v1064_v41  ;;  %v1039_v12 = vsel %vm992_vm2, %v3738_v7, %v1038_v17  ;;  %v5598_v31 = vshll.u32 %v3270_v1, 16 }
  0xf5   : > { %v1049_v59 = vrot.slane %v5600_v14, 5 }
  0xf6   : > { %v1071_v9 = vsel %vm992_vm2, %v1066_v20, %v1070_v55  ;;  %v1081_v6 = vrot.slane %v5598_v31, 5 }
  0xf7   : > { %1109 = vrot.lane.b32.xlu2 %v1027_v26, %s3045_s13  ;;  %v5601_v26 = vshrl.u32 %v3278_v11, 16 }
  0xf8   : > { %1107 = vrot.lane.b32.xlu1 %v3704_v58, %s3045_s13  ;;  %1105 = vrot.lane.b32.xlu0 %v1019_v4, %s3045_s13  ;;  %v5599_v58 = vshrl.u32 %v3219_v39, 16  ;;  %v5602_v4 = vshll.u32 %v3278_v11, 16 }
  0xf9   : > { %v3843_v50 = vpop.permute.xlu2 %942  ;;  %v1076_v41 = vrot.slane %v5601_v26, 4 }
  0xfa   : > { %5596 = vst [vmem:[#allocation58_spill] sm:$0xff] %v3843_v50  ;;  %v3845_v62 = vpop.permute.xlu1 %723  ;;  %v3847_v46 = vpop.permute.xlu0 %721  ;;  %v1048_v0 = vrot.slane %v5599_v58, 4  ;;  %v1077_v52 = vrot.slane %v5602_v4, 5  ;;  %v1031_v50 = vsel %vm992_vm2, %v1026_v21, %v3740_v28  ;;  %v5603_v21 = vshrl.u32 %v3237_v48, 16 }
  0xfb   : > { %5597 = vst [vmem:[#allocation59_spill] sm:$0xff] %v3845_v62  ;;  %v1082_v62 = vor.u32 %v1081_v6, %v1080_v45  ;;  %v5605_v4 = vshrl.u32 %v3255_v57, 16 }
  0xfc   : > { %v1078_v7 = vor.u32 %v1077_v52, %v1076_v41  ;;  %v1050_v1 = vor.u32 %v1049_v59, %v1048_v0  ;;  %v1060_v45 = vrot.slane %v5603_v21, 4  ;;  %v5461_v21 = vshrl.u32 %v3273_v8, 16 }
  0xfd   : > { %v1072_v52 = vrot.slane %v5605_v4, 4 }
  0xfe   : > { %v1083_v31 = vsel %vm992_vm2, %v1078_v7, %v1082_v62  ;;  %v1051_v28 = vsel %vm992_vm2, %v3773_v13, %v1050_v1 }
  0xff   : > { %1115 = vrot.lane.b32.xlu2 %v1039_v12, %s3045_s13  ;;  %v5604_v12 = vshll.u32 %v3237_v48, 16 }
 0x100   : > { %1113 = vrot.lane.b32.xlu1 %v3751_v25, %s3045_s13  ;;  %1111 = vrot.lane.b32.xlu0 %v1031_v50, %s3045_s13  ;;  %v1043_v50 = vsel %vm992_vm2, %v1038_v17, %v3775_v36  ;;  %v5606_v36 = vshll.u32 %v3255_v57, 16 }
 0x101   : > { %v3868_v58 = vpop.permute.xlu2 %948  ;;  %v1061_v25 = vrot.slane %v5604_v12, 5 }
 0x102   : > { %v3870_v14 = vpop.permute.xlu1 %729  ;;  %v3872_v26 = vpop.permute.xlu0 %727  ;;  %v1073_v17 = vrot.slane %v5606_v36, 5 }
 0x103   : > { %v1062_v6 = vor.u32 %v1061_v25, %v1060_v45  ;;  %v5462_v45 = vshll.u32 %v3273_v8, 16 }
 0x105   : > { %v1063_v41 = vsel %vm992_vm2, %v1058_v49, %v1062_v6 }
 0x107   : > { %1121 = vrot.lane.b32.xlu2 %v1051_v28, %s3045_s13  ;;  %v1055_v28 = vsel %vm992_vm2, %v1050_v1, %v1054_v40  ;;  %v1087_v40 = vrot.slane %v5461_v21, 4  ;;  %v1067_v1 = vsel %vm992_vm2, %v1062_v6, %v1066_v20 }
 0x108   : > { %1119 = vrot.lane.b32.xlu1 %v3785_v5, %s3045_s13  ;;  %1117 = vrot.lane.b32.xlu0 %v1043_v50, %s3045_s13  ;;  %v1074_v5 = vor.u32 %v1073_v17, %v1072_v52 }
 0x109   : > { %v3886_v0 = vpop.permute.xlu2 %954 }
 0x10a   : > { %v3888_v13 = vpop.permute.xlu1 %735  ;;  %v3890_v59 = vpop.permute.xlu0 %733  ;;  %v1075_v50 = vsel %vm992_vm2, %v1070_v55, %v1074_v5  ;;  %v1079_v17 = vsel %vm992_vm2, %v1074_v5, %v1078_v7  ;;  %v5463_v5 = vrot.slane %v3198_v29, 1 }
 0x10f   : > { %1127 = vrot.lane.b32.xlu2 %v1063_v41, %s3045_s13 }
 0x110   : > { %1125 = vrot.lane.b32.xlu1 %v1059_v63, %s3045_s13  ;;  %1123 = vrot.lane.b32.xlu0 %v1055_v28, %s3045_s13  ;;  %v1090_v63 = vrot.slane %v5462_v45, 5 }
 0x111   : > { %v3903_v49 = vpop.permute.xlu2 %960 }
 0x112   : > { %v3905_v12 = vpop.permute.xlu1 %741  ;;  %v3907_v25 = vpop.permute.xlu0 %739  ;;  %v1091_v41 = vor.u32 %v1090_v63, %v1087_v40  ;;  %v1336_v63 = vrot.slane %v3224_v42, 5 }
 0x114   : > { %v1092_v36 = vsel %vm992_vm2, %v1082_v62, %v1091_v41  ;;  %vm2449_vm2 = vcmask 516096  }
 0x117   : > { %1133 = vrot.lane.b32.xlu2 %v1075_v50, %s3045_s13 }
 0x118   : > { %1131 = vrot.lane.b32.xlu1 %v1071_v9, %s3045_s13  ;;  %1129 = vrot.lane.b32.xlu0 %v1067_v1, %s3045_s13 }
 0x119   : > { %v3918_v4 = vpop.permute.xlu2 %966 }
 0x11a   : > { %v3920_v52 = vpop.permute.xlu1 %946  ;;  %v3922_v55 = vpop.permute.xlu0 %944 }
 0x11f   : > { %1139 = vrot.lane.b32.xlu2 %v1092_v36, %s3045_s13  ;;  %v5467_v36 = vrot.slane %v3260_v60, 1 }
 0x120   : > { %1137 = vrot.lane.b32.xlu1 %v1083_v31, %s3045_s13  ;;  %1135 = vrot.lane.b32.xlu0 %v1079_v17, %s3045_s13  ;;  %v5466_v17 = vrot.slane %v3234_v47, 1 }
 0x121   : > { %v3929_v20 = vpop.permute.xlu2 %972 }
 0x122   : > { %v953_v9 = vpop.permute.xlu1 %952  ;;  %v3931_v6 = vpop.permute.xlu0 %950 }
 0x127   : > { %1163 = vrot.lane.b32.xlu2 %v3452_v37, %s3046_s14 }
 0x128   : > { %1161 = vrot.lane.b32.xlu1 %v3405_v15, %s3046_s14  ;;  %1141 = vrot.lane.b32.xlu0 %v1091_v41, %s3045_s13  ;;  %v1250_v41 = vrot.slane %v3237_v48, 1 }
 0x129   : > { %v3938_v62 = vpop.permute.xlu2 %978 }
 0x12a   : > { %v3940_v7 = vpop.permute.xlu1 %958  ;;  %v3942_v31 = vpop.permute.xlu0 %956  ;;  %v4004_v45 = vsel %vm1212_vm3, %v1250_v41, %v5467_v36  ;;  %v5472_v36 = vrot.slane %v3216_v38, 5 }
 0x12b   : > { %5609 = vst [vmem:[#allocation62_spill] sm:$0xff] %v4004_v45 }
 0x12f   : > { %1169 = vrot.lane.b32.xlu2 %v3488_v53, %s3046_s14  ;;  %v5464_v53 = vrot.slane %v3224_v42, 1 }
 0x130   : > { %1167 = vrot.lane.b32.xlu1 %v3443_v18, %s3046_s14  ;;  %1165 = vrot.lane.b32.xlu0 %v3449_v61, %s3046_s14  ;;  %v1238_v18 = vrot.slane %v3201_v30, 1 }
 0x131   : > { %v3950_v37 = vpop.permute.xlu2 %984 }
 0x132   : > { %v3952_v15 = vpop.permute.xlu1 %964  ;;  %v3954_v28 = vpop.permute.xlu0 %962 }
 0x137   : > { %1197 = vrot.lane.b32.xlu2 %v3667_v34, %s3046_s14  ;;  %v5465_v34 = vrot.slane %v3201_v30, 5 }
 0x138   : > { %1187 = vrot.lane.b32.xlu1 %v3634_v35, %s3046_s14  ;;  %1185 = vrot.lane.b32.xlu0 %v3560_v32, %s3046_s14  ;;  %v3974_v35 = vsel %vm1212_vm3, %v1238_v18, %v5464_v53  ;;  %v3979_v32 = vsel %vm1212_vm3, %v5463_v5, %v1238_v18  ;;  %v4009_v5 = vsel %vm1212_vm3, %v5466_v17, %v1250_v41  ;;  %v1348_v41 = vrot.slane %v3260_v60, 5 }
 0x139   : > { %v3964_v61 = vpop.permute.xlu2 %990  ;;  %5607 = vst [vmem:[#allocation60_spill] sm:$0xff] %v3974_v35  ;;  %v1480_v53 = vsel %vm1468_vm5, %v3148_v3, %v3323_v22  ;;  %v5470_v17 = vrot.slane %v3252_v56, 5 }
 0x13a   : > { %v3967_v50 = vpop.permute.xlu1 %970  ;;  %v3969_v40 = vpop.permute.xlu0 %968  ;;  %5608 = vst [vmem:[#allocation61_spill] sm:$0xff] %v3979_v32 }
 0x13f   : > { %1288 = vrot.lane.b32.xlu2 %v3974_v35, %s3047_s15  ;;  %v1351_v35 = vsel %vm1312_vm4, %v1348_v41, %v5470_v17  ;;  %v5475_v17 = vrot.slane %v3252_v56, 1 }
 0x140   : > { %1286 = vrot.lane.b32.xlu1 %v3979_v32, %s3047_s15  ;;  %1199 = vrot.lane.b32.xlu0 %v3736_v54, %s3046_s14  ;;  %v1337_v54 = vsel %vm1312_vm4, %v5465_v34, %v1336_v63  ;;  %v1531_v34 = vsel %vm1519_vm6, %v1480_v53, %v3757_v2 }
 0x141   : > { %v3989_v1 = vpop.permute.xlu2 %1097  ;;  %v1582_v3 = vsel %vm1570_vm7, %v1531_v34, %v953_v9  ;;  %v1339_v34 = vsel %vm1312_vm4, %v1336_v63, %v5472_v36  ;;  %v1244_v36 = vrot.slane %v3219_v39, 1 }
 0x142   : > { %v3994_v18 = vpop.permute.xlu1 %976  ;;  %v3996_v21 = vpop.permute.xlu0 %974 }
 0x147   : > { %1386 = vrot.lane.b32.xlu2 %v1337_v54, %s3048_s16  ;;  %v5471_v54 = vrot.slane %v3237_v48, 5 }
 0x148   : > { %1300 = vrot.lane.b32.xlu1 %v4004_v45, %s3047_s15  ;;  %1298 = vrot.lane.b32.xlu0 %v4009_v5, %s3047_s15 }
 0x149   : > { %v1104_v22 = vpop.permute.xlu2 %1103  ;;  %v1349_v9 = vsel %vm1312_vm4, %v5471_v54, %v1348_v41  ;;  %v1256_v41 = vrot.slane %v3255_v57, 1 }
 0x14a   : > { %v4027_v2 = vsel %vm1621_vm8, %v1582_v3, %v1104_v22  ;;  %v4029_v53 = vpop.permute.xlu1 %982  ;;  %v4031_v30 = vpop.permute.xlu0 %980  ;;  %v1486_v3 = vsel %vm1468_vm5, %v3188_v24, %v3331_v23  ;;  %v5473_v24 = vrot.slane %v3242_v51, 1  ;;  %v5476_v23 = vrot.slane %v3216_v38, 1 }
 0x14b   : > { %5610 = vst [vmem:[#allocation63_spill] sm:$0xff] %v4027_v2  ;;  %v1537_v22 = vsel %vm1519_vm6, %v1486_v3, %v3791_v16  ;;  %v4067_v57 = vsel %vm1212_vm3, %v5475_v17, %v1256_v41  ;;  %v5617_v17 = vld [vmem:[#allocation48_spill] sm:$0xff] }
 0x14c   : > { %v1588_v63 = vsel %vm1570_vm7, %v1537_v22, %v3940_v7  ;;  %v4072_v39 = vsel %vm1212_vm3, %v1244_v36, %v5473_v24  ;;  %v4077_v7 = vsel %vm1212_vm3, %v5476_v23, %v1244_v36  ;;  %v5615_v24 = vld [vmem:[#allocation32_spill] sm:$0xff] }
 0x14d   : > { %5612 = vst [vmem:[#allocation65_spill] sm:$0xff] %v4072_v39  ;;  %v5622_v2 = vld [vmem:[#allocation8_spill] sm:$0xff] }
 0x14f   : > { %1400 = vrot.lane.b32.xlu2 %v1351_v35, %s3048_s16 }
 0x150   : > { %1398 = vrot.lane.b32.xlu1 %v1349_v9, %s3048_s16  ;;  %1388 = vrot.lane.b32.xlu0 %v1339_v34, %s3048_s16 }
 0x151   : > { %v1110_v54 = vpop.permute.xlu2 %1109 }
 0x152   : > { %v4058_v16 = vsel %vm1621_vm8, %v1588_v63, %v1110_v54  ;;  %v4060_v35 = vpop.permute.xlu1 %988  ;;  %v4062_v9 = vpop.permute.xlu0 %986  ;;  %v1492_v54 = vsel %vm1468_vm5, %v3206_v33, %v3344_v27  ;;  %v5474_v33 = vrot.slane %v3278_v11, 1 }
 0x153   : > { %5611 = vst [vmem:[#allocation64_spill] sm:$0xff] %v4058_v16  ;;  %v1543_v34 = vsel %vm1519_vm6, %v1492_v54, %v3818_v10  ;;  %v4106_v54 = vld [vmem:[%s3145_s9 + $0x10] sm:$0xff]  ;;  %v1213_v16 = vrot.slane %v5622_v2, 1 }
 0x154   : > { %v1594_v36 = vsel %vm1570_vm7, %v1543_v34, %v3952_v15  ;;  %v4103_v63 = vsel %vm1212_vm3, %v1256_v41, %v5474_v33  ;;  %v1478_v15 = vsel %vm1468_vm5, %v4106_v54, %v3315_v19  ;;  %v1498_v34 = vsel %vm1468_vm5, %v3224_v42, %v3362_v43  ;;  %v5616_v33 = vld [vmem:[#allocation31_spill] sm:$0xff]  ;;  %v5618_v43 = vld [vmem:[#allocation24_spill] sm:$0xff] }
 0x155   : > { %5614 = vst [vmem:[#allocation67_spill] sm:$0xff] %v4103_v63  ;;  %v1529_v41 = vsel %vm1519_vm6, %v1478_v15, %v5615_v24  ;;  %v1549_v23 = vsel %vm1519_vm6, %v1498_v34, %v3847_v46  ;;  %v4137_v24 = vld [vmem:[%s3145_s9 + $0x28] sm:$0xff]  ;;  %v5620_v46 = vld [vmem:[#allocation5_spill] sm:$0xff] }
 0x156   : > { %5619 = vst [vmem:[#allocation32_spill] sm:$0xff] %v4137_v24  ;;  %v4143_v34 = vrot.slane %v5620_v46, 1  ;;  %v1580_v48 = vsel %vm1570_vm7, %v1529_v41, %v3931_v6 }
 0x157   : > { %1454 = vrot.lane.b32.xlu2 %v4067_v57, %s3049_s17 }
 0x158   : > { %1444 = vrot.lane.b32.xlu1 %v4072_v39, %s3049_s17  ;;  %1442 = vrot.lane.b32.xlu0 %v4077_v7, %s3049_s17  ;;  %5621 = vst [vmem:[#allocation31_spill] sm:$0xff] %v4143_v34  ;;  %v1215_v41 = vsel %vm1212_vm3, %v1213_v16, %v4143_v34 }
 0x159   : > { %v1116_v3 = vpop.permute.xlu2 %1115 }
 0x15a   : > { %v4094_v27 = vsel %vm1621_vm8, %v1594_v36, %v1116_v3  ;;  %v4096_v22 = vpop.permute.xlu1 %1095  ;;  %v4098_v10 = vpop.permute.xlu0 %1093  ;;  %v4115_v36 = vld [vmem:[%s3145_s9 + $0x8] sm:$0xff] }
 0x15b   : > { %5613 = vst [vmem:[#allocation66_spill] sm:$0xff] %v4094_v27  ;;  %v1476_v3 = vsel %vm1468_vm5, %v4115_v36, %v3364_v44  ;;  %v4133_v27 = vld [vmem:[%s3145_s9 + $0x20] sm:$0xff] }
 0x15c   : > { %v1527_v19 = vsel %vm1519_vm6, %v1476_v3, %v5617_v17  ;;  %v1600_v17 = vsel %vm1570_vm7, %v1549_v23, %v3967_v50  ;;  %v4146_v3 = vld [vmem:[%s3145_s9] sm:$0xff] }
 0x15d   : > { %v1578_v44 = vsel %vm1570_vm7, %v1527_v19, %v3868_v58  ;;  %v5625_v58 = vrot.slane %v4146_v3, 1  ;;  %v4175_v19 = vld [vmem:[%s3145_s9 + $0x78] sm:$0xff] }
 0x15f   : > { %1175 = vrot.lane.b32.xlu2 %v5616_v33, %s3046_s14  ;;  %v1226_v33 = vrot.slane %v4137_v24, 1  ;;  %v1217_v6 = vsel %vm1212_vm3, %v4143_v34, %v5625_v58 }
 0x160   : > { %1173 = vrot.lane.b32.xlu1 %v5618_v43, %s3046_s14  ;;  %1456 = vrot.lane.b32.xlu0 %v4103_v63, %s3049_s17  ;;  %v5624_v43 = vrot.slane %v4133_v27, 1 }
 0x161   : > { %v1122_v15 = vpop.permute.xlu2 %1121 }
 0x162   : > { %v4155_v45 = vsel %vm1621_vm8, %v1600_v17, %v1122_v15  ;;  %v1102_v50 = vpop.permute.xlu1 %1101  ;;  %v1100_v23 = vpop.permute.xlu0 %1099  ;;  %v4166_v32 = vsel %vm1212_vm3, %v5624_v43, %v1226_v33  ;;  %v5627_v17 = vld [vmem:[#allocation16_spill] sm:$0xff]  ;;  %v5628_v43 = vld [vmem:[#allocation17_spill] sm:$0xff] }
 0x163   : > { %5623 = vst [vmem:[#allocation48_spill] sm:$0xff] %v4155_v45  ;;  %v4158_v63 = vsel %vm1621_vm8, %v1580_v48, %v1102_v50  ;;  %v4161_v39 = vsel %vm1621_vm8, %v1578_v44, %v1100_v23  ;;  %v5626_v48 = vld [vmem:[#allocation14_spill] sm:$0xff]  ;;  %v1484_v15 = vsel %vm1468_vm5, %v4137_v24, %v5627_v17  ;;  %v1482_v50 = vsel %vm1468_vm5, %v4133_v27, %v5628_v43  ;;  %v5630_v45 = vld [vmem:[#allocation53_spill] sm:$0xff] }
 0x164   : > { %v1504_v44 = vsel %vm1468_vm5, %v4175_v19, %v5626_v48  ;;  %v1313_v23 = vrot.slane %v4146_v3, 5  ;;  %v5629_v48 = vld [vmem:[#allocation37_spill] sm:$0xff]  ;;  %v1533_v34 = vsel %vm1519_vm6, %v1482_v50, %v5630_v45 }
 0x165   : > { %v1555_v16 = vsel %vm1519_vm6, %v1504_v44, %v3872_v26  ;;  %v1535_v17 = vsel %vm1519_vm6, %v1484_v15, %v5629_v48  ;;  %v1584_v44 = vsel %vm1570_vm7, %v1533_v34, %v3886_v0 }
 0x166   : > { %v1606_v43 = vsel %vm1570_vm7, %v1555_v16, %v3994_v18  ;;  %v1586_v58 = vsel %vm1570_vm7, %v1535_v17, %v3942_v31  ;;  %v5633_v16 = vrot.slane %v4115_v36, 5  ;;  %v4226_v31 = vld [vmem:[%s3145_s9 + $0x40] sm:$0xff]  ;;  %v5636_v17 = vld [vmem:[#allocation19_spill] sm:$0xff] }
 0x167   : > { %1274 = vrot.lane.b32.xlu2 %v4166_v32, %s3047_s15 }
 0x168   : > { %1264 = vrot.lane.b32.xlu1 %v1217_v6, %s3047_s15  ;;  %1262 = vrot.lane.b32.xlu0 %v1215_v41, %s3047_s15  ;;  %v4201_v6 = vld [vmem:[%s3145_s9 + $0x30] sm:$0xff]  ;;  %v1315_v41 = vsel %vm1312_vm4, %v1313_v23, %v5633_v16 }
 0x169   : > { %v1128_v26 = vpop.permute.xlu2 %1127  ;;  %v5634_v0 = vrot.slane %v4201_v6, 1 }
 0x16a   : > { %v4209_v15 = vsel %vm1621_vm8, %v1606_v43, %v1128_v26  ;;  %v1108_v45 = vpop.permute.xlu1 %1107  ;;  %v1106_v50 = vpop.permute.xlu0 %1105  ;;  %v1490_v43 = vsel %vm1468_vm5, %v4226_v31, %v5636_v17  ;;  %v5637_v26 = vld [vmem:[#allocation18_spill] sm:$0xff] }
 0x16b   : > { %5631 = vst [vmem:[#allocation24_spill] sm:$0xff] %v4209_v15  ;;  %v4212_v48 = vsel %vm1621_vm8, %v1586_v58, %v1108_v45  ;;  %v4215_v18 = vsel %vm1621_vm8, %v1584_v44, %v1106_v50  ;;  %v4223_v34 = vsel %vm1212_vm3, %v1226_v33, %v5634_v0  ;;  %v2946_v58 = vld [vmem:[%s3145_s9 + $0x90] sm:$0xff]  ;;  %v4235_v45 = vld [vmem:[%s3145_s9 + $0x38] sm:$0xff]  ;;  %v5639_v15 = vld [vmem:[#allocation42_spill] sm:$0xff] }
 0x16c   : > { %5632 = vst [vmem:[#allocation8_spill] sm:$0xff] %v4215_v18  ;;  %v1510_v44 = vsel %vm1468_vm5, %v2946_v58, %v5637_v26  ;;  %v5638_v50 = vld [vmem:[#allocation20_spill] sm:$0xff]  ;;  %v1541_v33 = vsel %vm1519_vm6, %v1490_v43, %v5639_v15  ;;  %v5640_v0 = vld [vmem:[#allocation55_spill] sm:$0xff]  ;;  %v1220_v26 = vrot.slane %v4106_v54, 1  ;;  %v1324_v43 = vrot.slane %v4201_v6, 5 }
 0x16d   : > { %5635 = vst [vmem:[#allocation14_spill] sm:$0xff] %v4223_v34  ;;  %v1488_v16 = vsel %vm1468_vm5, %v4235_v45, %v5638_v50  ;;  %v1561_v17 = vsel %vm1519_vm6, %v1510_v44, %v3890_v59  ;;  %v1592_v44 = vsel %vm1570_vm7, %v1541_v33, %v3954_v28  ;;  %v5644_v50 = vrot.slane %v4115_v36, 1 }
 0x16e   : > { %v1539_v18 = vsel %vm1519_vm6, %v1488_v16, %v5640_v0  ;;  %v1612_v15 = vsel %vm1570_vm7, %v1561_v17, %v4029_v53 }
 0x16f   : > { %1364 = vrot.lane.b32.xlu2 %v1315_v41, %s3048_s16  ;;  %v4273_v59 = vsel %vm1212_vm3, %v5644_v50, %v1220_v26 }
 0x170   : > { %1362 = vrot.lane.b32.xlu1 %v1313_v23, %s3048_s16  ;;  %1276 = vrot.lane.b32.xlu0 %v4223_v34, %s3047_s15  ;;  %v1590_v23 = vsel %vm1570_vm7, %v1539_v18, %v3903_v49  ;;  %v5645_v49 = vrot.slane %v4235_v45, 5  ;;  %v5646_v18 = vrot.slane %v4137_v24, 5 }
 0x171   : > { %v1134_v41 = vpop.permute.xlu2 %1133 }
 0x172   : > { %v4262_v16 = vsel %vm1621_vm8, %v1612_v15, %v1134_v41  ;;  %v1114_v0 = vpop.permute.xlu1 %1113  ;;  %v1112_v53 = vpop.permute.xlu0 %1111  ;;  %v1327_v28 = vsel %vm1312_vm4, %v1324_v43, %v5645_v49  ;;  %v1325_v33 = vsel %vm1312_vm4, %v5646_v18, %v1324_v43  ;;  %v4282_v15 = vld [vmem:[%s3145_s9 + $0xa8] sm:$0xff]  ;;  %v5647_v41 = vld [vmem:[#allocation21_spill] sm:$0xff]  ;;  %v5650_v43 = vld [vmem:[#allocation47_spill] sm:$0xff] }
 0x173   : > { %5641 = vst [vmem:[#allocation16_spill] sm:$0xff] %v4262_v16  ;;  %v4265_v17 = vsel %vm1621_vm8, %v1592_v44, %v1114_v0  ;;  %v4268_v58 = vsel %vm1621_vm8, %v1590_v23, %v1112_v53  ;;  %v1516_v23 = vsel %vm1468_vm5, %v4282_v15, %v5647_v41  ;;  %v2949_v44 = vld [vmem:[%s3145_s9 + $0x58] sm:$0xff]  ;;  %v5648_v0 = vld [vmem:[#allocation22_spill] sm:$0xff]  ;;  %v4291_v53 = vld [vmem:[%s3145_s9 + $0x50] sm:$0xff] }
 0x174   : > { %5642 = vst [vmem:[#allocation17_spill] sm:$0xff] %v4265_v17  ;;  %v1496_v50 = vsel %vm1468_vm5, %v2949_v44, %v5648_v0  ;;  %v5649_v17 = vld [vmem:[#allocation23_spill] sm:$0xff]  ;;  %v1567_v41 = vsel %vm1519_vm6, %v1516_v23, %v3907_v25  ;;  %v1232_v44 = vrot.slane %v4226_v31, 1  ;;  %v4306_v0 = vld [vmem:[%s3145_s9 + $0x48] sm:$0xff]  ;;  %v4315_v25 = vld [vmem:[%s3145_s9 + $0x18] sm:$0xff] }
 0x175   : > { %5643 = vst [vmem:[#allocation37_spill] sm:$0xff] %v4268_v58  ;;  %v1494_v49 = vsel %vm1468_vm5, %v4291_v53, %v5649_v17  ;;  %v1547_v18 = vsel %vm1519_vm6, %v1496_v50, %v5650_v43  ;;  %v5485_v58 = vrot.slane %v4306_v0, 1  ;;  %v5651_v17 = vld [vmem:[#allocation57_spill] sm:$0xff]  ;;  %v1618_v16 = vsel %vm1570_vm7, %v1567_v41, %v4060_v35 }
 0x176   : > { %v1545_v24 = vsel %vm1519_vm6, %v1494_v49, %v5651_v17  ;;  %v1598_v23 = vsel %vm1570_vm7, %v1547_v18, %v3969_v40  ;;  %v5655_v18 = vld [vmem:[#allocation12_spill] sm:$0xff] }
 0x177   : > { %1418 = vrot.lane.b32.xlu2 %v4273_v59, %s3049_s17 }
 0x178   : > { %1376 = vrot.lane.b32.xlu1 %v1327_v28, %s3048_s16  ;;  %1374 = vrot.lane.b32.xlu0 %v1325_v33, %s3048_s16  ;;  %v1596_v33 = vsel %vm1570_vm7, %v1545_v24, %v3918_v4  ;;  %v4334_v28 = vsel %vm1212_vm3, %v1232_v44, %v5485_v58  ;;  %v5653_v4 = vrot.slane %v4235_v45, 1  ;;  %v5654_v24 = vrot.slane %v4315_v25, 1  ;;  %v5660_v58 = vld [vmem:[#allocation59_spill] sm:$0xff] }
 0x179   : > { %v1140_v50 = vpop.permute.xlu2 %1139 }
 0x17a   : > { %v4323_v49 = vsel %vm1621_vm8, %v1618_v16, %v1140_v50  ;;  %v1120_v17 = vpop.permute.xlu1 %1119  ;;  %v1118_v35 = vpop.permute.xlu0 %1117  ;;  %v4339_v40 = vsel %vm1212_vm3, %v5653_v4, %v1232_v44  ;;  %v4344_v16 = vsel %vm1212_vm3, %v1220_v26, %v5654_v24  ;;  %v1472_v50 = vsel %vm1468_vm5, %v5620_v46, %v5655_v18  ;;  %v5657_v44 = vld [vmem:[#allocation27_spill] sm:$0xff]  ;;  %v2954_v4 = vld [vmem:[%s3145_s9 + $0x68] sm:$0xff]  ;;  %v5658_v26 = vld [vmem:[#allocation28_spill] sm:$0xff] }
 0x17b   : > { %5652 = vst [vmem:[#allocation53_spill] sm:$0xff] %v4323_v49  ;;  %v4326_v41 = vsel %vm1621_vm8, %v1598_v23, %v1120_v17  ;;  %v4329_v43 = vsel %vm1621_vm8, %v1596_v33, %v1118_v35  ;;  %v5656_v33 = vld [vmem:[#allocation26_spill] sm:$0xff]  ;;  %v4354_v17 = vld [vmem:[%s3145_s9 + $0x70] sm:$0xff]  ;;  %v1500_v24 = vsel %vm1468_vm5, %v2954_v4, %v5658_v26 }
 0x17c   : > { %v1523_v23 = vsel %vm1519_vm6, %v1472_v50, %v5656_v33  ;;  %v1502_v35 = vsel %vm1468_vm5, %v4354_v17, %v5657_v44  ;;  %v5659_v50 = vld [vmem:[#allocation52_spill] sm:$0xff]  ;;  %v1551_v44 = vsel %vm1519_vm6, %v1500_v24, %v5660_v58  ;;  %v5662_v24 = vrot.slane %v3224_v42, 1  ;;  %v5666_v42 = vld [vmem:[#allocation41_spill] sm:$0xff] }
 0x17d   : > { %v1574_v18 = vsel %vm1570_vm7, %v1523_v23, %v3922_v55  ;;  %v1553_v33 = vsel %vm1519_vm6, %v1502_v35, %v5659_v50  ;;  %v1602_v55 = vsel %vm1570_vm7, %v1551_v44, %v3929_v20  ;;  %v5665_v44 = vld [vmem:[#allocation51_spill] sm:$0xff] }
 0x17e   : > { %v1625_v4 = vsel %vm1621_vm8, %v1574_v18, %v4096_v22  ;;  %v1604_v23 = vsel %vm1570_vm7, %v1553_v33, %v3996_v21  ;;  %v5661_v22 = vrot.slane %v3216_v38, 1  ;;  %v2955_v21 = vld [vmem:[%s3145_s9 + $0x88] sm:$0xff]  ;;  %v5663_v18 = vld [vmem:[#allocation33_spill] sm:$0xff] }
 0x17f   : > { %1432 = vrot.lane.b32.xlu2 %v4334_v28, %s3049_s17  ;;  %v1508_v50 = vsel %vm1468_vm5, %v2955_v21, %v5663_v18  ;;  %v4400_v33 = vld [vmem:[%s3145_s9 + $0x80] sm:$0xff]  ;;  %v1340_v21 = vrot.slane %v4354_v17, 5 }
 0x180   : > { %1430 = vrot.lane.b32.xlu1 %v4339_v40, %s3049_s17  ;;  %1420 = vrot.lane.b32.xlu0 %v4344_v16, %s3049_s17  ;;  %v4392_v20 = vsel %vm1212_vm3, %v5662_v24, %v5661_v22 }
 0x181   : > { %v1164_v26 = vpop.permute.xlu2 %1163 }
 0x182   : > { %v4379_v49 = vsel %vm1672_vm9, %v1625_v4, %v1164_v26  ;;  %v1126_v46 = vpop.permute.xlu1 %1125  ;;  %v1124_v34 = vpop.permute.xlu0 %1123  ;;  %v4410_v4 = vld [vmem:[%s3145_s9 + $0xa0] sm:$0xff] }
 0x183   : > { %v4382_v35 = vsel %vm1621_vm8, %v1604_v23, %v1126_v46  ;;  %v4385_v58 = vsel %vm1621_vm8, %v1602_v55, %v1124_v34  ;;  %v5664_v46 = vld [vmem:[#allocation34_spill] sm:$0xff]  ;;  %v1352_v26 = vrot.slane %v4410_v4, 5 }
 0x184   : > { %v1506_v34 = vsel %vm1468_vm5, %v4400_v33, %v5664_v46  ;;  %v5667_v55 = vld [vmem:[#allocation54_spill] sm:$0xff] }
 0x185   : > { %v1559_v23 = vsel %vm1519_vm6, %v1508_v50, %v5667_v55  ;;  %v1557_v22 = vsel %vm1519_vm6, %v1506_v34, %v3870_v14 }
 0x186   : > { %v1608_v18 = vsel %vm1570_vm7, %v1557_v22, %v3938_v62  ;;  %v1610_v46 = vsel %vm1570_vm7, %v1559_v23, %v4031_v30  ;;  %v5668_v62 = vrot.slane %v3252_v56, 5  ;;  %v5669_v30 = vrot.slane %v3216_v38, 5  ;;  %v5674_v38 = vld [vmem:[#allocation56_spill] sm:$0xff] }
 0x187   : > { %1290 = vrot.lane.b32.xlu2 %v4392_v20, %s3047_s15  ;;  %v5670_v23 = vrot.slane %v3252_v56, 1  ;;  %v5671_v22 = vrot.slane %v3260_v60, 1 }
 0x188   : > { %1201 = vrot.lane.b32.xlu1 %v5665_v44, %s3046_s14  ;;  %1189 = vrot.lane.b32.xlu0 %v5666_v42, %s3046_s14  ;;  %v1353_v34 = vsel %vm1312_vm4, %v5668_v62, %v1352_v26 }
 0x189   : > { %v1170_v24 = vpop.permute.xlu2 %1169 }
 0x18a   : > { %v4424_v44 = vsel %vm1672_vm9, %v4158_v63, %v1170_v24  ;;  %v1132_v42 = vpop.permute.xlu1 %1131  ;;  %v1130_v50 = vpop.permute.xlu0 %1129  ;;  %v1341_v63 = vsel %vm1312_vm4, %v5669_v30, %v1340_v21  ;;  %v4447_v24 = vsel %vm1212_vm3, %v5671_v22, %v5670_v23  ;;  %v4466_v30 = vld [vmem:[%s3145_s9 + $0xb0] sm:$0xff] }
 0x18b   : > { %v4427_v55 = vsel %vm1621_vm8, %v1610_v46, %v1132_v42  ;;  %v4430_v14 = vsel %vm1621_vm8, %v1608_v18, %v1130_v50  ;;  %v5672_v18 = vld [vmem:[#allocation38_spill] sm:$0xff]  ;;  %v2958_v42 = vld [vmem:[%s3145_s9 + $0x98] sm:$0xff]  ;;  %v5673_v50 = vld [vmem:[#allocation39_spill] sm:$0xff]  ;;  %v4469_v23 = vrot.slane %v4466_v30, 1 }
 0x18c   : > { %v1514_v46 = vsel %vm1468_vm5, %v4410_v4, %v5672_v18  ;;  %v1512_v62 = vsel %vm1468_vm5, %v2958_v42, %v5673_v50  ;;  %v5675_v50 = vrot.slane %v3278_v11, 1 }
 0x18d   : > { %v1565_v56 = vsel %vm1519_vm6, %v1514_v46, %v5674_v38  ;;  %v1563_v60 = vsel %vm1519_vm6, %v1512_v62, %v3888_v13  ;;  %v5676_v38 = vrot.slane %v3234_v47, 1  ;;  %v1316_v47 = vrot.slane %v4106_v54, 5 }
 0x18e   : > { %v1614_v22 = vsel %vm1570_vm7, %v1563_v60, %v3950_v37  ;;  %v4485_v62 = vsel %vm1212_vm3, %v5675_v50, %v4469_v23  ;;  %v5677_v37 = vrot.slane %v3242_v51, 1  ;;  %v5682_v51 = vld [vmem:[#allocation58_spill] sm:$0xff] }
 0x18f   : > { %1402 = vrot.lane.b32.xlu2 %v1353_v34, %s3048_s16 }
 0x190   : > { %1390 = vrot.lane.b32.xlu1 %v1341_v63, %s3048_s16  ;;  %1302 = vrot.lane.b32.xlu0 %v4447_v24, %s3047_s15  ;;  %v1616_v63 = vsel %vm1570_vm7, %v1565_v56, %v4062_v9  ;;  %v4492_v9 = vsel %vm1212_vm3, %v5677_v37, %v5676_v38  ;;  %v5678_v56 = vld [vmem:[#allocation10_spill] sm:$0xff] }
 0x191   : > { %v4463_v34 = vpop.permute.xlu2 %1197  ;;  %v1470_v60 = vsel %vm1468_vm5, %v5622_v2, %v5678_v56 }
 0x192   : > { %v1138_v18 = vpop.permute.xlu1 %1137  ;;  %v1136_v42 = vpop.permute.xlu0 %1135 }
 0x193   : > { %v4476_v46 = vsel %vm1621_vm8, %v1616_v63, %v1138_v18  ;;  %v4479_v13 = vsel %vm1621_vm8, %v1614_v22, %v1136_v42  ;;  %v5679_v22 = vld [vmem:[#allocation30_spill] sm:$0xff]  ;;  %v5680_v63 = vld [vmem:[#allocation43_spill] sm:$0xff]  ;;  %v5681_v18 = vld [vmem:[#allocation44_spill] sm:$0xff] }
 0x194   : > { %v1521_v11 = vsel %vm1519_vm6, %v1470_v60, %v5680_v63  ;;  %v1518_v42 = vsel %vm1468_vm5, %v4466_v30, %v5681_v18 }
 0x195   : > { %v1572_v2 = vsel %vm1570_vm7, %v1521_v11, %v5682_v51  ;;  %v1569_v50 = vsel %vm1519_vm6, %v1518_v42, %v3905_v12  ;;  %v5683_v12 = vrot.slane %v4115_v36, 5  ;;  %v5684_v42 = vrot.slane %v4235_v45, 1 }
 0x196   : > { %v1620_v37 = vsel %vm1570_vm7, %v1569_v50, %v3964_v61  ;;  %v1623_v56 = vsel %vm1621_vm8, %v1572_v2, %v4098_v10  ;;  %v5685_v61 = vrot.slane %v4201_v6, 1  ;;  %v5686_v51 = vrot.slane %v4115_v36, 1 }
 0x197   : > { %1177 = vrot.lane.b32.xlu2 %v5679_v22, %s3046_s14  ;;  %v1317_v11 = vsel %vm1312_vm4, %v5683_v12, %v1316_v47  ;;  %v5687_v2 = vrot.slane %v4146_v3, 1  ;;  %v5488_v12 = vrot.slane %v4226_v31, 5 }
 0x198   : > { %1458 = vrot.lane.b32.xlu1 %v4485_v62, %s3049_s17  ;;  %1446 = vrot.lane.b32.xlu0 %v4492_v9, %s3049_s17  ;;  %v4535_v10 = vsel %vm1212_vm3, %v5685_v61, %v5684_v42 }
 0x199   : > { %v4513_v38 = vpop.permute.xlu2 %1288  ;;  %v1219_v50 = vsel %vm1212_vm3, %v5687_v2, %v5686_v51  ;;  %v5690_v2 = vrot.slane %v3198_v29, 1  ;;  %v2804_v29 = vld [vmem:[%s5404_s3 + $0x8] sm:$0xf] }
 0x19a   : > { %v1162_v60 = vpop.permute.xlu1 %1161  ;;  %v1142_v22 = vpop.permute.xlu0 %1141 }
 0x19b   : > { %v4520_v63 = vsel %vm1672_vm9, %v1623_v56, %v1162_v60  ;;  %v4523_v18 = vsel %vm1621_vm8, %v1620_v37, %v1142_v22  ;;  %v5688_v37 = vld [vmem:[#allocation9_spill] sm:$0xff] }
 0x19c   : > { %v1474_v56 = vsel %vm1468_vm5, %v4146_v3, %v5688_v37  ;;  %v5689_v60 = vld [vmem:[#allocation49_spill] sm:$0xff]  ;;  %v5692_v37 = vrot.slane %v4133_v27, 1  ;;  %vm2501_vm5 = vsmask.f32 7938 }
 0x19d   : > { %v1525_v22 = vsel %vm1519_vm6, %v1474_v56, %v5689_v60 }
 0x19e   : > { %v1576_v36 = vsel %vm1570_vm7, %v1525_v22, %v3920_v52  ;;  %v5691_v52 = vrot.slane %v4306_v0, 1  ;;  %v2860_v22 = vld [vmem:[%s5404_s3 + $0x8] sm:$0x30] }
 0x19f   : > { %1366 = vrot.lane.b32.xlu2 %v1317_v11, %s3048_s16  ;;  %v1627_v3 = vsel %vm1621_vm8, %v1576_v36, %v3989_v1  ;;  %v5693_v1 = vrot.slane %v4315_v25, 1  ;;  %v3050_v36 = vmov 65535  }
 0x1a0   : > { %1278 = vrot.lane.b32.xlu1 %v4535_v10, %s3047_s15  ;;  %1266 = vrot.lane.b32.xlu0 %v1219_v50, %s3047_s15  ;;  %v4570_v50 = vsel %vm1212_vm3, %v5691_v52, %v5690_v2 }
 0x1a1   : > { %v4553_v6 = vpop.permute.xlu2 %1386  ;;  %v4577_v56 = vsel %vm1212_vm3, %v5693_v1, %v5692_v37 }
 0x1a2   : > { %v1168_v42 = vpop.permute.xlu1 %1167  ;;  %v1166_v11 = vpop.permute.xlu0 %1165 }
 0x1a3   : > { %v4560_v61 = vsel %vm1672_vm9, %v4161_v39, %v1168_v42  ;;  %v4563_v51 = vsel %vm1672_vm9, %v1627_v3, %v1166_v11  ;;  %v5694_v39 = vrot.slane %v4235_v45, 5  ;;  %v2805_v45 = vor.u32 %v2860_v22, %v2804_v29  ;;  %v2859_v29 = vld [vmem:[%s5404_s3] sm:$0xff]  ;;  %v5697_v22 = vld [vmem:[#allocation40_spill] sm:$0xff] }
 0x1a4   : > { %v2170_v3 = vsel %vm2168_vm10, 4294967295, %v3050_v36  ;;  %v5695_v11 = vshll.u32 %v3273_v8, 16 }
 0x1a5   : > { %v1329_v60 = vsel %vm1312_vm4, %v5694_v39, %v5488_v12  ;;  %v2171_v52 = vsel %vm2169_vm11, %v2170_v3, 0  ;;  %v5696_v12 = vld [vmem:[#allocation50_spill] sm:$0xff] }
 0x1a6   : > { %v4599_v2 = vrot.slane %v5695_v11, 1  ;;  %v2173_v39 = vand.u32 %v2805_v45, %v2171_v52  ;;  %v1354_v45 = vrot.slane %v4282_v15, 5  ;;  %v5707_v15 = vld [vmem:[#allocation31_spill] sm:$0xff] }
 0x1a7   : > { %1434 = vrot.lane.b32.xlu2 %v4570_v50, %s3049_s17 }
 0x1a8   : > { %1422 = vrot.lane.b32.xlu1 %v4577_v56, %s3049_s17  ;;  %1378 = vrot.lane.b32.xlu0 %v1329_v60, %s3048_s16  ;;  %v1144_v60 = vsel %vm743_vm1, %v5696_v12, %v4599_v2  ;;  %v5490_v12 = vrot.slane %v4175_v19, 5 }
 0x1a9   : > { %v4595_v42 = vpop.permute.xlu2 %1400  ;;  %2862 = vmatpush.bf16.msra.mxu2 %v2173_v39  ;;  %2863 = vmatpush.bf16.msra.mxu3 %v2173_v39 }
 0x1aa   : > { %v1188_v37 = vpop.permute.xlu1 %1187  ;;  %v1186_v1 = vpop.permute.xlu0 %1185  ;;  %2181 = vmatpush.bf16.msra.mxu0 %v2173_v39  ;;  %2861 = vmatpush.bf16.msra.mxu1 %v2173_v39  ;;  %v1343_v52 = vsel %vm1312_vm4, %v1340_v21, %v5490_v12  ;;  %v5698_v21 = vld [vmem:[#allocation29_spill] sm:$0xff]  ;;  %v1710_v12 = vsel %vm1672_vm9, %v4430_v14, %v4463_v34 }
 0x1ad   : > { %2865 = vmatpush.bf16.msra.mxu2 %v2859_v29  ;;  %2866 = vmatpush.bf16.msra.mxu3 %v2859_v29 }
 0x1ae   : > { %2182 = vmatpush.bf16.msra.mxu0 %v2859_v29  ;;  %2864 = vmatpush.bf16.msra.mxu1 %v2859_v29 }
 0x1af   : > { %1292 = vrot.lane.b32.xlu2 %v4077_v7, %s3047_s15  ;;  %v1355_v7 = vsel %vm1312_vm4, %v1352_v26, %v1354_v45 }
 0x1b0   : > { %1203 = vrot.lane.b32.xlu1 %v1144_v60, %s3046_s14  ;;  %1191 = vrot.lane.b32.xlu0 %v5697_v22, %s3046_s14  ;;  %v4631_v60 = vld [vmem:[%s3145_s9 + $0xb8] sm:$0xff] }
 0x1b1   : > { %v1455_v36 = vpop.permute.xlu2 %1454  ;;  %v5489_v4 = vrot.slane %v4631_v60, 1 }
 0x1b2   : > { %v1287_v3 = vpop.permute.xlu1 %1286  ;;  %v1200_v11 = vpop.permute.xlu0 %1199 }
 0x1b3   : > { %v1413_v17 = vsel %vm1212_vm3, %v4469_v23, %v5489_v4 }
 0x1b7   : > { %1404 = vrot.lane.b32.xlu2 %v1355_v7, %s3048_s16 }
 0x1b8   : > { %1392 = vrot.lane.b32.xlu1 %v1343_v52, %s3048_s16  ;;  %1304 = vrot.lane.b32.xlu0 %v4067_v57, %s3047_s15  ;;  %v1318_v57 = vrot.slane %v4315_v25, 5 }
 0x1b9   : > { %v4628_v39 = vpop.permute.xlu2 %1175 }
 0x1ba   : > { %v1301_v26 = vpop.permute.xlu1 %1300  ;;  %v1299_v29 = vpop.permute.xlu0 %1298  ;;  %v1319_v4 = vsel %vm1312_vm4, %v1316_v47, %v1318_v57  ;;  %v1330_v47 = vrot.slane %v4306_v0, 5 }
 0x1bb   : > { %v1761_v54 = vsel %vm1723_vm12, %v1710_v12, %v1299_v29 }
 0x1bf   : > { %1179 = vrot.lane.b32.xlu2 %v5698_v21, %s3046_s14  ;;  %v1700_v21 = vsel %vm1672_vm9, %v4326_v41, %v1188_v37 }
 0x1c0   : > { %1460 = vrot.lane.b32.xlu1 %v1413_v17, %s3049_s17  ;;  %1448 = vrot.lane.b32.xlu0 %v4009_v5, %s3049_s17  ;;  %v1698_v17 = vsel %vm1672_vm9, %v4329_v43, %v1186_v1  ;;  %v1751_v43 = vsel %vm1723_vm12, %v1700_v21, %v4513_v38  ;;  %v1712_v21 = vsel %vm1672_vm9, %v4427_v55, %v1200_v11 }
 0x1c1   : > { %v4644_v22 = vpop.permute.xlu2 %1274  ;;  %v1749_v5 = vsel %vm1723_vm12, %v1698_v17, %v1287_v3 }
 0x1c2   : > { %v1399_v7 = vpop.permute.xlu1 %1398  ;;  %v1389_v52 = vpop.permute.xlu0 %1388 }
 0x1c3   : > { %v1812_v37 = vsel %vm1774_vm13, %v1761_v54, %v1399_v7  ;;  %v1802_v14 = vsel %vm1774_vm13, %v1751_v43, %v1389_v52  ;;  %v5699_v52 = vrot.slane %v4226_v31, 5 }
 0x1c4   : > { %v1863_v7 = vsel %vm1825_vm14, %v1812_v37, %v1455_v36 }
 0x1c5   : > { %v2028_v55 = vshrl.u32 %v1863_v7, 16  ;;  %v2031_v11 = vshll.u32 %v1863_v7, 16 }
 0x1c7   : > { %1368 = vrot.lane.b32.xlu2 %v1319_v4, %s3048_s16 }
 0x1c8   : > { %1280 = vrot.lane.b32.xlu1 %v4339_v40, %s3047_s15  ;;  %1268 = vrot.lane.b32.xlu0 %v4273_v59, %s3047_s15  ;;  %v1800_v40 = vsel %vm1774_vm13, %v1749_v5, %v4553_v6  ;;  %v1331_v6 = vsel %vm1312_vm4, %v5699_v52, %v1330_v47 }
 0x1c9   : > { %v4667_v41 = vpop.permute.xlu2 %1364 }
 0x1ca   : > { %v1445_v34 = vpop.permute.xlu1 %1444  ;;  %v1443_v1 = vpop.permute.xlu0 %1442 }
 0x1cb   : > { %v1853_v59 = vsel %vm1825_vm14, %v1802_v14, %v1445_v34  ;;  %v1851_v12 = vsel %vm1825_vm14, %v1800_v40, %v1443_v1  ;;  %v1763_v14 = vsel %vm1723_vm12, %v1712_v21, %v1301_v26  ;;  %v5700_v34 = vld [vmem:[#allocation61_spill] sm:$0xff]  ;;  %v5701_v40 = vshrl.u32 %v3273_v8, 16  ;;  %v5702_v8 = vld [vmem:[#allocation11_spill] sm:$0xff] }
 0x1cc   : > { %v1988_v3 = vshrl.u32 %v1853_v59, 16  ;;  %v1991_v38 = vshll.u32 %v1853_v59, 16  ;;  %v1980_v4 = vshrl.u32 %v1851_v12, 16  ;;  %v1983_v29 = vshll.u32 %v1851_v12, 16 }
 0x1cd   : > { %v1145_v26 = vor.u32 %v4599_v2, %v5701_v40  ;;  %v1814_v59 = vsel %vm1774_vm13, %v1763_v14, %v4595_v42  ;;  %v5703_v42 = vld [vmem:[#allocation65_spill] sm:$0xff]  ;;  %v1344_v14 = vrot.slane %v4400_v33, 5 }
 0x1ce   : > { %v1990_v17 = vrot.slane %v1988_v3, 3  ;;  %v1993_v5 = vrot.slane %v1991_v38, 4  ;;  %v1982_v54 = vrot.slane %v1980_v4, 3  ;;  %v1985_v43 = vrot.slane %v1983_v29, 4 }
 0x1cf   : > { %1436 = vrot.lane.b32.xlu2 %v5700_v34, %s3049_s17  ;;  %v2033_v4 = vrot.slane %v2031_v11, 4  ;;  %v1150_v2 = vsel %vm743_vm1, %v1145_v26, %v5702_v8  ;;  %v5705_v26 = vrot.slane %v4175_v19, 5  ;;  %v5710_v8 = vld [vmem:[#allocation62_spill] sm:$0xff] }
 0x1d0   : > { %v4687_v36 = vor.u32 %v1993_v5, %v1990_v17  ;;  %v4689_v37 = vor.u32 %v1985_v43, %v1982_v54  ;;  %1424 = vrot.lane.b32.xlu1 %v4166_v32, %s3049_s17  ;;  %1380 = vrot.lane.b32.xlu0 %v1331_v6, %s3048_s16  ;;  %v2030_v32 = vrot.slane %v2028_v55, 3  ;;  %v5704_v17 = vld [vmem:[#allocation46_spill] sm:$0xff]  ;;  %v1356_v54 = vrot.slane %v4466_v30, 5 }
 0x1d1   : > { %v1419_v31 = vpop.permute.xlu2 %1418 }
 0x1d2   : > { %v1174_v1 = vpop.permute.xlu1 %1173  ;;  %v1457_v12 = vpop.permute.xlu0 %1456  ;;  %v1995_v3 = vsel %vm1884_vm15, %v4689_v37, %v4687_v36  ;;  %v4713_v5 = vor.u32 %v2033_v4, %v2030_v32  ;;  %v1357_v40 = vsel %vm1312_vm4, %v1354_v45, %v1356_v54  ;;  %v5708_v45 = vrot.slane %v4631_v60, 1 }
 0x1d3   : > { %v1865_v38 = vsel %vm1825_vm14, %v1814_v59, %v1457_v12  ;;  %2818 = vmatmul.msk.bf16.vlgmr.msra.gmra.mxu2 %vm2095_vm0, %v1995_v3  ;;  %v1345_v59 = vsel %vm1312_vm4, %v5705_v26, %v1344_v14  ;;  %v5706_v12 = vld [vmem:[#allocation67_spill] sm:$0xff] }
 0x1d4   : > { %v2036_v29 = vshrl.u32 %v1865_v38, 16  ;;  %v2039_v21 = vshll.u32 %v1865_v38, 16  ;;  %v1415_v4 = vsel %vm1212_vm3, %v5708_v45, %v5707_v15 }
 0x1d6   : > { %v2038_v7 = vrot.slane %v2036_v29, 3  ;;  %v2041_v52 = vrot.slane %v2039_v21, 4  ;;  %v5709_v29 = vld [vmem:[#allocation36_spill] sm:$0xff] }
 0x1d7   : > { %1294 = vrot.lane.b32.xlu2 %v5703_v42, %s3047_s15 }
 0x1d8   : > { %v4708_v6 = vor.u32 %v2041_v52, %v2038_v7  ;;  %1205 = vrot.lane.b32.xlu1 %v1150_v2, %s3046_s14  ;;  %1193 = vrot.lane.b32.xlu0 %v5704_v17, %s3046_s14  ;;  %v1320_v2 = vrot.slane %v4133_v27, 5  ;;  %v1688_v7 = vsel %vm1672_vm9, %v4212_v48, %v4628_v39 }
 0x1d9   : > { %v1433_v43 = vpop.permute.xlu2 %1432 }
 0x1da   : > { %v1265_v34 = vpop.permute.xlu1 %1264  ;;  %v1263_v55 = vpop.permute.xlu0 %1262  ;;  %v2043_v11 = vsel %vm1884_vm15, %v4713_v5, %v4708_v6  ;;  %v1321_v26 = vsel %vm1312_vm4, %v1318_v57, %v1320_v2 }
 0x1db   : > { %2824 = vmatmul.msk.bf16.vlgmr.msra.gmra.mxu3 %vm2095_vm0, %v2043_v11  ;;  %v1725_v19 = vsel %vm1723_vm12, %v4520_v63, %v1263_v55 }
 0x1df   : > { %1406 = vrot.lane.b32.xlu2 %v1357_v40, %s3048_s16 }
 0x1e0   : > { %1394 = vrot.lane.b32.xlu1 %v1345_v59, %s3048_s16  ;;  %1306 = vrot.lane.b32.xlu0 %v5706_v12, %s3047_s15  ;;  %v5711_v59 = vld [vmem:[#allocation8_spill] sm:$0xff] }
 0x1e1   : > { %v4735_v3 = vpop.permute.xlu2 %1290  ;;  %v1686_v48 = vsel %vm1672_vm9, %v5711_v59, %v1174_v1  ;;  %v1332_v1 = vrot.slane %v4291_v53, 5  ;;  %v5713_v59 = vld [vmem:[#allocation60_spill] sm:$0xff] }
 0x1e2   : > { %v1363_v38 = vpop.permute.xlu1 %1362  ;;  %v1277_v32 = vpop.permute.xlu0 %1276  ;;  %v1737_v25 = vsel %vm1723_vm12, %v1686_v48, %v4644_v22 }
 0x1e3   : > { %v1776_v21 = vsel %vm1774_vm13, %v1725_v19, %v1363_v38  ;;  %v1739_v63 = vsel %vm1723_vm12, %v1688_v7, %v1277_v32  ;;  %v1727_v38 = vsel %vm1723_vm12, %v4379_v49, %v1265_v34 }
 0x1e4   : > { %v1827_v55 = vsel %vm1825_vm14, %v1776_v21, %v1419_v31 }
 0x1e5   : > { %v1885_v39 = vshrl.u32 %v1827_v55, 16  ;;  %v1888_v12 = vshll.u32 %v1827_v55, 16 }
 0x1e7   : > { %1181 = vrot.lane.b32.xlu2 %v5709_v29, %s3046_s14  ;;  %v1890_v45 = vrot.slane %v1888_v12, 4 }
 0x1e8   : > { %1462 = vrot.lane.b32.xlu1 %v1415_v4, %s3049_s17  ;;  %1450 = vrot.lane.b32.xlu0 %v5710_v8, %s3049_s17  ;;  %v1778_v4 = vsel %vm1774_vm13, %v1727_v38, %v4667_v41  ;;  %v5714_v38 = vld [vmem:[#allocation14_spill] sm:$0xff] }
 0x1e9   : > { %v4753_v52 = vpop.permute.xlu2 %1402 }
 0x1ea   : > { %v1377_v42 = vpop.permute.xlu1 %1376  ;;  %v1375_v17 = vpop.permute.xlu0 %1374 }
 0x1eb   : > { %v1790_v11 = vsel %vm1774_vm13, %v1739_v63, %v1377_v42  ;;  %v1788_v49 = vsel %vm1774_vm13, %v1737_v25, %v1375_v17  ;;  %v5712_v42 = vld [vmem:[#allocation13_spill] sm:$0xff]  ;;  %v1333_v17 = vsel %vm1312_vm4, %v1330_v47, %v1332_v1 }
 0x1ec   : > { %v1841_v40 = vsel %vm1825_vm14, %v1790_v11, %v1433_v43  ;;  %v1887_v43 = vrot.slane %v1885_v39, 3  ;;  %v1154_v55 = vshll.u32 %v5712_v42, 16  ;;  %v1416_v30 = vrot.slane %v5712_v42, 1 }
 0x1ed   : > { %v1940_v32 = vshrl.u32 %v1841_v40, 16  ;;  %v1943_v31 = vshll.u32 %v1841_v40, 16 }
 0x1ee   : > { %v1891_v48 = vor.u32 %v1890_v45, %v1887_v43  ;;  %v5715_v45 = vld [vmem:[#allocation15_spill] sm:$0xff] }
 0x1ef   : > { %1370 = vrot.lane.b32.xlu2 %v1321_v26, %s3048_s16  ;;  %v1945_v29 = vrot.slane %v1943_v31, 4 }
 0x1f0   : > { %1282 = vrot.lane.b32.xlu1 %v4334_v28, %s3047_s15  ;;  %1270 = vrot.lane.b32.xlu0 %v4344_v16, %s3047_s15  ;;  %v1942_v28 = vrot.slane %v1940_v32, 3  ;;  %v4800_v32 = vrot.slane %v1154_v55, 1  ;;  %v5720_v55 = vld [vmem:[#allocation48_spill] sm:$0xff] }
 0x1f1   : > { %v4775_v57 = vpop.permute.xlu2 %1177 }
 0x1f2   : > { %v1431_v34 = vpop.permute.xlu1 %1430  ;;  %v1421_v19 = vpop.permute.xlu0 %1420  ;;  %v4798_v0 = vor.u32 %v1945_v29, %v1942_v28 }
 0x1f3   : > { %v1839_v16 = vsel %vm1825_vm14, %v1788_v49, %v1431_v34  ;;  %v1829_v21 = vsel %vm1825_vm14, %v1778_v4, %v1421_v19  ;;  %v1157_v34 = vsel %vm743_vm1, %v5715_v45, %v4800_v32  ;;  %v5716_v4 = vld [vmem:[#allocation45_spill] sm:$0xff]  ;;  %v1358_v19 = vrot.slane %v4631_v60, 5 }
 0x1f4   : > { %v1932_v22 = vshrl.u32 %v1839_v16, 16  ;;  %v1935_v8 = vshll.u32 %v1839_v16, 16  ;;  %v1892_v7 = vshrl.u32 %v1829_v21, 16  ;;  %v1895_v63 = vshll.u32 %v1829_v21, 16 }
 0x1f5   : > { %v1359_v21 = vsel %vm1312_vm4, %v1356_v54, %v1358_v19  ;;  %vm2400_vm1 = vcmask 519168  }
 0x1f6   : > { %v1934_v41 = vrot.slane %v1932_v22, 3  ;;  %v1937_v11 = vrot.slane %v1935_v8, 4  ;;  %v1894_v40 = vrot.slane %v1892_v7, 3  ;;  %v1897_v26 = vrot.slane %v1895_v63, 4  ;;  %v5717_v22 = vld [vmem:[#allocation7_spill] sm:$0xff]  ;;  %v5719_v7 = vld [vmem:[#allocation16_spill] sm:$0xff]  ;;  %vm5119_vm6 = vmand %vm2400_vm1, %vm2501_vm5 }
 0x1f7   : > { %1438 = vrot.lane.b32.xlu2 %v5713_v59, %s3049_s17  ;;  %v5718_v8 = vrot.slane %v5717_v22, 5 }
 0x1f8   : > { %v4791_v39 = vor.u32 %v1937_v11, %v1934_v41  ;;  %v4793_v12 = vor.u32 %v1897_v26, %v1894_v40  ;;  %1426 = vrot.lane.b32.xlu1 %v5714_v38, %s3049_s17  ;;  %1382 = vrot.lane.b32.xlu0 %v1333_v17, %s3048_s16 }
 0x1f9   : > { %v1367_v47 = vpop.permute.xlu2 %1366 }
 0x1fa   : > { %v1202_v31 = vpop.permute.xlu1 %1201  ;;  %v1190_v25 = vpop.permute.xlu0 %1189  ;;  %v1899_v49 = vsel %vm1884_vm15, %v1891_v48, %v4793_v12  ;;  %v1947_v43 = vsel %vm1884_vm15, %v4791_v39, %v4798_v0 }
 0x1fb   : > { %2806 = vmatmul.msk.bf16.vlgmr.msra.gmra.mxu0 %vm2095_vm0, %v1899_v49  ;;  %2812 = vmatmul.msk.bf16.vlgmr.msra.gmra.mxu1 %vm2095_vm0, %v1947_v43  ;;  %v1714_v63 = vsel %vm1672_vm9, %v5719_v7, %v1202_v31  ;;  %v1702_v17 = vsel %vm1672_vm9, %v5720_v55, %v1190_v25 }
 0x1fc   : > { %v1753_v33 = vsel %vm1723_vm12, %v1702_v17, %v4735_v3  ;;  %v1417_v3 = vsel %vm1212_vm3, %v5707_v15, %v1416_v30  ;;  %vm2450_vm3 = vsmask.f32 256 }
 0x1ff   : > { %1296 = vrot.lane.b32.xlu2 %v4492_v9, %s3047_s15  ;;  %v1347_v9 = vsel %vm1312_vm4, %v1344_v14, %v5718_v8 }
 0x200   : > { %1207 = vrot.lane.b32.xlu1 %v1157_v34, %s3046_s14  ;;  %1195 = vrot.lane.b32.xlu0 %v5716_v4, %s3046_s14 }
 0x201   : > { %v1435_v28 = vpop.permute.xlu2 %1434 }
 0x202   : > { %v1391_v29 = vpop.permute.xlu1 %1390  ;;  %v1303_v16 = vpop.permute.xlu0 %1302 }
 0x203   : > { %v1765_v41 = vsel %vm1723_vm12, %v1714_v63, %v1303_v16  ;;  %v1804_v14 = vsel %vm1774_vm13, %v1753_v33, %v1391_v29 }
 0x204   : > { %v1816_v40 = vsel %vm1774_vm13, %v1765_v41, %v4753_v52  ;;  %v5721_v52 = vld [vmem:[#allocation25_spill] sm:$0xff] }
 0x207   : > { %1408 = vrot.lane.b32.xlu2 %v1359_v21, %s3048_s16 }
 0x208   : > { %1396 = vrot.lane.b32.xlu1 %v1347_v9, %s3048_s16  ;;  %1308 = vrot.lane.b32.xlu0 %v4485_v62, %s3047_s15 }
 0x209   : > { %v4840_v54 = vpop.permute.xlu2 %1292 }
 0x20a   : > { %v1459_v11 = vpop.permute.xlu1 %1458  ;;  %v1447_v26 = vpop.permute.xlu0 %1446 }
 0x20b   : > { %v1867_v59 = vsel %vm1825_vm14, %v1816_v40, %v1459_v11  ;;  %v1855_v48 = vsel %vm1825_vm14, %v1804_v14, %v1447_v26  ;;  %v5724_v26 = vld [vmem:[#allocation6_spill] sm:$0xff] }
 0x20c   : > { %v2044_v38 = vshrl.u32 %v1867_v59, 16  ;;  %v2047_v62 = vshll.u32 %v1867_v59, 16  ;;  %v1996_v31 = vshrl.u32 %v1855_v48, 16  ;;  %v1999_v25 = vshll.u32 %v1855_v48, 16 }
 0x20e   : > { %v2046_v49 = vrot.slane %v2044_v38, 3  ;;  %v2049_v43 = vrot.slane %v2047_v62, 4  ;;  %v1998_v45 = vrot.slane %v1996_v31, 3  ;;  %v2001_v34 = vrot.slane %v1999_v25, 4 }
 0x20f   : > { %1171 = vrot.lane.b32.xlu2 %v5721_v52, %s3046_s14 }
 0x210   : > { %v4853_v4 = vor.u32 %v2049_v43, %v2046_v49  ;;  %v4855_v29 = vor.u32 %v2001_v34, %v1998_v45  ;;  %1464 = vrot.lane.b32.xlu1 %v1417_v3, %s3049_s17  ;;  %1452 = vrot.lane.b32.xlu0 %v4447_v24, %s3049_s17  ;;  %v5722_v24 = vld [vmem:[#allocation35_spill] sm:$0xff] }
 0x211   : > { %v1405_v16 = vpop.permute.xlu2 %1404 }
 0x212   : > { %v1279_v21 = vpop.permute.xlu1 %1278  ;;  %v1267_v22 = vpop.permute.xlu0 %1266  ;;  %v2003_v15 = vsel %vm1884_vm15, %v4687_v36, %v4855_v29  ;;  %v2051_v8 = vsel %vm1884_vm15, %v4708_v6, %v4853_v4  ;;  %v5723_v36 = vld [vmem:[#allocation64_spill] sm:$0xff] }
 0x213   : > { %2819 = vmatmul.msk.bf16.gmra.mxu2 %vm2095_vm0, %v2003_v15  ;;  %2825 = vmatmul.msk.bf16.gmra.mxu3 %vm2095_vm0, %v2051_v8  ;;  %v1729_v9 = vsel %vm1723_vm12, %v4563_v51, %v1267_v22  ;;  %v1690_v6 = vsel %vm1672_vm9, %v5723_v36, %v4775_v57  ;;  %v5725_v57 = vrot.slane %v5724_v26, 5 }
 0x214   : > { %v1741_v7 = vsel %vm1723_vm12, %v1690_v6, %v1279_v21  ;;  %v1780_v55 = vsel %vm1774_vm13, %v1729_v9, %v1367_v47  ;;  %v5726_v47 = vld [vmem:[#allocation32_spill] sm:$0xff] }
 0x215   : > { %v1335_v59 = vsel %vm1312_vm4, %v1332_v1, %v5725_v57  ;;  %v5727_v48 = vrot.slane %v5726_v47, 5 }
 0x217   : > { %1284 = vrot.lane.b32.xlu2 %v4570_v50, %s3047_s15  ;;  %v1323_v38 = vsel %vm1312_vm4, %v1320_v2, %v5727_v48 }
 0x218   : > { %1272 = vrot.lane.b32.xlu1 %v4577_v56, %s3047_s15  ;;  %1183 = vrot.lane.b32.xlu0 %v5722_v24, %s3046_s14 }
 0x219   : > { %v4881_v51 = vpop.permute.xlu2 %1179 }
 0x21a   : > { %v1423_v63 = vpop.permute.xlu1 %1422  ;;  %v1379_v17 = vpop.permute.xlu0 %1378 }
 0x21b   : > { %v1831_v50 = vsel %vm1825_vm14, %v1780_v55, %v1423_v63  ;;  %v1792_v41 = vsel %vm1774_vm13, %v1741_v7, %v1379_v17 }
 0x21c   : > { %v1900_v56 = vshrl.u32 %v1831_v50, 16  ;;  %v1903_v33 = vshll.u32 %v1831_v50, 16  ;;  %v1843_v14 = vsel %vm1825_vm14, %v1792_v41, %v1435_v28  ;;  %v1158_v28 = vshrl.u32 %v5712_v42, 16 }
 0x21d   : > { %v1948_v11 = vshrl.u32 %v1843_v14, 16  ;;  %v1951_v40 = vshll.u32 %v1843_v14, 16 }
 0x21e   : > { %v1902_v62 = vrot.slane %v1900_v56, 3  ;;  %v1905_v31 = vrot.slane %v1903_v33, 4  ;;  %v1160_v43 = vor.u32 %v1158_v28, %v4800_v32 }
 0x21f   : > { %v1950_v25 = vrot.slane %v1948_v11, 3  ;;  %v1953_v3 = vrot.slane %v1951_v40, 4  ;;  %1428 = vrot.lane.b32.xlu2 %v4535_v10, %s3049_s17  ;;  %v5729_v11 = vld [vmem:[#allocation37_spill] sm:$0xff] }
 0x220   : > { %v4899_v49 = vor.u32 %v1905_v31, %v1902_v62  ;;  %1384 = vrot.lane.b32.xlu1 %v1335_v59, %s3048_s16  ;;  %1372 = vrot.lane.b32.xlu0 %v1323_v38, %s3048_s16  ;;  %v1692_v40 = vsel %vm1672_vm9, %v5729_v11, %v4881_v51 }
 0x221   : > { %v4903_v53 = vor.u32 %v1953_v3, %v1950_v25  ;;  %v1369_v45 = vpop.permute.xlu2 %1368 }
 0x222   : > { %v1204_v27 = vpop.permute.xlu1 %1203  ;;  %v1192_v1 = vpop.permute.xlu0 %1191  ;;  %v1907_v2 = vsel %vm1884_vm15, %v4793_v12, %v4899_v49  ;;  %v5728_v12 = vld [vmem:[#allocation5_spill] sm:$0xff] }
 0x223   : > { %2807 = vmatmul.msk.bf16.gmra.mxu0 %vm2095_vm0, %v1907_v2  ;;  %v1955_v10 = vsel %vm1884_vm15, %v4798_v0, %v4903_v53  ;;  %v1360_v34 = vrot.slane %v5728_v12, 5  ;;  %v1716_v32 = vsel %vm1672_vm9, %v4479_v13, %v1204_v27  ;;  %v1704_v22 = vsel %vm1672_vm9, %v4385_v58, %v1192_v1 }
 0x224   : > { %2813 = vmatmul.msk.bf16.gmra.mxu1 %vm2095_vm0, %v1955_v10 }
 0x225   : > { %v1361_v0 = vsel %vm1312_vm4, %v1358_v19, %v1360_v34  ;;  %vm5001_vm4 = vmand %vm2449_vm2, %vm2450_vm3 }
 0x227   : > { %1310 = vrot.lane.b32.xlu2 %v4469_v23, %s3047_s15  ;;  %s2566_s15 = scalar_lea.hbm %s5406_s5, %s2869_s12 }
 0x228   : > { %1209 = vrot.lane.b32.xlu1 %v1160_v43, %s3046_s14  ;;  %1440 = vrot.lane.b32.xlu0 %v4392_v20, %s3049_s17  ;;  %v1755_v20 = vsel %vm1723_vm12, %v1704_v22, %v4840_v54 }
 0x229   : > { %v1437_v23 = vpop.permute.xlu2 %1436 }
 0x22a   : > { %v1393_v52 = vpop.permute.xlu1 %1392  ;;  %v1305_v21 = vpop.permute.xlu0 %1304 }
 0x22b   : > { %v1767_v15 = vsel %vm1723_vm12, %v1716_v32, %v1305_v21  ;;  %v1806_v60 = vsel %vm1774_vm13, %v1755_v20, %v1393_v52 }
 0x22c   : > { %v1818_v13 = vsel %vm1774_vm13, %v1767_v15, %v1405_v16 }
 0x230   : > { %1410 = vrot.lane.b32.xlu0 %v1361_v0, %s3048_s16  ;;  %1466 = vrot.lane.b32.xlu1 %v1416_v30, %s3049_s17  ;;  %v4976_v0 = vld [vmem:[%s5405_s4] ss:$0 sm:$0xff]  ;;  %s2569_s16 = sshll.u32 %s2566_s15, 4  ;;  %s2552_s17 = scalar_lea.sflag [#allocation3], %s332_s7  ;;  %s2570_s16 = int_to_ptr.hbm [resolvable:$true] %s2569_s16 }
 0x231   : > { %v1295_v50 = vpop.permute.xlu2 %1294  ;;  %s2975_s22 = sshra.s32 %s2570_s16, 4  ;;  %s2976_s22 = int_to_ptr.hbm [resolvable:$true] %s2975_s22 }
 0x232   : > { %v1461_v19 = vpop.permute.xlu1 %1460  ;;  %v1449_v8 = vpop.permute.xlu0 %1448  ;;  %s2977_s23 = scalar_lea.hbm %s2976_s22, 192  ;;  %p2982_p1 = scmp.lt.s32.totalorder %s2976_s22, %s5406_s5 }
 0x233   : > { %v1869_v58 = vsel %vm1825_vm14, %v1818_v13, %v1461_v19  ;;  %v1857_v9 = vsel %vm1825_vm14, %v1806_v60, %v1449_v8  ;;  %p2978_p12 = scmp.ne.s32.totalorder %s2976_s22, %s2977_s23  ;;  %p2983_p2 = scmp.lt.s32.totalorder %s2981_s30, %s2977_s23 }
 0x234   : > { %v2052_v24 = vshrl.u32 %v1869_v58, 16  ;;  %v2055_v36 = vshll.u32 %v1869_v58, 16  ;;  %v2004_v6 = vshrl.u32 %v1857_v9, 16  ;;  %v2007_v7 = vshll.u32 %v1857_v9, 16 }
 0x235   : > { %p2979_p13 = pnand %p2978_p12, %p3123_p4  ;;  %p2984_p3 = por %p2983_p2, %p2982_p1 }
 0x236   : > { %v2054_v63 = vrot.slane %v2052_v24, 3  ;;  %v2057_v42 = vrot.slane %v2055_v36, 4  ;;  %v2006_v30 = vrot.slane %v2004_v6, 3  ;;  %v2009_v55 = vrot.slane %v2007_v7, 4 }
 0x237   : > { %p2980_p0 = pneg %p2979_p13 }
 0x238   : > { %v4938_v17 = vor.u32 %v2057_v42, %v2054_v63  ;;  %v4940_v54 = vor.u32 %v2009_v55, %v2006_v30 }
 0x239   : > { %v1407_v47 = vpop.permute.xlu2 %1406  ;;  %p2985_p5 = pnand %p2984_p3, %p2980_p0 }
 0x23a   : > { %v1281_v41 = vpop.permute.xlu1 %1280  ;;  %v1269_v16 = vpop.permute.xlu0 %1268  ;;  %v2011_v56 = vsel %vm1884_vm15, %v4855_v29, %v4940_v54  ;;  %v2059_v33 = vsel %vm1884_vm15, %v4853_v4, %v4938_v17 }
 0x23b   : > { %2820 = vmatmul.msk.bf16.gmra.mxu2 %vm2095_vm0, %v2011_v56  ;;  %2826 = vmatmul.msk.bf16.gmra.mxu3 %vm2095_vm0, %v2059_v33  ;;  %v1731_v14 = vsel %vm1723_vm12, %v4560_v61, %v1269_v16  ;;  %v1743_v26 = vsel %vm1723_vm12, %v1692_v40, %v1281_v41 }
 0x23c   : > { %v1782_v29 = vsel %vm1774_vm13, %v1731_v14, %v1369_v45 }
 0x241   : > { %v1182_v34 = vpop.permute.xlu2 %1181 }
 0x242   : > { %v1425_v57 = vpop.permute.xlu1 %1424  ;;  %v1381_v59 = vpop.permute.xlu0 %1380 }
 0x243   : > { %v1833_v4 = vsel %vm1825_vm14, %v1782_v29, %v1425_v57  ;;  %v1794_v48 = vsel %vm1774_vm13, %v1743_v26, %v1381_v59 }
 0x244   : > { %v1908_v38 = vshrl.u32 %v1833_v4, 16  ;;  %v1911_v62 = vshll.u32 %v1833_v4, 16  ;;  %v1845_v31 = vsel %vm1825_vm14, %v1794_v48, %v1437_v23 }
 0x245   : > { %v1956_v61 = vshrl.u32 %v1845_v31, 16  ;;  %v1959_v25 = vshll.u32 %v1845_v31, 16 }
 0x246   : > { %v1910_v3 = vrot.slane %v1908_v38, 3  ;;  %v1913_v51 = vrot.slane %v1911_v62, 4 }
 0x247   : > { %v1958_v28 = vrot.slane %v1956_v61, 3  ;;  %v1961_v27 = vrot.slane %v1959_v25, 4  ;;  %v5732_v25 = vld [vmem:[#allocation17_spill] sm:$0xff] }
 0x248   : > { %v4960_v1 = vor.u32 %v1913_v51, %v1910_v3  ;;  %v1694_v3 = vsel %vm1672_vm9, %v5732_v25, %v1182_v34 }
 0x249   : > { %v4962_v2 = vor.u32 %v1961_v27, %v1958_v28  ;;  %v1371_v22 = vpop.permute.xlu2 %1370 }
 0x24a   : > { %v1206_v10 = vpop.permute.xlu1 %1205  ;;  %v1194_v43 = vpop.permute.xlu0 %1193  ;;  %v1915_v45 = vsel %vm1884_vm15, %v4899_v49, %v4960_v1 }
 0x24b   : > { %2808 = vmatmul.msk.bf16.gmra.mxu0 %vm2095_vm0, %v1915_v45  ;;  %v1963_v12 = vsel %vm1884_vm15, %v4903_v53, %v4962_v2  ;;  %v1718_v49 = vsel %vm1672_vm9, %v4476_v46, %v1206_v10  ;;  %v1706_v32 = vsel %vm1672_vm9, %v4382_v35, %v1194_v43 }
 0x24c   : > { %2814 = vmatmul.msk.bf16.gmra.mxu1 %vm2095_vm0, %v1963_v12  ;;  %v1757_v20 = vsel %vm1723_vm12, %v1706_v32, %v1295_v50 }
 0x251   : > { %v1439_v11 = vpop.permute.xlu2 %1438 }
 0x252   : > { %v1395_v52 = vpop.permute.xlu1 %1394  ;;  %v1307_v21 = vpop.permute.xlu0 %1306 }
 0x253   : > { %v1769_v23 = vsel %vm1723_vm12, %v1718_v49, %v1307_v21  ;;  %v1808_v19 = vsel %vm1774_vm13, %v1757_v20, %v1395_v52 }
 0x254   : > { %v1820_v46 = vsel %vm1774_vm13, %v1769_v23, %v1407_v47 }
 0x256   : > { %v2244_v53 = vpop.f32.mrf.mxu2 }
 0x257   : > { %v2245_v15 = vadd.f32 %v4976_v0, %v2244_v53 }
 0x259   : > { %v2328_v60 = vmax.f32 %v2245_v15, 0.0  ;;  %v1297_v45 = vpop.permute.xlu2 %1296 }
 0x25a   : > { %v1463_v13 = vpop.permute.xlu1 %1462  ;;  %v1451_v8 = vpop.permute.xlu0 %1450 }
 0x25b   : > { %v2376_v58 = vpack.c.bf16 %v2328_v60, %v2328_v60  ;;  %v1871_v35 = vsel %vm1825_vm14, %v1820_v46, %v1463_v13  ;;  %v1859_v9 = vsel %vm1825_vm14, %v1808_v19, %v1451_v8 }
 0x25c   : > { %v2060_v24 = vshrl.u32 %v1871_v35, 16  ;;  %v2063_v36 = vshll.u32 %v1871_v35, 16  ;;  %v2012_v6 = vshrl.u32 %v1859_v9, 16  ;;  %v2015_v7 = vshll.u32 %v1859_v9, 16 }
 0x25d   : > { %2425 = vst.msk [vmem:[%s4991_s11 + $0x60] sm:$0xf] %vm2400_vm1, %v2376_v58 }
 0x25e   : > { %v2062_v63 = vrot.slane %v2060_v24, 3  ;;  %v2065_v42 = vrot.slane %v2063_v36, 4  ;;  %v2014_v30 = vrot.slane %v2012_v6, 3  ;;  %v2017_v55 = vrot.slane %v2015_v7, 4  ;;  %v2246_v50 = vpop.f32.mrf.mxu2  ;;  %v2274_v41 = vpop.f32.mrf.mxu3 }
 0x25f   : > { %v2247_v16 = vadd.f32 %v4976_v0, %v2246_v50  ;;  %v2275_v56 = vadd.f32 %v4976_v0, %v2274_v41 }
 0x260   : > { %v4997_v33 = vor.u32 %v2065_v42, %v2062_v63  ;;  %v4999_v14 = vor.u32 %v2017_v55, %v2014_v30 }
 0x261   : > { %v2329_v40 = vmax.f32 %v2247_v16, 0.0  ;;  %v2340_v26 = vmax.f32 %v2275_v56, 0.0  ;;  %v1409_v24 = vpop.permute.xlu2 %1408  ;;  %v5733_v16 = vld [vmem:[#allocation53_spill] sm:$0xff]  ;;  %v5734_v56 = vld [vmem:[#allocation24_spill] sm:$0xff] }
 0x262   : > { %v1283_v29 = vpop.permute.xlu1 %1282  ;;  %v1271_v59 = vpop.permute.xlu0 %1270  ;;  %v2019_v47 = vsel %vm1884_vm15, %v4940_v54, %v4999_v14  ;;  %v2067_v4 = vsel %vm1884_vm15, %v4938_v17, %v4997_v33 }
 0x263   : > { %v2377_v48 = vpack.c.bf16 %v2329_v40, %v2329_v40  ;;  %v2388_v38 = vpack.c.bf16 %v2340_v26, %v2340_v26  ;;  %2821 = vmatmul.msk.bf16.gmra.mxu2 %vm2095_vm0, %v2019_v47  ;;  %2827 = vmatmul.msk.bf16.gmra.mxu3 %vm2095_vm0, %v2067_v4  ;;  %v1733_v17 = vsel %vm1723_vm12, %v4424_v44, %v1271_v59 }
 0x264   : > { %v2476_v62 = vld [vmem:[%s4991_s11 + $0x60] sm:$0x1]  ;;  %v1745_v28 = vsel %vm1723_vm12, %v1694_v3, %v1283_v29  ;;  %v1784_v10 = vsel %vm1774_vm13, %v1733_v17, %v1371_v22 }
 0x265   : > { %v2477_v31 = vsel %vm5001_vm4, 0, %v2476_v62  ;;  %2426 = vst.msk [vmem:[%s4991_s11 + $0x64] sm:$0xf] %vm2400_vm1, %v2377_v48 }
 0x266   : > { %2478 = vst [vmem:[%s4991_s11 + $0x60] sm:$0x1] %v2477_v31  ;;  %v2276_v61 = vpop.f32.mrf.mxu3 }
 0x267   : > { %2437 = vst.msk [vmem:[%s4991_s11 + $0x90] sm:$0xf] %vm2400_vm1, %v2388_v38  ;;  %v2277_v54 = vadd.f32 %v4976_v0, %v2276_v61 }
 0x269   : > { %v2341_v51 = vmax.f32 %v2277_v54, 0.0  ;;  %v1172_v40 = vpop.permute.xlu2 %1171 }
 0x26a   : > { %v1427_v27 = vpop.permute.xlu1 %1426  ;;  %v1383_v43 = vpop.permute.xlu0 %1382 }
 0x26b   : > { %v2389_v12 = vpack.c.bf16 %v2341_v51, %v2341_v51  ;;  %v1835_v52 = vsel %vm1825_vm14, %v1784_v10, %v1427_v27  ;;  %v1796_v44 = vsel %vm1774_vm13, %v1745_v28, %v1383_v43 }
 0x26c   : > { %v1916_v21 = vshrl.u32 %v1835_v52, 16  ;;  %v1919_v49 = vshll.u32 %v1835_v52, 16  ;;  %v1847_v32 = vsel %vm1825_vm14, %v1796_v44, %v1439_v11 }
 0x26d   : > { %2438 = vst.msk [vmem:[%s4991_s11 + $0x94] sm:$0xf] %vm2400_vm1, %v2389_v12  ;;  %v1964_v34 = vshrl.u32 %v1847_v32, 16  ;;  %v1967_v53 = vshll.u32 %v1847_v32, 16 }
 0x26e   : > { %v2488_v23 = vld [vmem:[%s4991_s11 + $0x90] sm:$0x1]  ;;  %v1918_v15 = vrot.slane %v1916_v21, 3  ;;  %v1921_v20 = vrot.slane %v1919_v49, 4 }
 0x26f   : > { %v2489_v22 = vsel %vm5001_vm4, 0, %v2488_v23  ;;  %v1966_v60 = vrot.slane %v1964_v34, 3  ;;  %v1969_v19 = vrot.slane %v1967_v53, 4 }
 0x270   : > { %2490 = vst [vmem:[%s4991_s11 + $0x90] sm:$0x1] %v2489_v22  ;;  %v5037_v13 = vor.u32 %v1921_v20, %v1918_v15 }
 0x271   : > { %v5039_v46 = vor.u32 %v1969_v19, %v1966_v60  ;;  %v1285_v53 = vpop.permute.xlu2 %1284 }
 0x272   : > { %v1208_v8 = vpop.permute.xlu1 %1207  ;;  %v1196_v58 = vpop.permute.xlu0 %1195  ;;  %v1923_v35 = vsel %vm1884_vm15, %v4960_v1, %v5037_v13 }
 0x273   : > { %2809 = vmatmul.msk.bf16.gmra.mxu0 %vm2095_vm0, %v1923_v35  ;;  %v1971_v9 = vsel %vm1884_vm15, %v4962_v2, %v5039_v46  ;;  %v1720_v2 = vsel %vm1672_vm9, %v5733_v16, %v1208_v8  ;;  %v1708_v11 = vsel %vm1672_vm9, %v5734_v56, %v1196_v58  ;;  %v5735_v58 = vld [vmem:[#allocation63_spill] sm:$0xff] }
 0x274   : > { %2815 = vmatmul.msk.bf16.gmra.mxu1 %vm2095_vm0, %v1971_v9  ;;  %v1759_v47 = vsel %vm1723_vm12, %v1708_v11, %v1297_v45  ;;  %v1684_v35 = vsel %vm1672_vm9, %v5735_v58, %v1172_v40 }
 0x278   : > { %v2184_v36 = vpop.f32.mrf.mxu0  ;;  %v2214_v6 = vpop.f32.mrf.mxu1 }
 0x279   : > { %v2185_v7 = vadd.f32 %v4976_v0, %v2184_v36  ;;  %v2215_v63 = vadd.f32 %v4976_v0, %v2214_v6  ;;  %v1429_v9 = vpop.permute.xlu2 %1428 }
 0x27a   : > { %v1397_v42 = vpop.permute.xlu1 %1396  ;;  %v1309_v30 = vpop.permute.xlu0 %1308 }
 0x27b   : > { %v2304_v1 = vmax.f32 %v2185_v7, 0.0  ;;  %v2316_v55 = vmax.f32 %v2215_v63, 0.0  ;;  %v1771_v26 = vsel %vm1723_vm12, %v1720_v2, %v1309_v30  ;;  %v1810_v38 = vsel %vm1774_vm13, %v1759_v47, %v1397_v42  ;;  %v5736_v30 = vld [vmem:[#allocation66_spill] sm:$0xff] }
 0x27c   : > { %v1822_v31 = vsel %vm1774_vm13, %v1771_v26, %v1409_v24 }
 0x27d   : > { %v2352_v50 = vpack.c.bf16 %v2304_v1, %v2304_v1  ;;  %v2364_v41 = vpack.c.bf16 %v2316_v55, %v2316_v55 }
 0x27f   : > { %2401 = vst.msk [vmem:[%s4991_s11] sm:$0xf] %vm2400_vm1, %v2352_v50 }
 0x280   : > { %2413 = vst.msk [vmem:[%s4991_s11 + $0x30] sm:$0xf] %vm2400_vm1, %v2364_v41  ;;  %v2186_v29 = vpop.f32.mrf.mxu0  ;;  %v2216_v59 = vpop.f32.mrf.mxu1 }
 0x281   : > { %v2187_v4 = vadd.f32 %v4976_v0, %v2186_v29  ;;  %v2217_v48 = vadd.f32 %v4976_v0, %v2216_v59 }
 0x282   : > { %v1465_v62 = vpop.permute.xlu1 %1464  ;;  %v1453_v61 = vpop.permute.xlu0 %1452 }
 0x283   : > { %v2305_v17 = vmax.f32 %v2187_v4, 0.0  ;;  %v2317_v54 = vmax.f32 %v2217_v48, 0.0  ;;  %v1873_v25 = vsel %vm1825_vm14, %v1822_v31, %v1465_v62  ;;  %v1861_v3 = vsel %vm1825_vm14, %v1810_v38, %v1453_v61 }
 0x284   : > { %v2068_v51 = vshrl.u32 %v1873_v25, 16  ;;  %v2071_v28 = vshll.u32 %v1873_v25, 16  ;;  %v2020_v27 = vshrl.u32 %v1861_v3, 16  ;;  %v2023_v10 = vshll.u32 %v1861_v3, 16 }
 0x285   : > { %v2353_v43 = vpack.c.bf16 %v2305_v17, %v2305_v17  ;;  %v2365_v45 = vpack.c.bf16 %v2317_v54, %v2317_v54 }
 0x286   : > { %v2452_v12 = vld [vmem:[%s4991_s11] sm:$0x1]  ;;  %v2070_v52 = vrot.slane %v2068_v51, 3  ;;  %v2073_v44 = vrot.slane %v2071_v28, 4  ;;  %v2022_v21 = vrot.slane %v2020_v27, 3  ;;  %v2025_v49 = vrot.slane %v2023_v10, 4  ;;  %v1311_v28 = vpop.permute.xlu2 %1310 }
 0x287   : > { %v2453_v32 = vsel %vm5001_vm4, 0, %v2452_v12  ;;  %v2464_v34 = vld [vmem:[%s4991_s11 + $0x30] sm:$0x1]  ;;  %2402 = vst.msk [vmem:[%s4991_s11 + $0x4] sm:$0xf] %vm2400_vm1, %v2353_v43 }
 0x288   : > { %2454 = vst [vmem:[%s4991_s11] sm:$0x1] %v2453_v32  ;;  %v2465_v23 = vsel %vm5001_vm4, 0, %v2464_v34  ;;  %v5076_v15 = vor.u32 %v2073_v44, %v2070_v52  ;;  %v2026_v20 = vor.u32 %v2025_v49, %v2022_v21 }
 0x289   : > { %2466 = vst [vmem:[%s4991_s11 + $0x30] sm:$0x1] %v2465_v23 }
 0x28a   : > { %2414 = vst.msk [vmem:[%s4991_s11 + $0x34] sm:$0xf] %vm2400_vm1, %v2365_v45  ;;  %v1273_v22 = vpop.permute.xlu1 %1272  ;;  %v1184_v60 = vpop.permute.xlu0 %1183  ;;  %v2027_v19 = vsel %vm1884_vm15, %v4999_v14, %v2026_v20  ;;  %v2075_v8 = vsel %vm1884_vm15, %v4997_v33, %v5076_v15  ;;  %v2035_v4 = vsel %vm1884_vm15, %v2026_v20, %v4713_v5 }
 0x28b   : > { %2822 = vmatmul.msk.bf16.gmra.mxu2 %vm2095_vm0, %v2027_v19  ;;  %2828 = vmatmul.msk.bf16.gmra.mxu3 %vm2095_vm0, %v2075_v8  ;;  %v1735_v24 = vsel %vm1723_vm12, %v1684_v35, %v1273_v22  ;;  %v1696_v33 = vsel %vm1672_vm9, %v5736_v30, %v1184_v60 }
 0x28c   : > { %v1747_v56 = vsel %vm1723_vm12, %v1696_v33, %v1285_v53 }
 0x292   : > { %v1385_v36 = vpop.permute.xlu1 %1384  ;;  %v1373_v6 = vpop.permute.xlu0 %1372 }
 0x293   : > { %v1786_v7 = vsel %vm1774_vm13, %v1735_v24, %v1373_v6  ;;  %v1798_v29 = vsel %vm1774_vm13, %v1747_v56, %v1385_v36 }
 0x294   : > { %v1837_v14 = vsel %vm1825_vm14, %v1786_v7, %v1429_v9 }
 0x295   : > { %v1924_v63 = vshrl.u32 %v1837_v14, 16  ;;  %v1927_v42 = vshll.u32 %v1837_v14, 16 }
 0x296   : > { %v2249_v1 = vpop.f32.mrf.mxu2  ;;  %v2279_v55 = vpop.f32.mrf.mxu3 }
 0x297   : > { %v1926_v50 = vrot.slane %v1924_v63, 3  ;;  %v1929_v41 = vrot.slane %v1927_v42, 4  ;;  %v2250_v16 = vadd.f32 %v4976_v0, %v2249_v1  ;;  %v2280_v2 = vadd.f32 %v4976_v0, %v2279_v55 }
 0x299   : > { %v5098_v11 = vor.u32 %v1929_v41, %v1926_v50  ;;  %v2330_v40 = vmax.f32 %v2250_v16, 0.0  ;;  %v2342_v26 = vmax.f32 %v2280_v2, 0.0 }
 0x29a   : > { %v1210_v59 = vpop.permute.xlu1 %1209  ;;  %v1441_v47 = vpop.permute.xlu0 %1440 }
 0x29b   : > { %v2378_v48 = vpack.c.bf16 %v2330_v40, %v2330_v40  ;;  %v2390_v38 = vpack.c.bf16 %v2342_v26, %v2342_v26  ;;  %v1849_v62 = vsel %vm1825_vm14, %v1798_v29, %v1441_v47  ;;  %2823 = vmatmul.msk.bf16.gmra.mxu2 %vm2095_vm0, %v2035_v4  ;;  %v1931_v17 = vsel %vm1884_vm15, %v5037_v13, %v5098_v11 }
 0x29c   : > { %v1972_v31 = vshrl.u32 %v1849_v62, 16  ;;  %v1975_v61 = vshll.u32 %v1849_v62, 16  ;;  %2810 = vmatmul.msk.bf16.gmra.mxu0 %vm2095_vm0, %v1931_v17  ;;  %v1722_v51 = vsel %vm1672_vm9, %v4523_v18, %v1210_v59  ;;  %v1939_v2 = vsel %vm1884_vm15, %v5098_v11, %v4791_v39 }
 0x29d   : > { %2427 = vst.msk [vmem:[%s4991_s11 + $0x68] sm:$0xf] %vm2400_vm1, %v2378_v48  ;;  %v1773_v18 = vsel %vm1723_vm12, %v1722_v51, %v1311_v28 }
 0x29e   : > { %2439 = vst.msk [vmem:[%s4991_s11 + $0x98] sm:$0xf] %vm2400_vm1, %v2390_v38  ;;  %v1974_v54 = vrot.slane %v1972_v31, 3  ;;  %v1977_v5 = vrot.slane %v1975_v61, 4  ;;  %v2251_v25 = vpop.f32.mrf.mxu2  ;;  %v2281_v3 = vpop.f32.mrf.mxu3 }
 0x29f   : > { %v2252_v27 = vadd.f32 %v4976_v0, %v2251_v25  ;;  %v2282_v10 = vadd.f32 %v4976_v0, %v2281_v3 }
 0x2a0   : > { %v1978_v13 = vor.u32 %v1977_v5, %v1974_v54  ;;  %v2189_v43 = vpop.f32.mrf.mxu0 }
 0x2a1   : > { %v2331_v45 = vmax.f32 %v2252_v27, 0.0  ;;  %v2343_v12 = vmax.f32 %v2282_v10, 0.0  ;;  %v2190_v52 = vadd.f32 %v4976_v0, %v2189_v43  ;;  %v2219_v44 = vpop.f32.mrf.mxu1 }
 0x2a2   : > { %v2220_v49 = vadd.f32 %v4976_v0, %v2219_v44  ;;  %v1411_v32 = vpop.permute.xlu0 %1410  ;;  %v1467_v34 = vpop.permute.xlu1 %1466  ;;  %v1979_v53 = vsel %vm1884_vm15, %v5039_v46, %v1978_v13  ;;  %v1987_v48 = vsel %vm1884_vm15, %v1978_v13, %v4689_v37 }
 0x2a3   : > { %v2379_v23 = vpack.c.bf16 %v2331_v45, %v2331_v45  ;;  %v2306_v20 = vmax.f32 %v2190_v52, 0.0  ;;  %v1824_v22 = vsel %vm1774_vm13, %v1773_v18, %v1411_v32  ;;  %2816 = vmatmul.msk.bf16.gmra.mxu1 %vm2095_vm0, %v1979_v53  ;;  %v2391_v19 = vpack.c.bf16 %v2343_v12, %v2343_v12 }
 0x2a4   : > { %v2527_v60 = vld [vmem:[%s4991_s11 + $0x68] sm:$0xf]  ;;  %v2318_v8 = vmax.f32 %v2220_v49, 0.0  ;;  %v1875_v58 = vsel %vm1825_vm14, %v1824_v22, %v1467_v34 }
 0x2a5   : > { %v2528_v35 = vsel %vm5119_vm6, 0, %v2527_v60  ;;  %v2539_v9 = vld [vmem:[%s4991_s11 + $0x98] sm:$0xf]  ;;  %2428 = vst.msk [vmem:[%s4991_s11 + $0x6c] sm:$0xf] %vm2400_vm1, %v2379_v23  ;;  %v2354_v46 = vpack.c.bf16 %v2306_v20, %v2306_v20  ;;  %v2076_v24 = vshrl.u32 %v1875_v58, 16 }
 0x2a6   : > { %2529 = vst [vmem:[%s4991_s11 + $0x68] sm:$0xf] %v2528_v35  ;;  %v2540_v36 = vsel %vm5119_vm6, 0, %v2539_v9  ;;  %v2366_v6 = vpack.c.bf16 %v2318_v8, %v2318_v8  ;;  %v2079_v7 = vshll.u32 %v1875_v58, 16 }
 0x2a7   : > { %2541 = vst [vmem:[%s4991_s11 + $0x98] sm:$0xf] %v2540_v36  ;;  %v2078_v14 = vrot.slane %v2076_v24, 3 }
 0x2a8   : > { %2440 = vst.msk [vmem:[%s4991_s11 + $0x9c] sm:$0xf] %vm2400_vm1, %v2391_v19  ;;  %v2081_v63 = vrot.slane %v2079_v7, 4  ;;  %v2191_v42 = vpop.f32.mrf.mxu0 }
 0x2a9   : > { %2403 = vst.msk [vmem:[%s4991_s11 + $0x8] sm:$0xf] %vm2400_vm1, %v2354_v46  ;;  %v2192_v30 = vadd.f32 %v4976_v0, %v2191_v42  ;;  %v2221_v33 = vpop.f32.mrf.mxu1 }
 0x2aa   : > { %2415 = vst.msk [vmem:[%s4991_s11 + $0x38] sm:$0xf] %vm2400_vm1, %v2366_v6  ;;  %v2082_v1 = vor.u32 %v2081_v63, %v2078_v14  ;;  %v2222_v55 = vadd.f32 %v4976_v0, %v2221_v33 }
 0x2ab   : > { %v2307_v50 = vmax.f32 %v2192_v30, 0.0 }
 0x2ac   : > { %v2479_v41 = vld [vmem:[%s4991_s11 + $0x6c] sm:$0x1]  ;;  %v2319_v16 = vmax.f32 %v2222_v55, 0.0  ;;  %v2083_v56 = vsel %vm1884_vm15, %v5076_v15, %v2082_v1  ;;  %2811 = vmatmul.msk.bf16.gmra.mxu0 %vm2095_vm0, %v1939_v2 }
 0x2ad   : > { %v2480_v40 = vsel %vm5001_vm4, 0, %v2479_v41  ;;  %v2355_v26 = vpack.c.bf16 %v2307_v50, %v2307_v50  ;;  %2829 = vmatmul.msk.bf16.gmra.mxu3 %vm2095_vm0, %v2083_v56 }
 0x2ae   : > { %2481 = vst [vmem:[%s4991_s11 + $0x6c] sm:$0x1] %v2480_v40  ;;  %v2367_v29 = vpack.c.bf16 %v2319_v16, %v2319_v16 }
 0x2af   : > { %v2491_v59 = vld [vmem:[%s4991_s11 + $0x9c] sm:$0x1]  ;;  %2404 = vst.msk [vmem:[%s4991_s11 + $0xc] sm:$0xf] %vm2400_vm1, %v2355_v26 }
 0x2b0   : > { %v2492_v39 = vsel %vm5001_vm4, 0, %v2491_v59  ;;  %v2503_v15 = vld [vmem:[%s4991_s11 + $0x8] sm:$0xf]  ;;  %2416 = vst.msk [vmem:[%s4991_s11 + $0x3c] sm:$0xf] %vm2400_vm1, %v2367_v29 }
 0x2b1   : > { %2493 = vst [vmem:[%s4991_s11 + $0x9c] sm:$0x1] %v2492_v39  ;;  %v2504_v11 = vsel %vm5119_vm6, 0, %v2503_v15  ;;  %v2515_v47 = vld [vmem:[%s4991_s11 + $0x38] sm:$0xf] }
 0x2b2   : > { %2505 = vst [vmem:[%s4991_s11 + $0x8] sm:$0xf] %v2504_v11  ;;  %v2516_v4 = vsel %vm5119_vm6, 0, %v2515_v47 }
 0x2b3   : > { %2517 = vst [vmem:[%s4991_s11 + $0x38] sm:$0xf] %v2516_v4  ;;  %2817 = vmatmul.msk.bf16.gmra.mxu1 %vm2095_vm0, %v1987_v48 }
 0x2b6   : > { %v2455_v38 = vld [vmem:[%s4991_s11 + $0xc] sm:$0x1] }
 0x2b7   : > { %v2456_v62 = vsel %vm5001_vm4, 0, %v2455_v38  ;;  %v2467_v31 = vld [vmem:[%s4991_s11 + $0x3c] sm:$0x1] }
 0x2b8   : > { %2457 = vst [vmem:[%s4991_s11 + $0xc] sm:$0x1] %v2456_v62  ;;  %v2468_v61 = vsel %vm5001_vm4, 0, %v2467_v31 }
 0x2b9   : > { %2469 = vst [vmem:[%s4991_s11 + $0x3c] sm:$0x1] %v2468_v61 }
 0x2be   : > { %v2254_v17 = vpop.f32.mrf.mxu2  ;;  %v2284_v54 = vpop.f32.mrf.mxu3 }
 0x2bf   : > { %v2255_v5 = vadd.f32 %v4976_v0, %v2254_v17  ;;  %v2285_v37 = vadd.f32 %v4976_v0, %v2284_v54 }
 0x2c1   : > { %v2332_v25 = vmax.f32 %v2255_v5, 0.0  ;;  %v2344_v3 = vmax.f32 %v2285_v37, 0.0 }
 0x2c3   : > { %v2380_v51 = vpack.c.bf16 %v2332_v25, %v2332_v25  ;;  %v2392_v28 = vpack.c.bf16 %v2344_v3, %v2344_v3 }
 0x2c5   : > { %2429 = vst.msk [vmem:[%s4991_s11 + $0x70] sm:$0xf] %vm2400_vm1, %v2380_v51 }
 0x2c6   : > { %2441 = vst.msk [vmem:[%s4991_s11 + $0xa0] sm:$0xf] %vm2400_vm1, %v2392_v28  ;;  %v2256_v27 = vpop.f32.mrf.mxu2  ;;  %v2286_v10 = vpop.f32.mrf.mxu3 }
 0x2c7   : > { %v2257_v13 = vadd.f32 %v4976_v0, %v2256_v27  ;;  %v2287_v43 = vadd.f32 %v4976_v0, %v2286_v10 }
 0x2c8   : > { %v2194_v45 = vpop.f32.mrf.mxu0 }
 0x2c9   : > { %v2333_v12 = vmax.f32 %v2257_v13, 0.0  ;;  %v2345_v52 = vmax.f32 %v2287_v43, 0.0  ;;  %v2195_v44 = vadd.f32 %v4976_v0, %v2194_v45  ;;  %v2224_v18 = vpop.f32.mrf.mxu1 }
 0x2ca   : > { %v2225_v49 = vadd.f32 %v4976_v0, %v2224_v18 }
 0x2cb   : > { %v2381_v32 = vpack.c.bf16 %v2333_v12, %v2333_v12  ;;  %v2393_v34 = vpack.c.bf16 %v2345_v52, %v2345_v52  ;;  %v2308_v53 = vmax.f32 %v2195_v44, 0.0 }
 0x2cc   : > { %v2320_v23 = vmax.f32 %v2225_v49, 0.0 }
 0x2cd   : > { %2430 = vst.msk [vmem:[%s4991_s11 + $0x74] sm:$0xf] %vm2400_vm1, %v2381_v32  ;;  %v2356_v20 = vpack.c.bf16 %v2308_v53, %v2308_v53 }
 0x2ce   : > { %2442 = vst.msk [vmem:[%s4991_s11 + $0xa4] sm:$0xf] %vm2400_vm1, %v2393_v34  ;;  %v2368_v22 = vpack.c.bf16 %v2320_v23, %v2320_v23 }
 0x2cf   : > { %2405 = vst.msk [vmem:[%s4991_s11 + $0x10] sm:$0xf] %vm2400_vm1, %v2356_v20 }
 0x2d0   : > { %2417 = vst.msk [vmem:[%s4991_s11 + $0x40] sm:$0xf] %vm2400_vm1, %v2368_v22  ;;  %v2196_v60 = vpop.f32.mrf.mxu0 }
 0x2d1   : > { %v2197_v19 = vadd.f32 %v4976_v0, %v2196_v60  ;;  %v2226_v8 = vpop.f32.mrf.mxu1 }
 0x2d2   : > { %v2227_v58 = vadd.f32 %v4976_v0, %v2226_v8 }
 0x2d3   : > { %v2309_v35 = vmax.f32 %v2197_v19, 0.0 }
 0x2d4   : > { %v2530_v9 = vld [vmem:[%s4991_s11 + $0x74] sm:$0xf]  ;;  %v2321_v46 = vmax.f32 %v2227_v58, 0.0 }
 0x2d5   : > { %v2531_v24 = vsel %vm5119_vm6, 0, %v2530_v9  ;;  %v2542_v36 = vld [vmem:[%s4991_s11 + $0xa4] sm:$0xf]  ;;  %v2357_v6 = vpack.c.bf16 %v2309_v35, %v2309_v35 }
 0x2d6   : > { %2532 = vst [vmem:[%s4991_s11 + $0x74] sm:$0xf] %v2531_v24  ;;  %v2543_v7 = vsel %vm5119_vm6, 0, %v2542_v36  ;;  %v2369_v14 = vpack.c.bf16 %v2321_v46, %v2321_v46 }
 0x2d7   : > { %2544 = vst [vmem:[%s4991_s11 + $0xa4] sm:$0xf] %v2543_v7 }
 0x2d8   : > { %2406 = vst.msk [vmem:[%s4991_s11 + $0x14] sm:$0xf] %vm2400_vm1, %v2357_v6 }
 0x2d9   : > { %2418 = vst.msk [vmem:[%s4991_s11 + $0x44] sm:$0xf] %vm2400_vm1, %v2369_v14 }
 0x2df   : > { %v2506_v63 = vld [vmem:[%s4991_s11 + $0x14] sm:$0xf] }
 0x2e0   : > { %v2507_v42 = vsel %vm5119_vm6, 0, %v2506_v63  ;;  %v2518_v30 = vld [vmem:[%s4991_s11 + $0x44] sm:$0xf] }
 0x2e1   : > { %2508 = vst [vmem:[%s4991_s11 + $0x14] sm:$0xf] %v2507_v42  ;;  %v2519_v33 = vsel %vm5119_vm6, 0, %v2518_v30 }
 0x2e2   : > { %2520 = vst [vmem:[%s4991_s11 + $0x44] sm:$0xf] %v2519_v33 }
 0x2e6   : > { %v2259_v1 = vpop.f32.mrf.mxu2  ;;  %v2289_v50 = vpop.f32.mrf.mxu3 }
 0x2e7   : > { %v2260_v55 = vadd.f32 %v4976_v0, %v2259_v1  ;;  %v2290_v41 = vadd.f32 %v4976_v0, %v2289_v50 }
 0x2e9   : > { %v2334_v16 = vmax.f32 %v2260_v55, 0.0  ;;  %v2346_v2 = vmax.f32 %v2290_v41, 0.0 }
 0x2eb   : > { %v2382_v56 = vpack.c.bf16 %v2334_v16, %v2334_v16  ;;  %v2394_v40 = vpack.c.bf16 %v2346_v2, %v2346_v2 }
 0x2ed   : > { %2431 = vst.msk [vmem:[%s4991_s11 + $0x78] sm:$0xf] %vm2400_vm1, %v2382_v56 }
 0x2ee   : > { %2443 = vst.msk [vmem:[%s4991_s11 + $0xa8] sm:$0xf] %vm2400_vm1, %v2394_v40  ;;  %v2261_v26 = vpop.f32.mrf.mxu2  ;;  %v2291_v59 = vpop.f32.mrf.mxu3 }
 0x2ef   : > { %v2262_v29 = vadd.f32 %v4976_v0, %v2261_v26  ;;  %v2292_v39 = vadd.f32 %v4976_v0, %v2291_v59 }
 0x2f0   : > { %v2199_v15 = vpop.f32.mrf.mxu0 }
 0x2f1   : > { %v2335_v11 = vmax.f32 %v2262_v29, 0.0  ;;  %v2200_v47 = vadd.f32 %v4976_v0, %v2199_v15  ;;  %v2229_v4 = vpop.f32.mrf.mxu1  ;;  %v2347_v48 = vmax.f32 %v2292_v39, 0.0 }
 0x2f2   : > { %v2230_v38 = vadd.f32 %v4976_v0, %v2229_v4 }
 0x2f3   : > { %v2383_v62 = vpack.c.bf16 %v2335_v11, %v2335_v11  ;;  %v2310_v31 = vmax.f32 %v2200_v47, 0.0  ;;  %v2395_v17 = vpack.c.bf16 %v2347_v48, %v2347_v48 }
 0x2f4   : > { %v2482_v61 = vld [vmem:[%s4991_s11 + $0x78] sm:$0x1]  ;;  %v2322_v54 = vmax.f32 %v2230_v38, 0.0 }
 0x2f5   : > { %v2483_v5 = vsel %vm5001_vm4, 0, %v2482_v61  ;;  %v2494_v37 = vld [vmem:[%s4991_s11 + $0xa8] sm:$0x1]  ;;  %2432 = vst.msk [vmem:[%s4991_s11 + $0x7c] sm:$0xf] %vm2400_vm1, %v2383_v62  ;;  %v2358_v25 = vpack.c.bf16 %v2310_v31, %v2310_v31 }
 0x2f6   : > { %2484 = vst [vmem:[%s4991_s11 + $0x78] sm:$0x1] %v2483_v5  ;;  %v2495_v3 = vsel %vm5001_vm4, 0, %v2494_v37  ;;  %v2370_v51 = vpack.c.bf16 %v2322_v54, %v2322_v54 }
 0x2f7   : > { %2496 = vst [vmem:[%s4991_s11 + $0xa8] sm:$0x1] %v2495_v3 }
 0x2f8   : > { %2444 = vst.msk [vmem:[%s4991_s11 + $0xac] sm:$0xf] %vm2400_vm1, %v2395_v17  ;;  %v2201_v28 = vpop.f32.mrf.mxu0 }
 0x2f9   : > { %2407 = vst.msk [vmem:[%s4991_s11 + $0x18] sm:$0xf] %vm2400_vm1, %v2358_v25  ;;  %v2202_v27 = vadd.f32 %v4976_v0, %v2201_v28  ;;  %v2231_v10 = vpop.f32.mrf.mxu1 }
 0x2fa   : > { %2419 = vst.msk [vmem:[%s4991_s11 + $0x48] sm:$0xf] %vm2400_vm1, %v2370_v51  ;;  %v2232_v13 = vadd.f32 %v4976_v0, %v2231_v10 }
 0x2fb   : > { %v2311_v43 = vmax.f32 %v2202_v27, 0.0 }
 0x2fc   : > { %v2323_v45 = vmax.f32 %v2232_v13, 0.0 }
 0x2fd   : > { %v2359_v12 = vpack.c.bf16 %v2311_v43, %v2311_v43 }
 0x2fe   : > { %v2371_v52 = vpack.c.bf16 %v2323_v45, %v2323_v45 }
 0x2ff   : > { %2408 = vst.msk [vmem:[%s4991_s11 + $0x1c] sm:$0xf] %vm2400_vm1, %v2359_v12 }
 0x300   : > { %v2458_v44 = vld [vmem:[%s4991_s11 + $0x18] sm:$0x1]  ;;  %2420 = vst.msk [vmem:[%s4991_s11 + $0x4c] sm:$0xf] %vm2400_vm1, %v2371_v52 }
 0x301   : > { %v2459_v18 = vsel %vm5001_vm4, 0, %v2458_v44  ;;  %v2470_v49 = vld [vmem:[%s4991_s11 + $0x48] sm:$0x1] }
 0x302   : > { %2460 = vst [vmem:[%s4991_s11 + $0x18] sm:$0x1] %v2459_v18  ;;  %v2471_v32 = vsel %vm5001_vm4, 0, %v2470_v49 }
 0x303   : > { %2472 = vst [vmem:[%s4991_s11 + $0x48] sm:$0x1] %v2471_v32 }
 0x30e   : > { %v2264_v34 = vpop.f32.mrf.mxu2  ;;  %v2294_v53 = vpop.f32.mrf.mxu3 }
 0x30f   : > { %v2265_v23 = vadd.f32 %v4976_v0, %v2264_v34  ;;  %v2295_v20 = vadd.f32 %v4976_v0, %v2294_v53 }
 0x311   : > { %v2336_v22 = vmax.f32 %v2265_v23, 0.0  ;;  %v2348_v60 = vmax.f32 %v2295_v20, 0.0 }
 0x313   : > { %v2384_v19 = vpack.c.bf16 %v2336_v22, %v2336_v22  ;;  %v2396_v8 = vpack.c.bf16 %v2348_v60, %v2348_v60 }
 0x315   : > { %2433 = vst.msk [vmem:[%s4991_s11 + $0x80] sm:$0xf] %vm2400_vm1, %v2384_v19 }
 0x316   : > { %2445 = vst.msk [vmem:[%s4991_s11 + $0xb0] sm:$0xf] %vm2400_vm1, %v2396_v8  ;;  %v2266_v58 = vpop.f32.mrf.mxu2  ;;  %v2296_v35 = vpop.f32.mrf.mxu3 }
 0x317   : > { %v2267_v9 = vadd.f32 %v4976_v0, %v2266_v58  ;;  %v2297_v46 = vadd.f32 %v4976_v0, %v2296_v35 }
 0x319   : > { %v2337_v24 = vmax.f32 %v2267_v9, 0.0  ;;  %v2349_v36 = vmax.f32 %v2297_v46, 0.0  ;;  %v2204_v6 = vpop.f32.mrf.mxu0 }
 0x31a   : > { %v2205_v14 = vadd.f32 %v4976_v0, %v2204_v6 }
 0x31b   : > { %v2385_v7 = vpack.c.bf16 %v2337_v24, %v2337_v24  ;;  %v2397_v42 = vpack.c.bf16 %v2349_v36, %v2349_v36 }
 0x31c   : > { %v2533_v63 = vld [vmem:[%s4991_s11 + $0x80] sm:$0xf]  ;;  %v2312_v1 = vmax.f32 %v2205_v14, 0.0 }
 0x31d   : > { %v2534_v30 = vsel %vm5119_vm6, 0, %v2533_v63  ;;  %v2545_v33 = vld [vmem:[%s4991_s11 + $0xb0] sm:$0xf]  ;;  %2434 = vst.msk [vmem:[%s4991_s11 + $0x84] sm:$0xf] %vm2400_vm1, %v2385_v7 }
 0x31e   : > { %2535 = vst [vmem:[%s4991_s11 + $0x80] sm:$0xf] %v2534_v30  ;;  %v2546_v55 = vsel %vm5119_vm6, 0, %v2545_v33  ;;  %v2269_v50 = vpop.f32.mrf.mxu2  ;;  %v2360_v41 = vpack.c.bf16 %v2312_v1, %v2312_v1 }
 0x31f   : > { %2547 = vst [vmem:[%s4991_s11 + $0xb0] sm:$0xf] %v2546_v55  ;;  %v2270_v16 = vadd.f32 %v4976_v0, %v2269_v50 }
 0x320   : > { %2446 = vst.msk [vmem:[%s4991_s11 + $0xb4] sm:$0xf] %vm2400_vm1, %v2397_v42  ;;  %v2234_v2 = vpop.f32.mrf.mxu1 }
 0x321   : > { %2409 = vst.msk [vmem:[%s4991_s11 + $0x20] sm:$0xf] %vm2400_vm1, %v2360_v41  ;;  %v2338_v56 = vmax.f32 %v2270_v16, 0.0  ;;  %v2235_v40 = vadd.f32 %v4976_v0, %v2234_v2  ;;  %v2206_v26 = vpop.f32.mrf.mxu0 }
 0x322   : > { %v2207_v39 = vadd.f32 %v4976_v0, %v2206_v26 }
 0x323   : > { %v2386_v29 = vpack.c.bf16 %v2338_v56, %v2338_v56  ;;  %v2324_v59 = vmax.f32 %v2235_v40, 0.0 }
 0x324   : > { %v2485_v15 = vld [vmem:[%s4991_s11 + $0x84] sm:$0x1]  ;;  %v2313_v4 = vmax.f32 %v2207_v39, 0.0 }
 0x325   : > { %v2486_v11 = vsel %vm5001_vm4, 0, %v2485_v15  ;;  %2435 = vst.msk [vmem:[%s4991_s11 + $0x88] sm:$0xf] %vm2400_vm1, %v2386_v29  ;;  %v2372_v47 = vpack.c.bf16 %v2324_v59, %v2324_v59 }
 0x326   : > { %2487 = vst [vmem:[%s4991_s11 + $0x84] sm:$0x1] %v2486_v11  ;;  %v2271_v48 = vpop.f32.mrf.mxu2  ;;  %v2361_v62 = vpack.c.bf16 %v2313_v4, %v2313_v4 }
 0x327   : > { %v2497_v38 = vld [vmem:[%s4991_s11 + $0xb4] sm:$0x1]  ;;  %2421 = vst.msk [vmem:[%s4991_s11 + $0x50] sm:$0xf] %vm2400_vm1, %v2372_v47  ;;  %v2272_v31 = vadd.f32 %v4976_v0, %v2271_v48 }
 0x328   : > { %v2498_v61 = vsel %vm5001_vm4, 0, %v2497_v38  ;;  %v2509_v17 = vld [vmem:[%s4991_s11 + $0x20] sm:$0xf]  ;;  %v2236_v54 = vpop.f32.mrf.mxu1  ;;  %2410 = vst.msk [vmem:[%s4991_s11 + $0x24] sm:$0xf] %vm2400_vm1, %v2361_v62 }
 0x329   : > { %2499 = vst [vmem:[%s4991_s11 + $0xb4] sm:$0x1] %v2498_v61  ;;  %v2510_v5 = vsel %vm5119_vm6, 0, %v2509_v17  ;;  %v2339_v37 = vmax.f32 %v2272_v31, 0.0  ;;  %v2237_v25 = vadd.f32 %v4976_v0, %v2236_v54  ;;  %v2209_v3 = vpop.f32.mrf.mxu0 }
 0x32a   : > { %2511 = vst [vmem:[%s4991_s11 + $0x20] sm:$0xf] %v2510_v5  ;;  %v2210_v27 = vadd.f32 %v4976_v0, %v2209_v3 }
 0x32b   : > { %v2387_v51 = vpack.c.bf16 %v2339_v37, %v2339_v37  ;;  %v2325_v28 = vmax.f32 %v2237_v25, 0.0 }
 0x32c   : > { %v2314_v13 = vmax.f32 %v2210_v27, 0.0 }
 0x32d   : > { %2436 = vst.msk [vmem:[%s4991_s11 + $0x8c] sm:$0xf] %vm2400_vm1, %v2387_v51  ;;  %v2373_v10 = vpack.c.bf16 %v2325_v28, %v2325_v28 }
 0x32e   : > { %v2521_v43 = vld [vmem:[%s4991_s11 + $0x50] sm:$0xf]  ;;  %v2362_v12 = vpack.c.bf16 %v2314_v13, %v2314_v13 }
 0x32f   : > { %v2522_v45 = vsel %vm5119_vm6, 0, %v2521_v43  ;;  %2422 = vst.msk [vmem:[%s4991_s11 + $0x54] sm:$0xf] %vm2400_vm1, %v2373_v10  ;;  %v2461_v32 = vld [vmem:[%s4991_s11 + $0x24] sm:$0x1] }
 0x330   : > { %2523 = vst [vmem:[%s4991_s11 + $0x50] sm:$0xf] %v2522_v45  ;;  %v2299_v52 = vpop.f32.mrf.mxu3  ;;  %v2239_v44 = vpop.f32.mrf.mxu1  ;;  %v2462_v53 = vsel %vm5001_vm4, 0, %v2461_v32 }
 0x331   : > { %2411 = vst.msk [vmem:[%s4991_s11 + $0x28] sm:$0xf] %vm2400_vm1, %v2362_v12  ;;  %v2300_v18 = vadd.f32 %v4976_v0, %v2299_v52  ;;  %v2240_v49 = vadd.f32 %v4976_v0, %v2239_v44  ;;  %v2211_v34 = vpop.f32.mrf.mxu0 }
 0x332   : > { %v2212_v22 = vadd.f32 %v4976_v0, %v2211_v34  ;;  %2463 = vst [vmem:[%s4991_s11 + $0x24] sm:$0x1] %v2462_v53 }
 0x333   : > { %v2350_v23 = vmax.f32 %v2300_v18, 0.0  ;;  %v2326_v20 = vmax.f32 %v2240_v49, 0.0 }
 0x334   : > { %v2536_v60 = vld [vmem:[%s4991_s11 + $0x8c] sm:$0xf]  ;;  %v2315_v35 = vmax.f32 %v2212_v22, 0.0 }
 0x335   : > { %v2537_v19 = vsel %vm5119_vm6, 0, %v2536_v60  ;;  %v2398_v8 = vpack.c.bf16 %v2350_v23, %v2350_v23  ;;  %v2374_v58 = vpack.c.bf16 %v2326_v20, %v2326_v20 }
 0x336   : > { %2538 = vst [vmem:[%s4991_s11 + $0x8c] sm:$0xf] %v2537_v19  ;;  %v2473_v9 = vld [vmem:[%s4991_s11 + $0x54] sm:$0x1]  ;;  %v2363_v24 = vpack.c.bf16 %v2315_v35, %v2315_v35 }
 0x337   : > { %v2474_v46 = vsel %vm5001_vm4, 0, %v2473_v9  ;;  %2447 = vst.msk [vmem:[%s4991_s11 + $0xb8] sm:$0xf] %vm2400_vm1, %v2398_v8 }
 0x338   : > { %2475 = vst [vmem:[%s4991_s11 + $0x54] sm:$0x1] %v2474_v46  ;;  %v2301_v36 = vpop.f32.mrf.mxu3  ;;  %v2241_v6 = vpop.f32.mrf.mxu1 }
 0x339   : > { %2423 = vst.msk [vmem:[%s4991_s11 + $0x58] sm:$0xf] %vm2400_vm1, %v2374_v58  ;;  %v2302_v7 = vadd.f32 %v4976_v0, %v2301_v36  ;;  %v2242_v14 = vadd.f32 %v4976_v0, %v2241_v6 }
 0x33a   : > { %2412 = vst.msk [vmem:[%s4991_s11 + $0x2c] sm:$0xf] %vm2400_vm1, %v2363_v24 }
 0x33b   : > { %v2351_v57 = vmax.f32 %v2302_v7, 0.0  ;;  %v2327_v63 = vmax.f32 %v2242_v14, 0.0 }
 0x33d   : > { %v2399_v42 = vpack.c.bf16 %v2351_v57, %v2351_v57  ;;  %v2375_v30 = vpack.c.bf16 %v2327_v63, %v2327_v63 }
 0x33f   : > { %2448 = vst.msk [vmem:[%s4991_s11 + $0xbc] sm:$0xf] %vm2400_vm1, %v2399_v42 }
 0x340   : > { %2424 = vst.msk [vmem:[%s4991_s11 + $0x5c] sm:$0xf] %vm2400_vm1, %v2375_v30 }
 0x341   : > { %v2512_v0 = vld [vmem:[%s4991_s11 + $0x2c] sm:$0xf] }
 0x342   : > { %v2513_v33 = vsel %vm5119_vm6, 0, %v2512_v0 }
 0x343   : > { %2514 = vst [vmem:[%s4991_s11 + $0x2c] sm:$0xf] %v2513_v33 }
 0x346   : > { %v2548_v1 = vld [vmem:[%s4991_s11 + $0xbc] sm:$0xf] }
 0x347   : > { %v2549_v55 = vsel %vm5119_vm6, 0, %v2548_v1  ;;  %v2524_v50 = vld [vmem:[%s4991_s11 + $0x5c] sm:$0xf] }
 0x348   : > { %2550 = vst [vmem:[%s4991_s11 + $0xbc] sm:$0xf] %v2549_v55  ;;  %v2525_v41 = vsel %vm5119_vm6, 0, %v2524_v50 }
 0x349   : > { %2526 = vst [vmem:[%s4991_s11 + $0x5c] sm:$0xf] %v2525_v41 }
 0x34a   : > { %2988 = shalt.err (!%p2985_p5)
}
 0x34b   : > { %s3051_s7 = smov 64   ;;  %s3052_s9 = smov 4  }
 0x34c   : > { %2870 = dma.vmem_to_hbm [thread:$0]  (%p3123_p4), %s2568_s1, 3072, %s2570_s16, %s2552_s17, %s3051_s7, %s3051_s7, %s3052_s9  }
 0x34d PF: > { %p2876_p6 = scmp.ge.s32.totalorder %s3039_s21, 2  ;;  %s2584_s10 = sand.u32 1, %s3019_s18  }
 0x34e   : > { %s2585_s11 = scalar_lea.sflag [#allocation3], %s2584_s10 }
 0x34f   : > { %p2873_p7 = pnand %p2876_p6, %p3130_p8 }
 0x351   : > { %p2874_p9 = pneg %p2873_p7 }
 0x353   : > { %3014 = dma.done.wait (%p2874_p9), %s2585_s11, 3072  }
 0x354   : > { %3016 = vsyncadd (%p2874_p9), %s2585_s11, 4294964224  ;;  %s18_s21 = sadd.s32 1, %s3039_s21   ;;  %s5739_s18 = smov %s3023_s19 }
 0x355   : > { %p15_p10 = scmp.ge.s32.totalorder %s18_s21, 4   ;;  %s5740_s19 = smov %s3027_s20 }
 0x356   : > { %s5741_s20 = smov %s3136_s29  ;;  %s5742_s1 = smov %s3035_s2 }
 0x357   : > { %s5743_s2 = smov %s5745_s24  ;;  %17 = sbr.rel (!%p15_p10) target bundleno = 4 (0x4), region = 81 }
 0x35c   :  { %2591 = vsyncpa [#allocation3], 1 }
 0x35d   :  { %2593 = vsyncpa [#allocation3 + $0x1], 1 }

</bundles_post_ra>
